<compile_context>
chip_gen: v7x
topology: tpu7x:2x2x1
jax: 0.10.0
libtpu: 0.0.40
codegen_flags: <defaults>
</compile_context>

<pallas_src>
import functools

import jax
import jax.numpy as jnp
from jax.experimental import pallas as pl
from jax.experimental.pallas import tpu as pltpu


# ----------------------------------------------------------------------------
# Fused kernel: conv1+bn1+relu -> conv2+bn2 -> SE -> +identity -> relu
# ----------------------------------------------------------------------------
def _se_basic_block_kernel(x_ref, w1_ref, b1_ref, w2_ref, b2_ref,
                           sw1t_ref, sb1_ref, sw2_ref, sb2_ref,
                           o_ref, pad_ref, patch_ref, *, H, W, C, Z):
    # x_ref:    (1, H*W, C) f32   flat NHWC activation (channels innermost)
    # w1/w2:    (9*C, C)    bf16  HWIO conv weights with folded BN scale
    # b1/b2:    (1, C)      f32   folded BN bias
    # sw1t:(Cr,C) sb1:(Cr,1) sw2:(Cr,C) sb2:(1,C)   f32  SE FC params
    # o_ref:    (1, H*W, C) f32
    # pad_ref:  (2*Z + H*W, C) bf16 VMEM  flat padded activation (reused by both convs)
    # patch_ref:(H*W, 9*C)     bf16 VMEM  im2col patch (reused by both convs)
    HW = H * W

    # Zero ONLY the top/bottom halo rows (interior fully overwritten each conv).
    pad_ref[0:Z, :] = jnp.zeros((Z, C), jnp.bfloat16)
    pad_ref[Z + HW:2 * Z + HW, :] = jnp.zeros((Z, C), jnp.bfloat16)

    def conv3x3(src_f32, w_ref, b_ref):
        # single bf16 cast + sublane-aligned interior store
        pad_ref[Z:Z + HW, :] = src_f32.astype(jnp.bfloat16)

        # masks for the horizontal (W) image border in the flat layout
        col = jax.lax.broadcasted_iota(jnp.int32, (HW, C), 0) % W
        not_left = col > 0           # tap looking one pixel LEFT is invalid at w == 0
        not_right = col < (W - 1)    # tap looking one pixel RIGHT is invalid at w == W-1

        # im2col: each tap is a sublane(row)-shifted slice of the flat pad buffer,
        # written straight into the bf16 patch scratch (no relayout, no concat).
        for kh in range(3):
            for kw in range(3):
                start = Z + (kh - 1) * W + (kw - 1)
                tap = pad_ref[start:start + HW, :]            # (H*W, C) bf16
                if kw == 0:
                    tap = jnp.where(not_left, tap, jnp.zeros_like(tap))
                elif kw == 2:
                    tap = jnp.where(not_right, tap, jnp.zeros_like(tap))
                t = 3 * kh + kw
                patch_ref[:, t * C:(t + 1) * C] = tap

        # one MXU matmul with K = 9*C, f32 accumulation, + folded BN bias
        return jnp.dot(patch_ref[...], w_ref[...],
                       preferred_element_type=jnp.float32) + b_ref[...]

    # conv1 + bn1 + ReLU
    a1 = jnp.maximum(conv3x3(x_ref[0], w1_ref, b1_ref), 0.0)     # (H*W, C) f32
    # conv2 + bn2
    a2 = conv3x3(a1, w2_ref, b2_ref)                              # (H*W, C) f32

    # SE: global average pool -> FC(C->Cr) -> ReLU -> FC(Cr->C) -> sigmoid.
    # Tiny FCs computed on the VPU (broadcast multiply + reduce), not the MXU.
    m = jnp.mean(a2, axis=0, keepdims=True)                       # (1, C)
    h = jnp.maximum(
        jnp.sum(m * sw1t_ref[...], axis=1, keepdims=True) + sb1_ref[...], 0.0)   # (Cr, 1)
    s = jax.nn.sigmoid(
        jnp.sum(h * sw2_ref[...], axis=0, keepdims=True) + sb2_ref[...])         # (1, C)

    # channel scale (broadcast over sublanes), residual add (re-read resident
    # input block instead of keeping it live), final ReLU.
    o_ref[0] = jnp.maximum(a2 * s + x_ref[0], 0.0)


def _fused_se_basic_block(x_flat, w1, b1, w2, b2, sw1t, sb1, sw2, sb2,
                          *, H, W, C, Cr):
    N = x_flat.shape[0]
    HW = H * W
    # halo rows above/below the image, rounded up to the bf16 sublane tile (16)
    Z = ((W + 1 + 15) // 16) * 16
    kernel = functools.partial(_se_basic_block_kernel, H=H, W=W, C=C, Z=Z)
    return pl.pallas_call(
        kernel,
        out_shape=jax.ShapeDtypeStruct((N, HW, C), jnp.float32),
        grid_spec=pltpu.PrefetchScalarGridSpec(
            num_scalar_prefetch=0,
            grid=(N,),
            in_specs=[
                pl.BlockSpec((1, HW, C), lambda n: (n, 0, 0)),    # x (flat pixel rows)
                pl.BlockSpec((9 * C, C), lambda n: (0, 0)),       # w1 (bf16, BN folded)
                pl.BlockSpec((1, C), lambda n: (0, 0)),           # b1
                pl.BlockSpec((9 * C, C), lambda n: (0, 0)),       # w2 (bf16, BN folded)
                pl.BlockSpec((1, C), lambda n: (0, 0)),           # b2
                pl.BlockSpec((Cr, C), lambda n: (0, 0)),          # se w1^T
                pl.BlockSpec((Cr, 1), lambda n: (0, 0)),          # se b1 (column)
                pl.BlockSpec((Cr, C), lambda n: (0, 0)),          # se w2
                pl.BlockSpec((1, C), lambda n: (0, 0)),           # se b2
            ],
            out_specs=pl.BlockSpec((1, HW, C), lambda n: (n, 0, 0)),
            scratch_shapes=[
                pltpu.VMEM((2 * Z + HW, C), jnp.bfloat16),        # flat padded activation
                pltpu.VMEM((HW, 9 * C), jnp.bfloat16),            # im2col patch
            ],
        ),
        compiler_params=pltpu.CompilerParams(
            dimension_semantics=("parallel",),
            vmem_limit_bytes=48 * 1024 * 1024,                    # fits v7x's 64 MiB VMEM
        ),
    )(x_flat, w1, b1, w2, b2, sw1t, sb1, sw2, sb2)


# ----------------------------------------------------------------------------
# Parameter construction / BN folding / wrapper
# ----------------------------------------------------------------------------
def fold_bn(gamma, beta, running_mean, running_var, eps=1e-5):
    scale = gamma / jnp.sqrt(running_var + eps)     # (C,)
    bias = beta - running_mean * scale              # (C,)
    return scale, bias


def init_params(key, inplanes, planes, reduction):
    ks = jax.random.split(key, 12)
    cr = planes // reduction
    return {
        # conv weights in HWIO (conceptually converted from PyTorch OIHW)
        "w1_conv": 0.1 * jax.random.normal(ks[0], (3, 3, inplanes, planes), jnp.float32),
        "w2_conv": 0.1 * jax.random.normal(ks[1], (3, 3, planes, planes), jnp.float32),
        # bn1
        "bn1_gamma": 1.0 + 0.1 * jax.random.normal(ks[2], (planes,), jnp.float32),
        "bn1_beta": 0.1 * jax.random.normal(ks[3], (planes,), jnp.float32),
        "bn1_mean": 0.05 * jax.random.normal(ks[4], (planes,), jnp.float32),
        "bn1_var": 1.0 + 0.1 * jax.random.uniform(ks[5], (planes,), jnp.float32),
        # bn2
        "bn2_gamma": 1.0 + 0.1 * jax.random.normal(ks[6], (planes,), jnp.float32),
        "bn2_beta": 0.1 * jax.random.normal(ks[7], (planes,), jnp.float32),
        "bn2_mean": 0.05 * jax.random.normal(ks[8], (planes,), jnp.float32),
        "bn2_var": 1.0 + 0.1 * jax.random.uniform(ks[9], (planes,), jnp.float32),
        # SE (global-avg-pool -> FC -> ReLU -> FC -> sigmoid -> scale)
        "se_w1": 0.2 * jax.random.normal(ks[10], (planes, cr), jnp.float32),
        "se_b1": jnp.zeros((1, cr), jnp.float32),
        "se_w2": 0.2 * jax.random.normal(ks[11], (cr, planes), jnp.float32),
        "se_b2": jnp.zeros((1, planes), jnp.float32),
    }


def se_basic_block_forward(x_nhwc, params):
    """SEBasicBlock forward (stride=1, downsample=None), NHWC activations.

    Keeping activations NHWC / flat (N, H*W, C) across the model avoids the
    NCHW<->NHWC HBM transposes around the kernel; the math is identical to
    the PyTorch module's forward.
    """
    N, H, W, C = x_nhwc.shape
    planes = params["w1_conv"].shape[-1]
    assert params["w1_conv"].shape[2] == planes == C, \
        "only stride=1, downsample=None, inplanes==planes is implemented"

    s1, b1 = fold_bn(params["bn1_gamma"], params["bn1_beta"],
                     params["bn1_mean"], params["bn1_var"])
    s2, b2 = fold_bn(params["bn2_gamma"], params["bn2_beta"],
                     params["bn2_mean"], params["bn2_var"])

    # fold BN scale into conv weights, reshape HWIO -> (9*Cin, Cout), cast bf16
    w1 = (params["w1_conv"] * s1).reshape(9 * C, C).astype(jnp.bfloat16)
    w2 = (params["w2_conv"] * s2).reshape(9 * C, C).astype(jnp.bfloat16)
    b1 = b1[None, :].astype(jnp.float32)
    b2 = b2[None, :].astype(jnp.float32)

    sw1t = params["se_w1"].T.astype(jnp.float32)               # (Cr, C)
    sb1 = params["se_b1"].reshape(-1, 1).astype(jnp.float32)   # (Cr, 1)
    sw2 = params["se_w2"].astype(jnp.float32)                  # (Cr, C)
    sb2 = params["se_b2"].astype(jnp.float32)                  # (1, C)
    Cr = sw1t.shape[0]

    x_flat = x_nhwc.reshape(N, H * W, C).astype(jnp.float32)   # pure reshape, no transpose
    out_flat = _fused_se_basic_block(x_flat, w1, b1, w2, b2, sw1t, sb1, sw2, sb2,
                                     H=H, W=W, C=C, Cr=Cr)
    return out_flat.reshape(N, H, W, C)


# ----------------------------------------------------------------------------
# Pure-JAX reference at matching precision (bf16 conv operands, f32 accumulate)
# ----------------------------------------------------------------------------
def _reference_forward(x_nhwc, params):
    s1, b1 = fold_bn(params["bn1_gamma"], params["bn1_beta"],
                     params["bn1_mean"], params["bn1_var"])
    s2, b2 = fold_bn(params["bn2_gamma"], params["bn2_beta"],
                     params["bn2_mean"], params["bn2_var"])
    w1 = (params["w1_conv"] * s1).astype(jnp.bfloat16)
    w2 = (params["w2_conv"] * s2).astype(jnp.bfloat16)
    dn = jax.lax.conv_dimension_numbers(x_nhwc.shape, w1.shape,
                                        ("NHWC", "HWIO", "NHWC"))
    a1 = jax.lax.conv_general_dilated(
        x_nhwc.astype(jnp.bfloat16), w1, (1, 1), "SAME",
        dimension_numbers=dn, preferred_element_type=jnp.float32) + b1
    a1 = jnp.maximum(a1, 0.0)
    a2 = jax.lax.conv_general_dilated(
        a1.astype(jnp.bfloat16), w2, (1, 1), "SAME",
        dimension_numbers=dn, preferred_element_type=jnp.float32) + b2
    m = jnp.mean(a2, axis=(1, 2))                                  # (N, C)
    h = jnp.maximum(m @ params["se_w1"] + params["se_b1"], 0.0)    # (N, Cr)
    s = jax.nn.sigmoid(h @ params["se_w2"] + params["se_b2"])      # (N, C)
    return jnp.maximum(a2 * s[:, None, None, :] + x_nhwc, 0.0)


if __name__ == "__main__":
    # small shapes consistent with the module (reduction=16 => channels >= 16)
    N, H, W, C = 2, 16, 16, 32
    reduction = 16

    key = jax.random.PRNGKey(0)
    kx, kp = jax.random.split(key)
    x = jax.random.normal(kx, (N, H, W, C), jnp.float32)     # NHWC, no transposes needed
    params = init_params(kp, C, C, reduction)

    out = jax.block_until_ready(se_basic_block_forward(x, params))
    assert out.shape == (N, H, W, C), out.shape
    assert bool(jnp.all(jnp.isfinite(out)))

    ref = jax.block_until_ready(_reference_forward(x, params))
    err = float(jnp.max(jnp.abs(out - ref)))
    assert err < 2e-2, f"max abs error vs reference: {err}"
    print("KERNEL_OK")
</pallas_src>

<mosaic_0001>
module attributes {stable_mosaic.version = 11 : i64} {
  func.func @_se_basic_block_kernel(%arg0: i32, %arg1: memref<1x256x32xf32, #tpu.memory_space<vmem>>, %arg2: memref<288x32xbf16, #tpu.memory_space<vmem>>, %arg3: memref<1x32xf32, #tpu.memory_space<vmem>>, %arg4: memref<288x32xbf16, #tpu.memory_space<vmem>>, %arg5: memref<1x32xf32, #tpu.memory_space<vmem>>, %arg6: memref<2x32xf32, #tpu.memory_space<vmem>>, %arg7: memref<2x1xf32, #tpu.memory_space<vmem>>, %arg8: memref<2x32xf32, #tpu.memory_space<vmem>>, %arg9: memref<1x32xf32, #tpu.memory_space<vmem>>, %arg10: memref<1x256x32xf32, #tpu.memory_space<vmem>>, %arg11: memref<320x32xbf16, #tpu.memory_space<vmem>>, %arg12: memref<256x288xbf16, #tpu.memory_space<vmem>>) attributes {dimension_semantics = [#tpu.dimension_semantics<parallel>], iteration_bounds = array<i64: 2>, scalar_prefetch = 0 : i64, scratch_operands = 2 : i64, tpu.core_type = #tpu.core_type<tc>, window_params = [{transform_indices = @transform_0, window_bounds = array<i64: 1, 256, 32>}, {pipeline_mode = #tpu.pipeline_mode<synchronous>, transform_indices = @transform_1, window_bounds = array<i64: 288, 32>}, {pipeline_mode = #tpu.pipeline_mode<synchronous>, transform_indices = @transform_2, window_bounds = array<i64: 1, 32>}, {pipeline_mode = #tpu.pipeline_mode<synchronous>, transform_indices = @transform_3, window_bounds = array<i64: 288, 32>}, {pipeline_mode = #tpu.pipeline_mode<synchronous>, transform_indices = @transform_4, window_bounds = array<i64: 1, 32>}, {pipeline_mode = #tpu.pipeline_mode<synchronous>, transform_indices = @transform_5, window_bounds = array<i64: 2, 32>}, {pipeline_mode = #tpu.pipeline_mode<synchronous>, transform_indices = @transform_6, window_bounds = array<i64: 2, 1>}, {pipeline_mode = #tpu.pipeline_mode<synchronous>, transform_indices = @transform_7, window_bounds = array<i64: 2, 32>}, {pipeline_mode = #tpu.pipeline_mode<synchronous>, transform_indices = @transform_8, window_bounds = array<i64: 1, 32>}, {transform_indices = @transform_9, window_bounds = array<i64: 1, 256, 32>}]} {
    %cst = arith.constant 0.000000e+00 : bf16
    %0 = vector.broadcast %cst : bf16 to vector<32x32xbf16>
    %c0 = arith.constant 0 : index
    %c0_0 = arith.constant 0 : index
    %1 = vector.load %arg11[%c0, %c0_0] : memref<320x32xbf16, #tpu.memory_space<vmem>>, vector<32x32xbf16>
    tpu.vector_store %arg11[%c0, %c0_0], %0 {strides = array<i32>} : memref<320x32xbf16, #tpu.memory_space<vmem>>, vector<32x32xbf16>,
    %cst_1 = arith.constant 0.000000e+00 : bf16
    %2 = vector.broadcast %cst_1 : bf16 to vector<32x32xbf16>
    %c288 = arith.constant 288 : index
    %c0_2 = arith.constant 0 : index
    %3 = vector.load %arg11[%c288, %c0_2] : memref<320x32xbf16, #tpu.memory_space<vmem>>, vector<32x32xbf16>
    tpu.vector_store %arg11[%c288, %c0_2], %2 {strides = array<i32>} : memref<320x32xbf16, #tpu.memory_space<vmem>>, vector<32x32xbf16>,
    %c0_3 = arith.constant 0 : index
    %c0_4 = arith.constant 0 : index
    %c0_5 = arith.constant 0 : index
    %4 = vector.load %arg1[%c0_3, %c0_4, %c0_5] : memref<1x256x32xf32, #tpu.memory_space<vmem>>, vector<1x256x32xf32>
    %5 = vector.shape_cast %4 : vector<1x256x32xf32> to vector<256x32xf32>
    %6 = arith.truncf %5 : vector<256x32xf32> to vector<256x32xbf16>
    %c32 = arith.constant 32 : index
    %c0_6 = arith.constant 0 : index
    %7 = vector.load %arg11[%c32, %c0_6] : memref<320x32xbf16, #tpu.memory_space<vmem>>, vector<256x32xbf16>
    tpu.vector_store %arg11[%c32, %c0_6], %6 {strides = array<i32>} : memref<320x32xbf16, #tpu.memory_space<vmem>>, vector<256x32xbf16>,
    %8 = tpu.iota {dimensions = array<i32: 0>} : vector<256x32xi32>
    %c16_i32 = arith.constant 16 : i32
    %c0_i32 = arith.constant 0 : i32
    %9 = arith.cmpi eq, %c16_i32, %c0_i32 : i32
    %c1_i32 = arith.constant 1 : i32
    %10 = arith.select %9, %c1_i32, %c16_i32 : i32
    %11 = vector.broadcast %10 : i32 to vector<256x32xi32>
    %12 = arith.remsi %8, %11 : vector<256x32xi32>
    %c0_i32_7 = arith.constant 0 : i32
    %13 = vector.broadcast %c0_i32_7 : i32 to vector<256x32xi32>
    %14 = arith.cmpi ne, %12, %13 : vector<256x32xi32>
    %c0_i32_8 = arith.constant 0 : i32
    %15 = vector.broadcast %c0_i32_8 : i32 to vector<256x32xi32>
    %16 = arith.cmpi slt, %12, %15 : vector<256x32xi32>
    %c0_i32_9 = arith.constant 0 : i32
    %17 = arith.cmpi slt, %10, %c0_i32_9 : i32
    %18 = vector.broadcast %17 : i1 to vector<256x32xi1>
    %19 = vector.broadcast %18 : vector<256x32xi1> to vector<256x32xi1>
    %20 = arith.xori %16, %19 : vector<256x32xi1>
    %21 = arith.andi %20, %14 : vector<256x32xi1>
    %22 = vector.broadcast %10 : i32 to vector<256x32xi32>
    %23 = arith.addi %12, %22 : vector<256x32xi32>
    %24 = arith.select %21, %23, %12 : vector<256x32xi1>, vector<256x32xi32>
    %c0_i32_10 = arith.constant 0 : i32
    %25 = vector.broadcast %c0_i32_10 : i32 to vector<256x32xi32>
    %26 = arith.cmpi sgt, %24, %25 : vector<256x32xi32>
    %c15_i32 = arith.constant 15 : i32
    %27 = vector.broadcast %c15_i32 : i32 to vector<256x32xi32>
    %28 = arith.cmpi slt, %24, %27 : vector<256x32xi32>
    %c15 = arith.constant 15 : index
    %c0_11 = arith.constant 0 : index
    %29 = vector.load %arg11[%c15, %c0_11] : memref<320x32xbf16, #tpu.memory_space<vmem>>, vector<256x32xbf16>
    %cst_12 = arith.constant 0.000000e+00 : bf16
    %30 = vector.broadcast %cst_12 : bf16 to vector<256x32xbf16>
    %31 = arith.select %26, %29, %30 : vector<256x32xi1>, vector<256x32xbf16>
    %c0_13 = arith.constant 0 : index
    %c0_14 = arith.constant 0 : index
    %32 = vector.load %arg12[%c0_13, %c0_14] : memref<256x288xbf16, #tpu.memory_space<vmem>>, vector<256x32xbf16>
    tpu.vector_store %arg12[%c0_13, %c0_14], %31 {strides = array<i32>} : memref<256x288xbf16, #tpu.memory_space<vmem>>, vector<256x32xbf16>,
    %c16 = arith.constant 16 : index
    %c0_15 = arith.constant 0 : index
    %33 = vector.load %arg11[%c16, %c0_15] : memref<320x32xbf16, #tpu.memory_space<vmem>>, vector<256x32xbf16>
    %c0_16 = arith.constant 0 : index
    %c32_17 = arith.constant 32 : index
    %34 = vector.load %arg12[%c0_16, %c32_17] : memref<256x288xbf16, #tpu.memory_space<vmem>>, vector<256x32xbf16>
    tpu.vector_store %arg12[%c0_16, %c32_17], %33 {strides = array<i32>} : memref<256x288xbf16, #tpu.memory_space<vmem>>, vector<256x32xbf16>,
    %c17 = arith.constant 17 : index
    %c0_18 = arith.constant 0 : index
    %35 = vector.load %arg11[%c17, %c0_18] : memref<320x32xbf16, #tpu.memory_space<vmem>>, vector<256x32xbf16>
    %cst_19 = arith.constant 0.000000e+00 : bf16
    %36 = vector.broadcast %cst_19 : bf16 to vector<256x32xbf16>
    %37 = arith.select %28, %35, %36 : vector<256x32xi1>, vector<256x32xbf16>
    %c0_20 = arith.constant 0 : index
    %c64 = arith.constant 64 : index
    %38 = vector.load %arg12[%c0_20, %c64] : memref<256x288xbf16, #tpu.memory_space<vmem>>, vector<256x32xbf16>
    tpu.vector_store %arg12[%c0_20, %c64], %37 {strides = array<i32>} : memref<256x288xbf16, #tpu.memory_space<vmem>>, vector<256x32xbf16>,
    %c31 = arith.constant 31 : index
    %c0_21 = arith.constant 0 : index
    %39 = vector.load %arg11[%c31, %c0_21] : memref<320x32xbf16, #tpu.memory_space<vmem>>, vector<256x32xbf16>
    %cst_22 = arith.constant 0.000000e+00 : bf16
    %40 = vector.broadcast %cst_22 : bf16 to vector<256x32xbf16>
    %41 = arith.select %26, %39, %40 : vector<256x32xi1>, vector<256x32xbf16>
    %c0_23 = arith.constant 0 : index
    %c96 = arith.constant 96 : index
    %42 = vector.load %arg12[%c0_23, %c96] : memref<256x288xbf16, #tpu.memory_space<vmem>>, vector<256x32xbf16>
    tpu.vector_store %arg12[%c0_23, %c96], %41 {strides = array<i32>} : memref<256x288xbf16, #tpu.memory_space<vmem>>, vector<256x32xbf16>,
    %c32_24 = arith.constant 32 : index
    %c0_25 = arith.constant 0 : index
    %43 = vector.load %arg11[%c32_24, %c0_25] : memref<320x32xbf16, #tpu.memory_space<vmem>>, vector<256x32xbf16>
    %c0_26 = arith.constant 0 : index
    %c128 = arith.constant 128 : index
    %44 = vector.load %arg12[%c0_26, %c128] : memref<256x288xbf16, #tpu.memory_space<vmem>>, vector<256x32xbf16>
    tpu.vector_store %arg12[%c0_26, %c128], %43 {strides = array<i32>} : memref<256x288xbf16, #tpu.memory_space<vmem>>, vector<256x32xbf16>,
    %c33 = arith.constant 33 : index
    %c0_27 = arith.constant 0 : index
    %45 = vector.load %arg11[%c33, %c0_27] : memref<320x32xbf16, #tpu.memory_space<vmem>>, vector<256x32xbf16>
    %cst_28 = arith.constant 0.000000e+00 : bf16
    %46 = vector.broadcast %cst_28 : bf16 to vector<256x32xbf16>
    %47 = arith.select %28, %45, %46 : vector<256x32xi1>, vector<256x32xbf16>
    %c0_29 = arith.constant 0 : index
    %c160 = arith.constant 160 : index
    %48 = vector.load %arg12[%c0_29, %c160] : memref<256x288xbf16, #tpu.memory_space<vmem>>, vector<256x32xbf16>
    tpu.vector_store %arg12[%c0_29, %c160], %47 {strides = array<i32>} : memref<256x288xbf16, #tpu.memory_space<vmem>>, vector<256x32xbf16>,
    %c47 = arith.constant 47 : index
    %c0_30 = arith.constant 0 : index
    %49 = vector.load %arg11[%c47, %c0_30] : memref<320x32xbf16, #tpu.memory_space<vmem>>, vector<256x32xbf16>
    %cst_31 = arith.constant 0.000000e+00 : bf16
    %50 = vector.broadcast %cst_31 : bf16 to vector<256x32xbf16>
    %51 = arith.select %26, %49, %50 : vector<256x32xi1>, vector<256x32xbf16>
    %c0_32 = arith.constant 0 : index
    %c192 = arith.constant 192 : index
    %52 = vector.load %arg12[%c0_32, %c192] : memref<256x288xbf16, #tpu.memory_space<vmem>>, vector<256x32xbf16>
    tpu.vector_store %arg12[%c0_32, %c192], %51 {strides = array<i32>} : memref<256x288xbf16, #tpu.memory_space<vmem>>, vector<256x32xbf16>,
    %c48 = arith.constant 48 : index
    %c0_33 = arith.constant 0 : index
    %53 = vector.load %arg11[%c48, %c0_33] : memref<320x32xbf16, #tpu.memory_space<vmem>>, vector<256x32xbf16>
    %c0_34 = arith.constant 0 : index
    %c224 = arith.constant 224 : index
    %54 = vector.load %arg12[%c0_34, %c224] : memref<256x288xbf16, #tpu.memory_space<vmem>>, vector<256x32xbf16>
    tpu.vector_store %arg12[%c0_34, %c224], %53 {strides = array<i32>} : memref<256x288xbf16, #tpu.memory_space<vmem>>, vector<256x32xbf16>,
    %c49 = arith.constant 49 : index
    %c0_35 = arith.constant 0 : index
    %55 = vector.load %arg11[%c49, %c0_35] : memref<320x32xbf16, #tpu.memory_space<vmem>>, vector<256x32xbf16>
    %cst_36 = arith.constant 0.000000e+00 : bf16
    %56 = vector.broadcast %cst_36 : bf16 to vector<256x32xbf16>
    %57 = arith.select %28, %55, %56 : vector<256x32xi1>, vector<256x32xbf16>
    %c0_37 = arith.constant 0 : index
    %c256 = arith.constant 256 : index
    %58 = vector.load %arg12[%c0_37, %c256] : memref<256x288xbf16, #tpu.memory_space<vmem>>, vector<256x32xbf16>
    tpu.vector_store %arg12[%c0_37, %c256], %57 {strides = array<i32>} : memref<256x288xbf16, #tpu.memory_space<vmem>>, vector<256x32xbf16>,
    %c0_38 = arith.constant 0 : index
    %c0_39 = arith.constant 0 : index
    %59 = vector.load %arg12[%c0_38, %c0_39] : memref<256x288xbf16, #tpu.memory_space<vmem>>, vector<256x288xbf16>
    %c0_40 = arith.constant 0 : index
    %c0_41 = arith.constant 0 : index
    %60 = vector.load %arg2[%c0_40, %c0_41] : memref<288x32xbf16, #tpu.memory_space<vmem>>, vector<288x32xbf16>
    %cst_42 = arith.constant dense<0.000000e+00> : vector<256x32xf32>
    %61 = tpu.matmul %59, %60, %cst_42 {dimension_numbers = #tpu.dot_dimension_numbers<[1], [0], [0], [1], [0, 0, 1, 1], [], []>} : vector<256x288xbf16>, vector<288x32xbf16>, vector<256x32xf32> -> vector<256x32xf32>
    %c0_43 = arith.constant 0 : index
    %c0_44 = arith.constant 0 : index
    %62 = vector.load %arg3[%c0_43, %c0_44] : memref<1x32xf32, #tpu.memory_space<vmem>>, vector<1x32xf32>
    %63 = vector.broadcast %62 : vector<1x32xf32> to vector<256x32xf32>
    %64 = arith.addf %61, %63 : vector<256x32xf32>
    %cst_45 = arith.constant 0.000000e+00 : f32
    %65 = vector.broadcast %cst_45 : f32 to vector<256x32xf32>
    %66 = arith.maximumf %64, %65 : vector<256x32xf32>
    %67 = arith.truncf %66 : vector<256x32xf32> to vector<256x32xbf16>
    %c32_46 = arith.constant 32 : index
    %c0_47 = arith.constant 0 : index
    %68 = vector.load %arg11[%c32_46, %c0_47] : memref<320x32xbf16, #tpu.memory_space<vmem>>, vector<256x32xbf16>
    tpu.vector_store %arg11[%c32_46, %c0_47], %67 {strides = array<i32>} : memref<320x32xbf16, #tpu.memory_space<vmem>>, vector<256x32xbf16>,
    %69 = tpu.iota {dimensions = array<i32: 0>} : vector<256x32xi32>
    %c16_i32_48 = arith.constant 16 : i32
    %c0_i32_49 = arith.constant 0 : i32
    %70 = arith.cmpi eq, %c16_i32_48, %c0_i32_49 : i32
    %c1_i32_50 = arith.constant 1 : i32
    %71 = arith.select %70, %c1_i32_50, %c16_i32_48 : i32
    %72 = vector.broadcast %71 : i32 to vector<256x32xi32>
    %73 = arith.remsi %69, %72 : vector<256x32xi32>
    %c0_i32_51 = arith.constant 0 : i32
    %74 = vector.broadcast %c0_i32_51 : i32 to vector<256x32xi32>
    %75 = arith.cmpi ne, %73, %74 : vector<256x32xi32>
    %c0_i32_52 = arith.constant 0 : i32
    %76 = vector.broadcast %c0_i32_52 : i32 to vector<256x32xi32>
    %77 = arith.cmpi slt, %73, %76 : vector<256x32xi32>
    %c0_i32_53 = arith.constant 0 : i32
    %78 = arith.cmpi slt, %71, %c0_i32_53 : i32
    %79 = vector.broadcast %78 : i1 to vector<256x32xi1>
    %80 = vector.broadcast %79 : vector<256x32xi1> to vector<256x32xi1>
    %81 = arith.xori %77, %80 : vector<256x32xi1>
    %82 = arith.andi %81, %75 : vector<256x32xi1>
    %83 = vector.broadcast %71 : i32 to vector<256x32xi32>
    %84 = arith.addi %73, %83 : vector<256x32xi32>
    %85 = arith.select %82, %84, %73 : vector<256x32xi1>, vector<256x32xi32>
    %c0_i32_54 = arith.constant 0 : i32
    %86 = vector.broadcast %c0_i32_54 : i32 to vector<256x32xi32>
    %87 = arith.cmpi sgt, %85, %86 : vector<256x32xi32>
    %c15_i32_55 = arith.constant 15 : i32
    %88 = vector.broadcast %c15_i32_55 : i32 to vector<256x32xi32>
    %89 = arith.cmpi slt, %85, %88 : vector<256x32xi32>
    %c15_56 = arith.constant 15 : index
    %c0_57 = arith.constant 0 : index
    %90 = vector.load %arg11[%c15_56, %c0_57] : memref<320x32xbf16, #tpu.memory_space<vmem>>, vector<256x32xbf16>
    %cst_58 = arith.constant 0.000000e+00 : bf16
    %91 = vector.broadcast %cst_58 : bf16 to vector<256x32xbf16>
    %92 = arith.select %87, %90, %91 : vector<256x32xi1>, vector<256x32xbf16>
    %c0_59 = arith.constant 0 : index
    %c0_60 = arith.constant 0 : index
    %93 = vector.load %arg12[%c0_59, %c0_60] : memref<256x288xbf16, #tpu.memory_space<vmem>>, vector<256x32xbf16>
    tpu.vector_store %arg12[%c0_59, %c0_60], %92 {strides = array<i32>} : memref<256x288xbf16, #tpu.memory_space<vmem>>, vector<256x32xbf16>,
    %c16_61 = arith.constant 16 : index
    %c0_62 = arith.constant 0 : index
    %94 = vector.load %arg11[%c16_61, %c0_62] : memref<320x32xbf16, #tpu.memory_space<vmem>>, vector<256x32xbf16>
    %c0_63 = arith.constant 0 : index
    %c32_64 = arith.constant 32 : index
    %95 = vector.load %arg12[%c0_63, %c32_64] : memref<256x288xbf16, #tpu.memory_space<vmem>>, vector<256x32xbf16>
    tpu.vector_store %arg12[%c0_63, %c32_64], %94 {strides = array<i32>} : memref<256x288xbf16, #tpu.memory_space<vmem>>, vector<256x32xbf16>,
    %c17_65 = arith.constant 17 : index
    %c0_66 = arith.constant 0 : index
    %96 = vector.load %arg11[%c17_65, %c0_66] : memref<320x32xbf16, #tpu.memory_space<vmem>>, vector<256x32xbf16>
    %cst_67 = arith.constant 0.000000e+00 : bf16
    %97 = vector.broadcast %cst_67 : bf16 to vector<256x32xbf16>
    %98 = arith.select %89, %96, %97 : vector<256x32xi1>, vector<256x32xbf16>
    %c0_68 = arith.constant 0 : index
    %c64_69 = arith.constant 64 : index
    %99 = vector.load %arg12[%c0_68, %c64_69] : memref<256x288xbf16, #tpu.memory_space<vmem>>, vector<256x32xbf16>
    tpu.vector_store %arg12[%c0_68, %c64_69], %98 {strides = array<i32>} : memref<256x288xbf16, #tpu.memory_space<vmem>>, vector<256x32xbf16>,
    %c31_70 = arith.constant 31 : index
    %c0_71 = arith.constant 0 : index
    %100 = vector.load %arg11[%c31_70, %c0_71] : memref<320x32xbf16, #tpu.memory_space<vmem>>, vector<256x32xbf16>
    %cst_72 = arith.constant 0.000000e+00 : bf16
    %101 = vector.broadcast %cst_72 : bf16 to vector<256x32xbf16>
    %102 = arith.select %87, %100, %101 : vector<256x32xi1>, vector<256x32xbf16>
    %c0_73 = arith.constant 0 : index
    %c96_74 = arith.constant 96 : index
    %103 = vector.load %arg12[%c0_73, %c96_74] : memref<256x288xbf16, #tpu.memory_space<vmem>>, vector<256x32xbf16>
    tpu.vector_store %arg12[%c0_73, %c96_74], %102 {strides = array<i32>} : memref<256x288xbf16, #tpu.memory_space<vmem>>, vector<256x32xbf16>,
    %c32_75 = arith.constant 32 : index
    %c0_76 = arith.constant 0 : index
    %104 = vector.load %arg11[%c32_75, %c0_76] : memref<320x32xbf16, #tpu.memory_space<vmem>>, vector<256x32xbf16>
    %c0_77 = arith.constant 0 : index
    %c128_78 = arith.constant 128 : index
    %105 = vector.load %arg12[%c0_77, %c128_78] : memref<256x288xbf16, #tpu.memory_space<vmem>>, vector<256x32xbf16>
    tpu.vector_store %arg12[%c0_77, %c128_78], %104 {strides = array<i32>} : memref<256x288xbf16, #tpu.memory_space<vmem>>, vector<256x32xbf16>,
    %c33_79 = arith.constant 33 : index
    %c0_80 = arith.constant 0 : index
    %106 = vector.load %arg11[%c33_79, %c0_80] : memref<320x32xbf16, #tpu.memory_space<vmem>>, vector<256x32xbf16>
    %cst_81 = arith.constant 0.000000e+00 : bf16
    %107 = vector.broadcast %cst_81 : bf16 to vector<256x32xbf16>
    %108 = arith.select %89, %106, %107 : vector<256x32xi1>, vector<256x32xbf16>
    %c0_82 = arith.constant 0 : index
    %c160_83 = arith.constant 160 : index
    %109 = vector.load %arg12[%c0_82, %c160_83] : memref<256x288xbf16, #tpu.memory_space<vmem>>, vector<256x32xbf16>
    tpu.vector_store %arg12[%c0_82, %c160_83], %108 {strides = array<i32>} : memref<256x288xbf16, #tpu.memory_space<vmem>>, vector<256x32xbf16>,
    %c47_84 = arith.constant 47 : index
    %c0_85 = arith.constant 0 : index
    %110 = vector.load %arg11[%c47_84, %c0_85] : memref<320x32xbf16, #tpu.memory_space<vmem>>, vector<256x32xbf16>
    %cst_86 = arith.constant 0.000000e+00 : bf16
    %111 = vector.broadcast %cst_86 : bf16 to vector<256x32xbf16>
    %112 = arith.select %87, %110, %111 : vector<256x32xi1>, vector<256x32xbf16>
    %c0_87 = arith.constant 0 : index
    %c192_88 = arith.constant 192 : index
    %113 = vector.load %arg12[%c0_87, %c192_88] : memref<256x288xbf16, #tpu.memory_space<vmem>>, vector<256x32xbf16>
    tpu.vector_store %arg12[%c0_87, %c192_88], %112 {strides = array<i32>} : memref<256x288xbf16, #tpu.memory_space<vmem>>, vector<256x32xbf16>,
    %c48_89 = arith.constant 48 : index
    %c0_90 = arith.constant 0 : index
    %114 = vector.load %arg11[%c48_89, %c0_90] : memref<320x32xbf16, #tpu.memory_space<vmem>>, vector<256x32xbf16>
    %c0_91 = arith.constant 0 : index
    %c224_92 = arith.constant 224 : index
    %115 = vector.load %arg12[%c0_91, %c224_92] : memref<256x288xbf16, #tpu.memory_space<vmem>>, vector<256x32xbf16>
    tpu.vector_store %arg12[%c0_91, %c224_92], %114 {strides = array<i32>} : memref<256x288xbf16, #tpu.memory_space<vmem>>, vector<256x32xbf16>,
    %c49_93 = arith.constant 49 : index
    %c0_94 = arith.constant 0 : index
    %116 = vector.load %arg11[%c49_93, %c0_94] : memref<320x32xbf16, #tpu.memory_space<vmem>>, vector<256x32xbf16>
    %cst_95 = arith.constant 0.000000e+00 : bf16
    %117 = vector.broadcast %cst_95 : bf16 to vector<256x32xbf16>
    %118 = arith.select %89, %116, %117 : vector<256x32xi1>, vector<256x32xbf16>
    %c0_96 = arith.constant 0 : index
    %c256_97 = arith.constant 256 : index
    %119 = vector.load %arg12[%c0_96, %c256_97] : memref<256x288xbf16, #tpu.memory_space<vmem>>, vector<256x32xbf16>
    tpu.vector_store %arg12[%c0_96, %c256_97], %118 {strides = array<i32>} : memref<256x288xbf16, #tpu.memory_space<vmem>>, vector<256x32xbf16>,
    %c0_98 = arith.constant 0 : index
    %c0_99 = arith.constant 0 : index
    %120 = vector.load %arg12[%c0_98, %c0_99] : memref<256x288xbf16, #tpu.memory_space<vmem>>, vector<256x288xbf16>
    %c0_100 = arith.constant 0 : index
    %c0_101 = arith.constant 0 : index
    %121 = vector.load %arg4[%c0_100, %c0_101] : memref<288x32xbf16, #tpu.memory_space<vmem>>, vector<288x32xbf16>
    %cst_102 = arith.constant dense<0.000000e+00> : vector<256x32xf32>
    %122 = tpu.matmul %120, %121, %cst_102 {dimension_numbers = #tpu.dot_dimension_numbers<[1], [0], [0], [1], [0, 0, 1, 1], [], []>} : vector<256x288xbf16>, vector<288x32xbf16>, vector<256x32xf32> -> vector<256x32xf32>
    %c0_103 = arith.constant 0 : index
    %c0_104 = arith.constant 0 : index
    %123 = vector.load %arg5[%c0_103, %c0_104] : memref<1x32xf32, #tpu.memory_space<vmem>>, vector<1x32xf32>
    %124 = vector.broadcast %123 : vector<1x32xf32> to vector<256x32xf32>
    %125 = arith.addf %122, %124 : vector<256x32xf32>
    %cst_105 = arith.constant dense<0.000000e+00> : vector<32xf32>
    %126 = vector.multi_reduction <add>, %125, %cst_105 [0] : vector<256x32xf32> to vector<32xf32>
    %127 = vector.shape_cast %126 : vector<32xf32> to vector<1x32xf32>
    %cst_106 = arith.constant 2.560000e+02 : f32
    %128 = vector.broadcast %cst_106 : f32 to vector<1x32xf32>
    %129 = arith.divf %127, %128 : vector<1x32xf32>
    %c0_107 = arith.constant 0 : index
    %c0_108 = arith.constant 0 : index
    %130 = vector.load %arg6[%c0_107, %c0_108] : memref<2x32xf32, #tpu.memory_space<vmem>>, vector<2x32xf32>
    %131 = vector.broadcast %129 : vector<1x32xf32> to vector<2x32xf32>
    %132 = arith.mulf %131, %130 : vector<2x32xf32>
    %cst_109 = arith.constant dense<0.000000e+00> : vector<2xf32>
    %133 = vector.multi_reduction <add>, %132, %cst_109 [1] : vector<2x32xf32> to vector<2xf32>
    %134 = vector.shape_cast %133 : vector<2xf32> to vector<2x1xf32>
    %c0_110 = arith.constant 0 : index
    %c0_111 = arith.constant 0 : index
    %135 = vector.load %arg7[%c0_110, %c0_111] : memref<2x1xf32, #tpu.memory_space<vmem>>, vector<2x1xf32>
    %136 = arith.addf %134, %135 : vector<2x1xf32>
    %cst_112 = arith.constant 0.000000e+00 : f32
    %137 = vector.broadcast %cst_112 : f32 to vector<2x1xf32>
    %138 = arith.maximumf %136, %137 : vector<2x1xf32>
    %c0_113 = arith.constant 0 : index
    %c0_114 = arith.constant 0 : index
    %139 = vector.load %arg8[%c0_113, %c0_114] : memref<2x32xf32, #tpu.memory_space<vmem>>, vector<2x32xf32>
    %140 = vector.broadcast %138 : vector<2x1xf32> to vector<2x32xf32>
    %141 = arith.mulf %140, %139 : vector<2x32xf32>
    %cst_115 = arith.constant dense<0.000000e+00> : vector<32xf32>
    %142 = vector.multi_reduction <add>, %141, %cst_115 [0] : vector<2x32xf32> to vector<32xf32>
    %143 = vector.shape_cast %142 : vector<32xf32> to vector<1x32xf32>
    %c0_116 = arith.constant 0 : index
    %c0_117 = arith.constant 0 : index
    %144 = vector.load %arg9[%c0_116, %c0_117] : memref<1x32xf32, #tpu.memory_space<vmem>>, vector<1x32xf32>
    %145 = arith.addf %143, %144 : vector<1x32xf32>
    %146 = arith.negf %145 : vector<1x32xf32>
    %147 = math.exp %146 : vector<1x32xf32>
    %cst_118 = arith.constant 1.000000e+00 : f32
    %148 = vector.broadcast %cst_118 : f32 to vector<1x32xf32>
    %149 = arith.addf %148, %147 : vector<1x32xf32>
    %150 = arith.divf %148, %149 : vector<1x32xf32>
    %151 = vector.broadcast %150 : vector<1x32xf32> to vector<256x32xf32>
    %152 = arith.mulf %125, %151 : vector<256x32xf32>
    %c0_119 = arith.constant 0 : index
    %c0_120 = arith.constant 0 : index
    %c0_121 = arith.constant 0 : index
    %153 = vector.load %arg1[%c0_119, %c0_120, %c0_121] : memref<1x256x32xf32, #tpu.memory_space<vmem>>, vector<1x256x32xf32>
    %154 = vector.shape_cast %153 : vector<1x256x32xf32> to vector<256x32xf32>
    %155 = arith.addf %152, %154 : vector<256x32xf32>
    %cst_122 = arith.constant 0.000000e+00 : f32
    %156 = vector.broadcast %cst_122 : f32 to vector<256x32xf32>
    %157 = arith.maximumf %155, %156 : vector<256x32xf32>
    %c0_123 = arith.constant 0 : index
    %c0_124 = arith.constant 0 : index
    %c0_125 = arith.constant 0 : index
    %158 = vector.load %arg10[%c0_123, %c0_124, %c0_125] : memref<1x256x32xf32, #tpu.memory_space<vmem>>, vector<1x256x32xf32>
    %159 = vector.shape_cast %158 : vector<1x256x32xf32> to vector<256x32xf32>
    %160 = vector.shape_cast %157 : vector<256x32xf32> to vector<1x256x32xf32>
    tpu.vector_store %arg10[%c0_123, %c0_124, %c0_125], %160 {strides = array<i32>} : memref<1x256x32xf32, #tpu.memory_space<vmem>>, vector<1x256x32xf32>,
    return
  }
  func.func @transform_0(%arg0: i32) -> (i32, i32, i32) {
    %c0_i32 = arith.constant 0 : i32
    %c0_i32_0 = arith.constant 0 : i32
    %c0_i32_1 = arith.constant 0 : i32
    return %arg0, %c0_i32, %c0_i32_0 : i32, i32, i32
  }
  func.func @transform_1(%arg0: i32) -> (i32, i32) {
    %c0_i32 = arith.constant 0 : i32
    %c0_i32_0 = arith.constant 0 : i32
    %c0_i32_1 = arith.constant 0 : i32
    return %c0_i32, %c0_i32_0 : i32, i32
  }
  func.func @transform_2(%arg0: i32) -> (i32, i32) {
    %c0_i32 = arith.constant 0 : i32
    %c0_i32_0 = arith.constant 0 : i32
    %c0_i32_1 = arith.constant 0 : i32
    return %c0_i32, %c0_i32_0 : i32, i32
  }
  func.func @transform_3(%arg0: i32) -> (i32, i32) {
    %c0_i32 = arith.constant 0 : i32
    %c0_i32_0 = arith.constant 0 : i32
    %c0_i32_1 = arith.constant 0 : i32
    return %c0_i32, %c0_i32_0 : i32, i32
  }
  func.func @transform_4(%arg0: i32) -> (i32, i32) {
    %c0_i32 = arith.constant 0 : i32
    %c0_i32_0 = arith.constant 0 : i32
    %c0_i32_1 = arith.constant 0 : i32
    return %c0_i32, %c0_i32_0 : i32, i32
  }
  func.func @transform_5(%arg0: i32) -> (i32, i32) {
    %c0_i32 = arith.constant 0 : i32
    %c0_i32_0 = arith.constant 0 : i32
    %c0_i32_1 = arith.constant 0 : i32
    return %c0_i32, %c0_i32_0 : i32, i32
  }
  func.func @transform_6(%arg0: i32) -> (i32, i32) {
    %c0_i32 = arith.constant 0 : i32
    %c0_i32_0 = arith.constant 0 : i32
    %c0_i32_1 = arith.constant 0 : i32
    return %c0_i32, %c0_i32_0 : i32, i32
  }
  func.func @transform_7(%arg0: i32) -> (i32, i32) {
    %c0_i32 = arith.constant 0 : i32
    %c0_i32_0 = arith.constant 0 : i32
    %c0_i32_1 = arith.constant 0 : i32
    return %c0_i32, %c0_i32_0 : i32, i32
  }
  func.func @transform_8(%arg0: i32) -> (i32, i32) {
    %c0_i32 = arith.constant 0 : i32
    %c0_i32_0 = arith.constant 0 : i32
    %c0_i32_1 = arith.constant 0 : i32
    return %c0_i32, %c0_i32_0 : i32, i32
  }
  func.func @transform_9(%arg0: i32) -> (i32, i32, i32) {
    %c0_i32 = arith.constant 0 : i32
    %c0_i32_0 = arith.constant 0 : i32
    %c0_i32_1 = arith.constant 0 : i32
    return %arg0, %c0_i32, %c0_i32_0 : i32, i32, i32
  }
}

</mosaic_0001>

<bundles_post_ra>
// kernel: tpu_custom_call.1
= control target key start
LH: loop header
LB: loop body
LE: loop exit
PB: predicated region body
PF: predicated region fallthrough
CT: control target
= control target key end

     0   :  { %s6579_s30 = smov 0   ;;  %s9857_s0 = inlined_call_operand.vmem [shape: f32[2,256,32], index: 0, kind: input, shape index: {}]   ;;  %s9858_s1 = inlined_call_operand.vmem [shape: bf16[288,32], index: 1, kind: input, shape index: {}]   ;;  %s9859_s2 = inlined_call_operand.vmem [shape: f32[1,32], index: 2, kind: input, shape index: {}]   ;;  %s9860_s3 = inlined_call_operand.vmem [shape: bf16[288,32], index: 3, kind: input, shape index: {}]   ;;  %s9861_s4 = inlined_call_operand.vmem [shape: f32[1,32], index: 4, kind: input, shape index: {}]   ;;  %s9862_s5 = inlined_call_operand.vmem [shape: f32[2,32], index: 5, kind: input, shape index: {}]   ;;  %s9863_s6 = inlined_call_operand.vmem [shape: f32[2,1], index: 6, kind: input, shape index: {}]   ;;  %s9864_s7 = inlined_call_operand.vmem [shape: f32[2,32], index: 7, kind: input, shape index: {}]   ;;  %s9865_s8 = inlined_call_operand.vmem [shape: f32[1,32], index: 8, kind: input, shape index: {}]   ;;  %s9866_s9 = inlined_call_operand.vmem [shape: f32[2,256,32], index: 9, kind: output, shape index: {}]  }
   0x1 LB: > { %s6006_s10 = sadd.s32 4294967295, %s6522_s30   ;;  %p6010_p0 = scmp.ge.s32.totalorder %s6522_s30, 1  ;;  %s6522_s30 = sphi %s6579_s30, %s19_s30  }
   0x2   : > { %p287_p1 = scmp.lt.s32.totalorder %s6522_s30, 3 }
   0x4   : > { %p288_p2 = pnand %p6010_p0, %p287_p1 }
   0x6   : > { %291 = sbr.rel (%p288_p2) target bundleno = 1365 (0x555), region = 56 }
   0xd   : > { %vm336_vm0 = vcmask 261120   ;;  %p323_p3 = scmp.lt.s32.totalorder %s6006_s10, 1  ;;  %v405_v0 = vlaneseq  ;;  %v9875_v1 = vmov 0   ;;  %vm6525_vm1 = vmmov 1   ;;  %s6526_s15 = smov 32  }
   0xe   : > { %338 = vst.msk [vmem:[#allocation2 + $0x8] sm:$0xff] %vm336_vm0, %v9875_v1  ;;  %337 = vst.msk [vmem:[#allocation2] sm:$0xff] %vm336_vm0, %v9875_v1  ;;  %6471 = vset.pattern.permute.xlu1 %v9875_v1  ;;  %6472 = vset.pattern.permute.xlu0 %v9875_v1  ;;  %vm1015_vm4 = vsmask.f32 7424  ;;  %vm1177_vm12 = vsmask.f32 256 }
   0xf   : > { %339 = vst.msk [vmem:[#allocation2 + $0x90] sm:$0xff] %vm336_vm0, %v9875_v1  ;;  %340 = vst.msk [vmem:[#allocation2 + $0x98] sm:$0xff] %vm336_vm0, %v9875_v1  ;;  %s10114_s10 = smov (!%p323_p3, %s6006_s10), 1  ;;  %v6599_v2 = vshrl.u32 %v405_v0, 7  ;;  %s6527_s16 = smov 96  }
  0x10   : > { %vm904_vm2 = vmpackc.low %vm6525_vm1, %vm6525_vm1  ;;  %s6120_s11 = sshll.u32 %s10114_s10, 8  ;;  %s6528_s21 = smov 64  }
  0x11   : > { %9943 = vst [vmem:[#allocation4_spill] sm:$0xff] %v6599_v2  ;;  %v6602_v3 = vsel %vm904_vm2, 65537, %v9875_v1  ;;  %v408_v4 = vadd.s32 16, %v6599_v2  ;;  %v442_v5 = vand.u32 15, %v6599_v2  ;;  %v407_v6 = vadd.s32 8, %v6599_v2  ;;  %s6614_s14 = scalar_lea.vmem %s9857_s0, %s6120_s11  ;;  %s9768_s22 = scalar_lea.vmem %s9866_s9, %s6120_s11 }
  0x12   : > { %v409_v7 = vadd.s32 24, %v6599_v2  ;;  %v411_v8 = vadd.s32 40, %v6599_v2  ;;  %v410_v9 = vadd.s32 32, %v6599_v2  ;;  %v6619_v10 = vadd.s32 56, %v6599_v2  ;;  %v341_v12 = vld [vmem:[%s6614_s14] sm:$0xff]  ;;  %v342_v13 = vld [vmem:[%s6614_s14 + $0x8] sm:$0xff] }
  0x13   : > { %v6622_v11 = vadd.s32 48, %v6599_v2  ;;  %v343_v14 = vld [vmem:[%s6614_s14 + $0x10] sm:$0xff]  ;;  %v456_v15 = vand.u32 15, %v408_v4  ;;  %vm6627_vm3 = vcmp.gt.s32.totalorder %v442_v5, 0  ;;  %v449_v17 = vand.u32 15, %v407_v6  ;;  %v344_v19 = vld [vmem:[%s6614_s14 + $0x18] sm:$0xff] }
  0x14   : > { %v373_v18 = vpack.c.bf16 %v342_v13, %v341_v12  ;;  %v345_v20 = vld [vmem:[%s6614_s14 + $0x20] sm:$0xff]  ;;  %v346_v21 = vld [vmem:[%s6614_s14 + $0x28] sm:$0xff]  ;;  %v463_v22 = vand.u32 15, %v409_v7  ;;  %v477_v23 = vand.u32 15, %v411_v8  ;;  %v470_v24 = vand.u32 15, %v410_v9  ;;  %vm903_vm6 = vmpackc.low %vm6627_vm3, %vm6627_vm3 }
  0x15   : > { %v6634_v25 = vld [vmem:[#allocation2 + $0x8] sm:$0xff]  ;;  %v374_v26 = vpack.c.bf16 %v344_v19, %v343_v14  ;;  %v375_v27 = vpack.c.bf16 %v346_v21, %v345_v20  ;;  %vm6636_vm5 = vcmp.gt.s32.totalorder %v456_v15, 0  ;;  %vm6643_vm7 = vcmp.lt.s32.totalorder %v449_v17, 15  ;;  %v347_v32 = vld [vmem:[%s6614_s14 + $0x30] sm:$0xff]  ;;  %v348_v33 = vld [vmem:[%s6614_s14 + $0x38] sm:$0xff] }
  0x16   : > { %1374 = vrot.lane.b32.xlu0 %v6634_v25, %s6526_s15  ;;  %389 = vst.msk [vmem:[#allocation2 + $0x10] sm:$0xff] %vm336_vm0, %v373_v18  ;;  %vm905_vm8 = vmpackc.low %vm6636_vm5, %vm6636_vm5  ;;  %v935_v30 = vsel %vm903_vm6, 65537, %v9875_v1  ;;  %vm6654_vm9 = vcmp.lt.s32.totalorder %v463_v22, 15  ;;  %vm6660_vm10 = vcmp.lt.s32.totalorder %v477_v23, 15  ;;  %vm6664_vm11 = vcmp.gt.s32.totalorder %v470_v24, 0  ;;  %v349_v39 = vld [vmem:[%s6614_s14 + $0x40] sm:$0xff] }
  0x17   : > { %390 = vst.msk [vmem:[#allocation2 + $0x18] sm:$0xff] %vm336_vm0, %v374_v26  ;;  %391 = vst.msk [vmem:[#allocation2 + $0x20] sm:$0xff] %vm336_vm0, %v375_v27  ;;  %v937_v36 = vsel %vm905_vm8, 65537, %v9875_v1  ;;  %v6015_v37 = vcombine.low %v935_v30, %v6602_v3  ;;  %v376_v38 = vpack.c.bf16 %v348_v33, %v347_v32  ;;  %v350_v40 = vld [vmem:[%s6614_s14 + $0x48] sm:$0xff]  ;;  %v491_v41 = vand.u32 15, %v6619_v10  ;;  %v6473_v22 = vld [vmem:[%s9858_s1 + $0x40] sm:$0xff]  }
  0x18   : > { %vm1457_vm13 = vmpackc.low %vm6643_vm7, %vm6643_vm7  ;;  %v6679_v42 = vcombine.low %v937_v36, %v6602_v3  ;;  %v377_v44 = vpack.c.bf16 %v350_v40, %v349_v39  ;;  %v484_v45 = vand.u32 15, %v6622_v11  ;;  %v1926_v57 = vld [vmem:[#allocation2 + $0x8] sm:$0x80]  ;;  %v6474_v27 = vld [vmem:[%s9858_s1] sm:$0xff]   ;;  %6122 = vmatprep.subr.bf16.mxu0 %v6473_v22 }
  0x19   : > { %vm1459_vm14 = vmpackc.low %vm6654_vm9, %vm6654_vm9  ;;  %v1489_v43 = vsel %vm1457_vm13, 65537, %v9875_v1  ;;  %v1017_v46 = vshll.u32 %v6015_v37, 16  ;;  %v1020_v47 = vshrl.u32 %v6015_v37, 16  ;;  %392 = vst.msk [vmem:[#allocation2 + $0x28] sm:$0xff] %vm336_vm0, %v376_v38  ;;  %6123 = vmatpush3.bf16.msra.mxu0 %v6474_v27  ;;  %v6476_v27 = vld [vmem:[%s9858_s1 + $0x8] sm:$0xff]   ;;  %vm861_vm8 = vcmp.lt.s32.totalorder %v491_v41, 15 }
  0x1a   : > { %v1491_v48 = vsel %vm1459_vm14, 65537, %v9875_v1  ;;  %v6031_v49 = vcombine.low %v6602_v3, %v1489_v43  ;;  %vm1461_vm15 = vmpackc.low %vm6660_vm10, %vm6660_vm10  ;;  %v1024_v50 = vshll.u32 %v6679_v42, 16  ;;  %v1028_v53 = vshrl.u32 %v6679_v42, 16  ;;  %393 = vst.msk [vmem:[#allocation2 + $0x30] sm:$0xff] %vm336_vm0, %v377_v44 }
  0x1b   : > { %v6032_v51 = vcombine.low %v6602_v3, %v1491_v48  ;;  %v1493_v52 = vsel %vm1461_vm15, 65537, %v9875_v1  ;;  %vm907_vm1 = vmpackc.low %vm6664_vm11, %vm6664_vm11  ;;  %v6700_v54 = vrot.slane %v1017_v46, 1  ;;  %vm6856_vm11 = vcmp.gt.s32.totalorder %v484_v45, 0  ;;  %v352_v45 = vld [vmem:[%s6614_s14 + $0x58] sm:$0xff] }
  0x1c   : > { %v1569_v55 = vshrl.u32 %v6031_v49, 16  ;;  %v1572_v56 = vshll.u32 %v6031_v49, 16  ;;  %v6703_v58 = vcombine.low %v6602_v3, %v1493_v52  ;;  %v6705_v59 = vrot.slane %v1024_v50, 1  ;;  %vm1463_vm9 = vmpackc.low %vm861_vm8, %vm861_vm8 }
  0x1d   : > { %v1576_v60 = vshrl.u32 %v6032_v51, 16  ;;  %v1579_v61 = vshll.u32 %v6032_v51, 16  ;;  %v939_v62 = vsel %vm907_vm1, 65537, %v9875_v1  ;;  %v6708_v63 = vld [vmem:[#allocation2 + $0x10] sm:$0xff]  ;;  %v1022_v0 = vor.u32 %v1020_v47, %v6700_v54  ;;  %vm909_vm13 = vmpackc.low %vm6856_vm11, %vm6856_vm11 }
  0x1e   : > { %vm9902_vm2 = vcmp.ne.s16.totalorder %v6700_v54, 0  ;;  %v2419_v4 = vld [vmem:[#allocation2 + $0x10] sm:$0x80]  ;;  %v1571_v5 = vrot.slane %v1569_v55, 7  ;;  %v1584_v6 = vshrl.u32 %v6703_v58, 16  ;;  %1376 = vrot.lane.b32.xlu1 %v6708_v63, %s6526_s15  ;;  %v6715_v7 = vld [vmem:[#allocation2 + $0x18] sm:$0xff]  ;;  %v6739_v21 = vcombine.low %v939_v62, %v6602_v3 }
  0x1f   : > { %v2436_v8 = vsel %vm9902_vm2, %v2419_v4, 0  ;;  %v6719_v9 = vrot.slane %v1576_v60, 7  ;;  %v1943_v12 = vsel %vm9902_vm2, %v1926_v57, 0  ;;  %v1587_v13 = vshll.u32 %v6703_v58, 16  ;;  %2681 = vrot.lane.b32.xlu0 %v6715_v7, %s6527_s16  ;;  %v6732_v18 = vld [vmem:[#allocation2 + $0x20] sm:$0xff]  ;;  %v6777_v50 = vld [vmem:[#allocation2 + $0x10] sm:$0xff] }
  0x20   : > { %v6728_v14 = vsel %vm1015_vm4, %v1022_v0, %v6705_v59  ;;  %v2454_v15 = vshrl.u32 %v2436_v8, 16  ;;  %v6730_v16 = vor.u32 %v1572_v56, %v1571_v5  ;;  %v1961_v17 = vshrl.u32 %v1943_v12, 16  ;;  %2173 = vst.msk [vmem:[#allocation3 + $0x8] sm:$0xff] %vm336_vm0, %v6777_v50  ;;  %v6803_v22 = vld [vmem:[#allocation2 + $0x28] sm:$0xff] }
  0x21   : > { %vm9889_vm3 = vcmp.ne.s16.totalorder %v6728_v14, 0  ;;  %v1581_v19 = vor.u32 %v1579_v61, %v6719_v9  ;;  %v6736_v20 = vrot.slane %v1584_v6, 7  ;;  %v1036_v11 = vshrl.u32 %v6739_v21, 16 }
  0x22   : > { %v2437_v23 = vsel %vm9889_vm3, %v6715_v7, 0  ;;  %v2456_v24 = vrot.slane %v2454_v15, 7  ;;  %vm9903_vm5 = vcmp.ne.s16.totalorder %v6730_v16, 0  ;;  %v1944_v26 = vsel %vm9889_vm3, %v6708_v63, 0  ;;  %1378 = vrot.lane.b32.xlu1 %v6715_v7, %s6526_s15  ;;  %v6799_v15 = vld [vmem:[#allocation2 + $0x18] sm:$0xff] }
  0x23   : > { %v2458_v28 = vshrl.u32 %v2437_v23, 16  ;;  %v2461_v29 = vshll.u32 %v2437_v23, 16  ;;  %v6757_v30 = vsel %vm1177_vm12, %v1571_v5, %v1581_v19  ;;  %v2206_v31 = vsel %vm9903_vm5, %v6708_v63, 0  ;;  %2683 = vrot.lane.b32.xlu0 %v6732_v18, %s6527_s16  ;;  %2174 = vst.msk [vmem:[#allocation3 + $0x20] sm:$0xff] %vm336_vm0, %v6799_v15 }
  0x24   : > { %9956 = vst [vmem:[#allocation5_spill] sm:$0xff] %v6757_v30  ;;  %vm9888_vm6 = vcmp.ne.s16.totalorder %v6757_v30, 0  ;;  %v2224_v32 = vshrl.u32 %v2206_v31, 16  ;;  %v2226_v33 = vshll.u32 %v2206_v31, 16  ;;  %v2762_v34 = vsel %vm9903_vm5, %v6715_v7, 0  ;;  %v372_v30 = vld [vmem:[%s6614_s14 + $0xf8] sm:$0xff] }
  0x25   : > { %v6768_v35 = vrot.slane %v2458_v28, 7  ;;  %v2207_v36 = vsel %vm9888_vm6, %v6715_v7, 0  ;;  %v2763_v37 = vsel %vm9888_vm6, %v6732_v18, 0  ;;  %v2780_v38 = vshrl.u32 %v2762_v34, 16 }
  0x26   : > { %v2228_v39 = vrot.slane %v2226_v33, 1  ;;  %v2231_v40 = vshll.u32 %v2207_v36, 16  ;;  %v2782_v43 = vshll.u32 %v2762_v34, 16  ;;  %v2787_v44 = vshll.u32 %v2763_v37, 16 }
  0x27   : > { %v2463_v46 = vor.u32 %v2461_v29, %v6768_v35  ;;  %v2791_v47 = vshrl.u32 %v2763_v37, 16  ;;  %v1963_v48 = vrot.slane %v1961_v17, 7  ;;  %v1965_v49 = vshrl.u32 %v1944_v26, 16 }
  0x28   : > { %v2229_v51 = vor.u32 %v2228_v39, %v2224_v32  ;;  %v2233_v52 = vrot.slane %v2231_v40, 1  ;;  %v2784_v55 = vrot.slane %v2782_v43, 1  ;;  %v2789_v56 = vrot.slane %v2787_v44, 1  ;;  %v6477_v44 = vld [vmem:[%s9858_s1 + $0x50] sm:$0xff]  }
  0x29   : > { %v2464_v57 = vsel %vm1177_vm12, %v2456_v24, %v2463_v46  ;;  %v6782_v58 = vrot.slane %v1965_v49, 7  ;;  %v1968_v60 = vshll.u32 %v1944_v26, 16  ;;  %v1589_v61 = vor.u32 %v1587_v13, %v6736_v20 }
  0x2a   : > { %2585 = vrot.lane.b32.xlu1 %v2464_v57, %s6528_s21  ;;  %v2234_v62 = vsel %vm1015_vm4, %v2229_v51, %v2233_v52  ;;  %v2785_v0 = vor.u32 %v2784_v55, %v2780_v38  ;;  %v2793_v4 = vor.u32 %v2791_v47, %v2789_v56  ;;  %v2235_v5 = vshrl.u32 %v2207_v36, 16 }
  0x2b   : > { %2355 = vrot.lane.b32.xlu0 %v2234_v62, %s6526_s15  ;;  %v1970_v6 = vor.u32 %v1968_v60, %v6782_v58  ;;  %v6791_v8 = vsel %vm1177_vm12, %v6719_v9, %v1589_v61  ;;  %v1712_v12 = vsel %vm9903_vm5, %v6634_v25, 0  ;;  %v1713_v13 = vsel %vm9888_vm6, %v6708_v63, 0  ;;  %v6475_v9 = vld [vmem:[%s9858_s1 + $0x48] sm:$0xff]   ;;  %v351_v61 = vld [vmem:[%s6614_s14 + $0x50] sm:$0xff] }
  0x2c   : > { %9957 = vst [vmem:[#allocation6_spill] sm:$0xff] %v6791_v8  ;;  %v2790_v17 = vsel %vm1015_vm4, %v2785_v0, %v2789_v56  ;;  %vm9871_vm7 = vcmp.ne.s16.totalorder %v6791_v8, 0  ;;  %v2237_v19 = vor.u32 %v2235_v5, %v2233_v52  ;;  %v1730_v23 = vshrl.u32 %v1712_v12, 16  ;;  %6124 = vmatprep.subr.bf16.mxu0 %v6475_v9 }
  0x2d   : > { %2927 = vst.msk [vmem:[#allocation3 + $0x10] sm:$0xff] %vm336_vm0, %v2790_v17  ;;  %v1971_v25 = vsel %vm1177_vm12, %v1963_v48, %v1970_v6  ;;  %v2208_v63 = vsel %vm9871_vm7, %v6732_v18, 0  ;;  %v2764_v24 = vsel %vm9871_vm7, %v6803_v22, 0  ;;  %v1732_v26 = vshll.u32 %v1712_v12, 16  ;;  %6125 = vmatpush3.bf16.msra.mxu0 %v6476_v27  ;;  %v6480_v27 = vld [vmem:[%s9858_s1 + $0x18] sm:$0xff]  }
  0x2e   : > { %2092 = vrot.lane.b32.xlu1 %v1971_v25, %s6527_s16  ;;  %v2239_v28 = vshll.u32 %v2208_v63, 16  ;;  %v2795_v29 = vshll.u32 %v2764_v24, 16  ;;  %v2799_v31 = vshrl.u32 %v2764_v24, 16  ;;  %v1737_v32 = vshll.u32 %v1713_v13, 16  ;;  %6126 = vmatprep.subr.bf16.mxu0 %v6477_v44 }
  0x2f   : > { %v1734_v33 = vrot.slane %v1732_v26, 1  ;;  %v1030_v34 = vor.u32 %v1028_v53, %v6705_v59  ;;  %v1032_v36 = vshll.u32 %v6739_v21, 16  ;;  %v6829_v37 = vsel %vm9871_vm7, %v6715_v7, 0  ;;  %v6478_v53 = vld [vmem:[%s9858_s1 + $0x10] sm:$0xff]   ;;  %v353_v26 = vld [vmem:[%s6614_s14 + $0x60] sm:$0xff] }
  0x30   : > { %v2241_v38 = vrot.slane %v2239_v28, 1  ;;  %v2797_v39 = vrot.slane %v2795_v29, 1  ;;  %v1739_v40 = vrot.slane %v1737_v32, 1  ;;  %v1741_v43 = vshrl.u32 %v1713_v13, 16 }
  0x31   : > { %v1735_v46 = vor.u32 %v1734_v33, %v1730_v23  ;;  %v1034_v47 = vrot.slane %v1032_v36, 1  ;;  %v1745_v42 = vshll.u32 %v6829_v37, 16  ;;  %v1495_v55 = vsel %vm1463_vm9, 65537, %v9875_v1  ;;  %6127 = vmatpush3.bf16.msra.mxu0 %v6478_v53  ;;  %v354_v33 = vld [vmem:[%s6614_s14 + $0x68] sm:$0xff]  ;;  %v6914_v53 = vld [vmem:[#allocation2 + $0x30] sm:$0xff] }
  0x32   : > { %v2242_v59 = vsel %vm1015_vm4, %v2237_v19, %v2241_v38  ;;  %v2798_v48 = vsel %vm1015_vm4, %v2793_v4, %v2797_v39  ;;  %v6842_v49 = vor.u32 %v2799_v31, %v2797_v39  ;;  %v1743_v51 = vor.u32 %v1741_v43, %v1739_v40 }
  0x33   : > { %2928 = vst.msk [vmem:[#allocation3 + $0x28] sm:$0xff] %vm336_vm0, %v2798_v48  ;;  %2357 = vrot.lane.b32.xlu0 %v2242_v59, %s6526_s15  ;;  %v1740_v10 = vsel %vm1015_vm4, %v1735_v46, %v1739_v40  ;;  %v6848_v41 = vsel %vm1015_vm4, %v1030_v34, %v1034_v47  ;;  %v1747_v52 = vrot.slane %v1745_v42, 1  ;;  %v6034_v56 = vcombine.low %v6602_v3, %v1495_v55  ;;  %v6481_v46 = vld [vmem:[%s9858_s1 + $0x60] sm:$0xff]  }
  0x34   : > { %9958 = vst [vmem:[#allocation7_spill] sm:$0xff] %v6848_v41  ;;  %1861 = vrot.lane.b32.xlu1 %v1740_v10, %s6528_s21  ;;  %vm9887_vm10 = vcmp.ne.s16.totalorder %v6848_v41, 0  ;;  %v2243_v57 = vshrl.u32 %v2208_v63, 16  ;;  %v941_v9 = vsel %vm909_vm13, 65537, %v9875_v1  ;;  %v1038_v24 = vor.u32 %v1036_v11, %v1034_v47 }
  0x35   : > { %v2438_v62 = vsel %vm9887_vm10, %v6732_v18, 0  ;;  %v1748_v0 = vsel %vm1015_vm4, %v1743_v51, %v1747_v52  ;;  %v1945_v4 = vsel %vm9887_vm10, %v6715_v7, 0  ;;  %v1592_v12 = vshrl.u32 %v6034_v56, 16  ;;  %v6479_v7 = vld [vmem:[%s9858_s1 + $0x58] sm:$0xff]   ;;  %v6482_v51 = vld [vmem:[%s9858_s1 + $0x20] sm:$0xff]  }
  0x36   : > { %v2466_v5 = vshrl.u32 %v2438_v62, 16  ;;  %v2469_v6 = vshll.u32 %v2438_v62, 16  ;;  %v1595_v13 = vshll.u32 %v6034_v56, 16  ;;  %v6873_v17 = vor.u32 %v2243_v57, %v2241_v38  ;;  %6128 = vmatprep.subr.bf16.mxu0 %v6479_v7  ;;  %v6483_v62 = vld [vmem:[%s9858_s1 + $0x68] sm:$0xff]  }
  0x37   : > { %v1973_v19 = vshrl.u32 %v1945_v4, 16  ;;  %v1976_v23 = vshll.u32 %v1945_v4, 16  ;;  %v6882_v21 = vrot.slane %v1592_v12, 7  ;;  %v6885_v63 = vcombine.low %v941_v9, %v6602_v3  ;;  %6129 = vmatpush3.bf16.msra.mxu0 %v6480_v27 }
  0x38   : > { %v6879_v25 = vrot.slane %v2466_v5, 7  ;;  %1863 = vrot.lane.b32.xlu1 %v1748_v0, %s6528_s21  ;;  %v1749_v29 = vshrl.u32 %v6829_v37, 16  ;;  %v378_v31 = vpack.c.bf16 %v352_v45, %v351_v61  ;;  %v415_v32 = vadd.s32 72, %v6599_v2  ;;  %6130 = vmatprep.subr.bf16.mxu0 %v6481_v46  ;;  %v6484_v5 = vld [vmem:[%s9858_s1 + $0x28] sm:$0xff]  }
  0x39   : > { %v6891_v28 = vrot.slane %v1973_v19, 7  ;;  %v1597_v36 = vor.u32 %v1595_v13, %v6882_v21  ;;  %v1040_v38 = vshll.u32 %v6885_v63, 16  ;;  %v6900_v39 = vadd.s32 64, %v6599_v2 }
  0x3a   : > { %v2471_v34 = vor.u32 %v2469_v6, %v6879_v25  ;;  %v1751_v43 = vor.u32 %v1749_v29, %v1747_v52  ;;  %394 = vst.msk [vmem:[#allocation2 + $0x38] sm:$0xff] %vm336_vm0, %v378_v31  ;;  %v505_v37 = vand.u32 15, %v415_v32  ;;  %v1044_v44 = vshrl.u32 %v6885_v63, 16  ;;  %v6485_v31 = vld [vmem:[%s9858_s1 + $0x70] sm:$0xff]  }
  0x3b   : > { %v1978_v40 = vor.u32 %v1976_v23, %v6891_v28  ;;  %v6912_v42 = vsel %vm1177_vm12, %v6736_v20, %v1597_v36  ;;  %v6916_v59 = vrot.slane %v1040_v38, 1  ;;  %v498_v48 = vand.u32 15, %v6900_v39  ;;  %6131 = vmatpush3.bf16.msra.mxu0 %v6482_v51  ;;  %v355_v36 = vld [vmem:[%s6614_s14 + $0x70] sm:$0xff]  ;;  %v356_v51 = vld [vmem:[%s6614_s14 + $0x78] sm:$0xff] }
  0x3c   : > { %v2472_v47 = vsel %vm1177_vm12, %v6768_v35, %v2471_v34  ;;  %9961 = vst [vmem:[#allocation8_spill] sm:$0xff] %v6912_v42  ;;  %vm9870_vm14 = vcmp.ne.s16.totalorder %v6912_v42, 0  ;;  %vm6926_vm15 = vcmp.lt.s32.totalorder %v505_v37, 15  ;;  %v379_v10 = vpack.c.bf16 %v354_v33, %v353_v26  ;;  %6132 = vmatprep.subr.bf16.mxu0 %v6483_v62 }
  0x3d   : > { %2587 = vrot.lane.b32.xlu0 %v2472_v47, %s6528_s21  ;;  %v1979_v35 = vsel %vm1177_vm12, %v6782_v58, %v1978_v40  ;;  %v6933_v52 = vsel %vm9870_vm14, %v6803_v22, 0  ;;  %v2765_v55 = vsel %vm9870_vm14, %v6914_v53, 0  ;;  %v6941_v58 = vsel %vm1015_vm4, %v1038_v24, %v6916_v59  ;;  %vm1465_vm1 = vmpackc.low %vm6926_vm15, %vm6926_vm15 }
  0x3e   : > { %2094 = vrot.lane.b32.xlu1 %v1979_v35, %s6527_s16  ;;  %9964 = vst [vmem:[#allocation9_spill] sm:$0xff] %v6941_v58  ;;  %v6946_v56 = vsel %vm9870_vm14, %v6732_v18, 0  ;;  %v2247_v57 = vshll.u32 %v6933_v52, 16  ;;  %v2803_v60 = vshll.u32 %v2765_v55, 16  ;;  %v2807_v61 = vshrl.u32 %v2765_v55, 16  ;;  %395 = vst.msk [vmem:[#allocation2 + $0x40] sm:$0xff] %vm336_vm0, %v379_v10 }
  0x3f   : > { %vm9901_vm8 = vcmp.ne.s16.totalorder %v6941_v58, 0  ;;  %v1753_v4 = vshll.u32 %v6946_v56, 16  ;;  %v1497_v45 = vsel %vm1465_vm1, 65537, %v9875_v1  ;;  %6133 = vmatpush3.bf16.msra.mxu0 %v6484_v5  ;;  %v2251_v40 = vshrl.u32 %v6933_v52, 16  ;;  %v6487_v52 = vld [vmem:[%s9858_s1 + $0x78] sm:$0xff]   ;;  %v6488_v55 = vld [vmem:[%s9858_s1 + $0x80] sm:$0xff]  }
  0x40   : > { %v2439_v0 = vsel %vm9901_vm8, %v6803_v22, 0  ;;  %v1946_v11 = vsel %vm9901_vm8, %v6732_v18, 0  ;;  %v2249_v6 = vrot.slane %v2247_v57, 1  ;;  %v2805_v12 = vrot.slane %v2803_v60, 1  ;;  %6134 = vmatprep.subr.bf16.mxu0 %v6485_v31  ;;  %6382 = vmatprep.subr.bf16.mxu1 %v6488_v55 }
  0x41   : > { %v2474_v13 = vshrl.u32 %v2439_v0, 16  ;;  %v2477_v19 = vshll.u32 %v2439_v0, 16  ;;  %v1755_v23 = vrot.slane %v1753_v4, 1  ;;  %v1981_v9 = vshrl.u32 %v1946_v11, 16  ;;  %v7036_v5 = vld [vmem:[#allocation2 + $0x38] sm:$0xff]  ;;  %6383 = vmatpush3.bf16.msra.mxu1 %v6488_v55 }
  0x42   : > { %v1984_v7 = vshll.u32 %v1946_v11, 16  ;;  %v6035_v24 = vcombine.low %v6602_v3, %v1497_v45  ;;  %v2250_v26 = vsel %vm1015_vm4, %v6873_v17, %v2249_v6  ;;  %v2806_v27 = vsel %vm1015_vm4, %v6842_v49, %v2805_v12  ;;  %v6486_v49 = vld [vmem:[%s9858_s1 + $0x30] sm:$0xff]  }
  0x43   : > { %v6973_v29 = vrot.slane %v2474_v13, 7  ;;  %2929 = vst.msk [vmem:[#allocation3 + $0x40] sm:$0xff] %vm336_vm0, %v2806_v27  ;;  %2359 = vrot.lane.b32.xlu0 %v2250_v26, %s6526_s15  ;;  %v1756_v32 = vsel %vm1015_vm4, %v1751_v43, %v1755_v23  ;;  %v6981_v33 = vrot.slane %v1981_v9, 7  ;;  %v6987_v38 = vor.u32 %v2807_v61, %v2805_v12  ;;  %6135 = vmatpush3.bf16.msra.mxu0 %v6486_v49  ;;  %v6490_v13 = vld [vmem:[%s9858_s1 + $0x88] sm:$0xff]  }
  0x44   : > { %v1600_v34 = vshrl.u32 %v6035_v24, 16  ;;  %v1603_v17 = vshll.u32 %v6035_v24, 16  ;;  %1865 = vrot.lane.b32.xlu1 %v1756_v32, %s6528_s21  ;;  %vm830_vm9 = vcmp.gt.s32.totalorder %v498_v48, 0  ;;  %v1757_v46 = vshrl.u32 %v6946_v56, 16  ;;  %6136 = vmatprep.subr.bf16.mxu0 %v6487_v52  ;;  %v2945_v24 = vld [vmem:[#allocation3 + $0x10] sm:$0xff] }
  0x45   : > { %v2479_v39 = vor.u32 %v2477_v19, %v6973_v29  ;;  %v1986_v43 = vor.u32 %v1984_v7, %v6981_v33  ;;  %vm911_vm11 = vmpackc.low %vm830_vm9, %vm830_vm9  ;;  %v417_v47 = vadd.s32 88, %v6599_v2  ;;  %v1046_v48 = vor.u32 %v1044_v44, %v6916_v59  ;;  %v6489_v44 = vld [vmem:[%s9858_s1 + $0x38] sm:$0xff]   ;;  %v7021_v59 = vld [vmem:[#allocation2 + $0x20] sm:$0xff]  ;;  %6384 = vmatprep.subr.bf16.mxu1 %v6490_v13  ;;  %6386 = vmatprep.mubr.msk.bf16.mxu1 %vm336_vm0, %v2945_v24 }
  0x46   : > { %v6993_v37 = vrot.slane %v1600_v34, 7  ;;  %v943_v20 = vsel %vm911_vm11, 65537, %v9875_v1  ;;  %v416_v10 = vadd.s32 80, %v6599_v2  ;;  %v2253_v57 = vor.u32 %v2251_v40, %v2249_v6  ;;  %2175 = vst.msk [vmem:[#allocation3 + $0x38] sm:$0xff] %vm336_vm0, %v7021_v59  ;;  %6385 = vmatpush3.bf16.msra.mxu1 %v6490_v13  ;;  %v357_v6 = vld [vmem:[%s6614_s14 + $0x80] sm:$0xff] }
  0x47   : > { %v2480_v35 = vsel %vm1177_vm12, %v6879_v25, %v2479_v39  ;;  %v1987_v25 = vsel %vm1177_vm12, %v6891_v28, %v1986_v43  ;;  %v7016_v63 = vcombine.low %v943_v20, %v6602_v3  ;;  %v519_v60 = vand.u32 15, %v417_v47  ;;  %6137 = vmatpush3.bf16.msra.mxu0 %v6489_v44 }
  0x48   : > { %2589 = vrot.lane.b32.xlu0 %v2480_v35, %s6528_s21  ;;  %v1605_v56 = vor.u32 %v1603_v17, %v6993_v37  ;;  %2096 = vrot.lane.b32.xlu1 %v1987_v25, %s6527_s16  ;;  %v512_v61 = vand.u32 15, %v416_v10  ;;  %v380_v62 = vpack.c.bf16 %v356_v51, %v355_v36  ;;  %v7025_v0 = vadd.s32 104, %v6599_v2  ;;  %v2948_v35 = vld [vmem:[#allocation3 + $0x28] sm:$0xff] }
  0x49   : > { %v1048_v4 = vshll.u32 %v7016_v63, 16  ;;  %v1759_v11 = vor.u32 %v1757_v46, %v1755_v23  ;;  %v1052_v45 = vshrl.u32 %v7016_v63, 16  ;;  %vm7038_vm15 = vcmp.lt.s32.totalorder %v519_v60, 15  ;;  %6387 = vmatmul.mubr.msk.bf16.vlgmr.msra.gmra.mrb[0].mxu1 %vm336_vm0, %v2948_v35 }
  0x4a   : > { %v7031_v28 = vsel %vm1177_vm12, %v6882_v21, %v1605_v56  ;;  %vm7042_vm1 = vcmp.gt.s32.totalorder %v512_v61, 0  ;;  %396 = vst.msk [vmem:[#allocation2 + $0x48] sm:$0xff] %vm336_vm0, %v380_v62  ;;  %v7048_v21 = vadd.s32 96, %v6599_v2  ;;  %vm1467_vm9 = vmpackc.low %vm7038_vm15, %vm7038_vm15  ;;  %v533_v32 = vand.u32 15, %v7025_v0 }
  0x4b   : > { %9965 = vst [vmem:[#allocation10_spill] sm:$0xff] %v7031_v28  ;;  %vm9867_vm13 = vcmp.ne.s16.totalorder %v7031_v28, 0  ;;  %v1050_v9 = vrot.slane %v1048_v4, 1  ;;  %vm913_vm11 = vmpackc.low %vm7042_vm1, %vm7042_vm1  ;;  %v1499_v36 = vsel %vm1467_vm9, 65537, %v9875_v1 }
  0x4c   : > { %2685 = vrot.lane.b32.xlu0 %v6803_v22, %s6527_s16  ;;  %v2210_v19 = vsel %vm9867_vm13, %v6914_v53, 0  ;;  %v2766_v23 = vsel %vm9867_vm13, %v7036_v5, 0  ;;  %v1716_v7 = vsel %vm9867_vm13, %v6803_v22, 0  ;;  %1380 = vrot.lane.b32.xlu1 %v6732_v18, %s6526_s15  ;;  %v945_v49 = vsel %vm913_vm11, 65537, %v9875_v1 }
  0x4d   : > { %v2255_v26 = vshll.u32 %v2210_v19, 16  ;;  %v2811_v27 = vshll.u32 %v2766_v23, 16  ;;  %v1761_v31 = vshll.u32 %v1716_v7, 16  ;;  %v2815_v34 = vshrl.u32 %v2766_v23, 16  ;;  %v358_v23 = vld [vmem:[%s6614_s14 + $0x88] sm:$0xff] }
  0x4e   : > { %v7074_v17 = vsel %vm1015_vm4, %v1046_v48, %v1050_v9  ;;  %v6036_v47 = vcombine.low %v6602_v3, %v1499_v36  ;;  %v6020_v51 = vcombine.low %v945_v49, %v6602_v3  ;;  %v2259_v52 = vshrl.u32 %v2210_v19, 16 }
  0x4f   : > { %9970 = vst [vmem:[#allocation11_spill] sm:$0xff] %v7074_v17  ;;  %v2257_v39 = vrot.slane %v2255_v26, 1  ;;  %v2813_v18 = vrot.slane %v2811_v27, 1  ;;  %vm1147_vm15 = vcmp.ne.s16.totalorder %v7074_v17, 0  ;;  %v1763_v40 = vrot.slane %v1761_v31, 1 }
  0x50   : > { %v2440_v43 = vsel %vm1147_vm15, %v6914_v53, 0  ;;  %v1947_v46 = vsel %vm1147_vm15, %v6803_v22, 0  ;;  %v1611_v60 = vshll.u32 %v6036_v47, 16  ;;  %v1054_v62 = vor.u32 %v1052_v45, %v1050_v9 }
  0x51   : > { %v2258_v20 = vsel %vm1015_vm4, %v2253_v57, %v2257_v39  ;;  %v2814_v48 = vsel %vm1015_vm4, %v6987_v38, %v2813_v18  ;;  %v2482_v10 = vshrl.u32 %v2440_v43, 16  ;;  %v2485_v55 = vshll.u32 %v2440_v43, 16 }
  0x52   : > { %2930 = vst.msk [vmem:[#allocation3 + $0x58] sm:$0xff] %vm336_vm0, %v2814_v48  ;;  %2361 = vrot.lane.b32.xlu0 %v2258_v20, %s6526_s15  ;;  %v1764_v25 = vsel %vm1015_vm4, %v1759_v11, %v1763_v40  ;;  %v1989_v56 = vshrl.u32 %v1947_v46, 16  ;;  %v1992_v63 = vshll.u32 %v1947_v46, 16  ;;  %v7095_v44 = vor.u32 %v2815_v34, %v2813_v18  ;;  %v7103_v11 = vld [vmem:[#allocation2 + $0x28] sm:$0xff] }
  0x53   : > { %v7097_v57 = vrot.slane %v2482_v10, 7  ;;  %1867 = vrot.lane.b32.xlu1 %v1764_v25, %s6528_s21  ;;  %v1608_v38 = vshrl.u32 %v6036_v47, 16  ;;  %v1056_v0 = vshll.u32 %v6020_v51, 16  ;;  %v1765_v4 = vshrl.u32 %v1716_v7, 16  ;;  %2176 = vst.msk [vmem:[#allocation3 + $0x50] sm:$0xff] %vm336_vm0, %v7103_v11 }
  0x54   : > { %v7100_v61 = vrot.slane %v1989_v56, 7  ;;  %vm867_vm1 = vcmp.lt.s32.totalorder %v533_v32, 15  ;;  %v526_v19 = vand.u32 15, %v7048_v21  ;;  %v2261_v26 = vor.u32 %v2259_v52, %v2257_v39  ;;  %v7133_v39 = vld [vmem:[#allocation2 + $0x40] sm:$0xff] }
  0x55   : > { %v2487_v12 = vor.u32 %v2485_v55, %v7097_v57  ;;  %v7106_v13 = vrot.slane %v1608_v38, 7  ;;  %v1058_v45 = vrot.slane %v1056_v0, 1  ;;  %vm1469_vm9 = vmpackc.low %vm867_vm1, %vm867_vm1  ;;  %v1060_v9 = vshrl.u32 %v6020_v51, 16 }
  0x56   : > { %v1994_v24 = vor.u32 %v1992_v63, %v7100_v61  ;;  %v1767_v31 = vor.u32 %v1765_v4, %v1763_v40  ;;  %v1501_v32 = vsel %vm1469_vm9, 65537, %v9875_v1  ;;  %vm7124_vm11 = vcmp.gt.s32.totalorder %v526_v19, 0 }
  0x57   : > { %v2488_v7 = vsel %vm1177_vm12, %v6973_v29, %v2487_v12  ;;  %v1613_v27 = vor.u32 %v1611_v60, %v7106_v13  ;;  %v7121_v34 = vsel %vm1015_vm4, %v1054_v62, %v1058_v45  ;;  %v6037_v36 = vcombine.low %v6602_v3, %v1501_v32  ;;  %vm915_vm13 = vmpackc.low %vm7124_vm11, %vm7124_vm11 }
  0x58   : > { %2591 = vrot.lane.b32.xlu0 %v2488_v7, %s6528_s21  ;;  %v1995_v21 = vsel %vm1177_vm12, %v6981_v33, %v1994_v24  ;;  %vm9919_vm1 = vcmp.ne.s16.totalorder %v7121_v34, 0  ;;  %v7136_v33 = vor.u32 %v1060_v9, %v1058_v45  ;;  %v381_v18 = vpack.c.bf16 %v358_v23, %v357_v6  ;;  %v359_v9 = vld [vmem:[%s6614_s14 + $0x90] sm:$0xff]  ;;  %v360_v7 = vld [vmem:[%s6614_s14 + $0x98] sm:$0xff] }
  0x59   : > { %2098 = vrot.lane.b32.xlu1 %v1995_v21, %s6527_s16  ;;  %v7131_v29 = vsel %vm1177_vm12, %v6993_v37, %v1613_v27  ;;  %v2441_v40 = vsel %vm9919_vm1, %v7036_v5, 0  ;;  %v1948_v43 = vsel %vm9919_vm1, %v6914_v53, 0  ;;  %v1616_v46 = vshrl.u32 %v6037_v36, 16 }
  0x5a   : > { %9973 = vst [vmem:[#allocation12_spill] sm:$0xff] %v7131_v29  ;;  %vm9869_vm9 = vcmp.ne.s16.totalorder %v7131_v29, 0  ;;  %v2490_v51 = vshrl.u32 %v2441_v40, 16  ;;  %v2493_v35 = vshll.u32 %v2441_v40, 16  ;;  %397 = vst.msk [vmem:[#allocation2 + $0x50] sm:$0xff] %vm336_vm0, %v381_v18  ;;  %v1997_v56 = vshrl.u32 %v1948_v43, 16 }
  0x5b   : > { %v2211_v37 = vsel %vm9869_vm9, %v7036_v5, 0  ;;  %v2767_v47 = vsel %vm9869_vm9, %v7133_v39, 0  ;;  %v1717_v52 = vsel %vm9869_vm9, %v6914_v53, 0  ;;  %v2000_v63 = vshll.u32 %v1948_v43, 16 }
  0x5c   : > { %2687 = vrot.lane.b32.xlu0 %v6914_v53, %s6527_s16  ;;  %v2263_v20 = vshll.u32 %v2211_v37, 16  ;;  %v2819_v48 = vshll.u32 %v2767_v47, 16  ;;  %v2823_v10 = vshrl.u32 %v2767_v47, 16  ;;  %v7162_v55 = vrot.slane %v2490_v51, 7 }
  0x5d   : > { %1382 = vrot.lane.b32.xlu1 %v6803_v22, %s6526_s15  ;;  %v1769_v25 = vshll.u32 %v1717_v52, 16  ;;  %v7164_v62 = vrot.slane %v1616_v46, 7  ;;  %v1619_v0 = vshll.u32 %v6037_v36, 16  ;;  %v7167_v12 = vrot.slane %v1997_v56, 7  ;;  %v2951_v46 = vld [vmem:[#allocation3 + $0x40] sm:$0xff] }
  0x5e   : > { %v2265_v38 = vrot.slane %v2263_v20, 1  ;;  %v2821_v60 = vrot.slane %v2819_v48, 1  ;;  %v2495_v4 = vor.u32 %v2493_v35, %v7162_v55  ;;  %v947_v19 = vsel %vm915_vm13, 65537, %v9875_v1  ;;  %6390 = vmatprep.mubr.msk.bf16.mxu1 %vm336_vm0, %v2951_v46 }
  0x5f   : > { %v1771_v6 = vrot.slane %v1769_v25, 1  ;;  %v1621_v24 = vor.u32 %v1619_v0, %v7164_v62  ;;  %v2267_v45 = vshrl.u32 %v2211_v37, 16  ;;  %v6021_v36 = vcombine.low %v947_v19, %v6602_v3  ;;  %v2954_v19 = vld [vmem:[#allocation3 + $0x58] sm:$0xff] }
  0x60   : > { %v2266_v22 = vsel %vm1015_vm4, %v2261_v26, %v2265_v38  ;;  %v2822_v23 = vsel %vm1015_vm4, %v7095_v44, %v2821_v60  ;;  %v2825_v27 = vor.u32 %v2823_v10, %v2821_v60  ;;  %v2496_v32 = vsel %vm1177_vm12, %v7097_v57, %v2495_v4  ;;  %v7192_v57 = vld [vmem:[#allocation2 + $0x48] sm:$0xff]  ;;  %6391 = vmatmul.mubr.msk.bf16.gmra.mrb[4].mxu1 %vm336_vm0, %v2954_v19  ;;  %v363_v19 = vld [vmem:[%s6614_s14 + $0xb0] sm:$0xff] }
  0x61   : > { %2931 = vst.msk [vmem:[#allocation3 + $0x70] sm:$0xff] %vm336_vm0, %v2822_v23  ;;  %2363 = vrot.lane.b32.xlu0 %v2266_v22, %s6526_s15  ;;  %v1772_v21 = vsel %vm1015_vm4, %v1767_v31, %v1771_v6  ;;  %v2002_v26 = vor.u32 %v2000_v63, %v7167_v12  ;;  %v7185_v44 = vsel %vm1177_vm12, %v7106_v13, %v1621_v24  ;;  %v1773_v49 = vshrl.u32 %v1717_v52, 16  ;;  %v7211_v22 = vld [vmem:[#allocation2 + $0x30] sm:$0xff]  ;;  %v364_v24 = vld [vmem:[%s6614_s14 + $0xb8] sm:$0xff] }
  0x62   : > { %1869 = vrot.lane.b32.xlu1 %v1772_v21, %s6528_s21  ;;  %9974 = vst [vmem:[#allocation13_spill] sm:$0xff] %v7185_v44  ;;  %v421_v18 = vadd.s32 120, %v6599_v2  ;;  %vm9868_vm13 = vcmp.ne.s16.totalorder %v7185_v44, 0  ;;  %v420_v31 = vadd.s32 112, %v6599_v2  ;;  %v382_v43 = vpack.c.bf16 %v360_v7, %v359_v9  ;;  %2177 = vst.msk [vmem:[#allocation3 + $0x68] sm:$0xff] %vm336_vm0, %v7211_v22 }
  0x63   : > { %v2003_v40 = vsel %vm1177_vm12, %v7100_v61, %v2002_v26  ;;  %v2212_v13 = vsel %vm9868_vm13, %v7133_v39, 0  ;;  %v2768_v37 = vsel %vm9868_vm13, %v7192_v57, 0  ;;  %v1064_v47 = vshll.u32 %v6021_v36, 16 }
  0x64   : > { %v7204_v61 = vsel %vm9868_vm13, %v7036_v5, 0  ;;  %v2269_v51 = vor.u32 %v2267_v45, %v2265_v38  ;;  %v2271_v35 = vshll.u32 %v2212_v13, 16  ;;  %v2827_v20 = vshll.u32 %v2768_v37, 16  ;;  %398 = vst.msk [vmem:[#allocation2 + $0x58] sm:$0xff] %vm336_vm0, %v382_v43 }
  0x65   : > { %2593 = vrot.lane.b32.xlu0 %v2496_v32, %s6528_s21  ;;  %v2831_v48 = vshrl.u32 %v2768_v37, 16  ;;  %v1066_v10 = vrot.slane %v1064_v47, 1  ;;  %v1775_v52 = vor.u32 %v1773_v49, %v1771_v6  ;;  %v1777_v25 = vshll.u32 %v7204_v61, 16  ;;  %v361_v47 = vld [vmem:[%s6614_s14 + $0xa0] sm:$0xff] }
  0x66   : > { %2100 = vrot.lane.b32.xlu1 %v2003_v40, %s6527_s16  ;;  %v547_v56 = vand.u32 15, %v421_v18  ;;  %v2273_v63 = vrot.slane %v2271_v35, 1  ;;  %v2829_v60 = vrot.slane %v2827_v20, 1  ;;  %v2275_v0 = vshrl.u32 %v2212_v13, 16 }
  0x67   : > { %v540_v4 = vand.u32 15, %v420_v31  ;;  %v7215_v38 = vsel %vm1015_vm4, %v7136_v33, %v1066_v10  ;;  %v1779_v23 = vrot.slane %v1777_v25, 1  ;;  %v1068_v6 = vshrl.u32 %v6021_v36, 16 }
  0x68   : > { %vm7217_vm11 = vcmp.lt.s32.totalorder %v547_v56, 15  ;;  %v2274_v45 = vsel %vm1015_vm4, %v2269_v51, %v2273_v63  ;;  %v2830_v9 = vsel %vm1015_vm4, %v2825_v27, %v2829_v60  ;;  %vm9925_vm13 = vcmp.ne.s16.totalorder %v7215_v38, 0 }
  0x69   : > { %2689 = vrot.lane.b32.xlu0 %v7036_v5, %s6527_s16  ;;  %vm1471_vm9 = vmpackc.low %vm7217_vm11, %vm7217_vm11  ;;  %v1781_v33 = vshrl.u32 %v7204_v61, 16  ;;  %2932 = vst.msk [vmem:[#allocation3 + $0x88] sm:$0xff] %vm336_vm0, %v2830_v9  ;;  %v2442_v7 = vsel %vm9925_vm13, %v7133_v39, 0  ;;  %v1780_v32 = vsel %vm1015_vm4, %v1775_v52, %v1779_v23  ;;  %v1949_v27 = vsel %vm9925_vm13, %v7036_v5, 0  ;;  %v362_v61 = vld [vmem:[%s6614_s14 + $0xa8] sm:$0xff] }
  0x6a   : > { %1384 = vrot.lane.b32.xlu1 %v6914_v53, %s6526_s15  ;;  %v1503_v21 = vsel %vm1471_vm9, 65537, %v9875_v1  ;;  %v2498_v26 = vshrl.u32 %v2442_v7, 16  ;;  %v2501_v36 = vshll.u32 %v2442_v7, 16  ;;  %v2005_v49 = vshrl.u32 %v1949_v27, 16 }
  0x6b   : > { %v2008_v18 = vshll.u32 %v1949_v27, 16  ;;  %v7244_v40 = vor.u32 %v2831_v48, %v2829_v60  ;;  %v6038_v53 = vcombine.low %v6602_v3, %v1503_v21  ;;  %v7247_v31 = vor.u32 %v2275_v0, %v2273_v63 }
  0x6c   : > { %vm836_vm11 = vcmp.gt.s32.totalorder %v540_v4, 0  ;;  %v7250_v43 = vrot.slane %v2498_v26, 7  ;;  %v7252_v46 = vrot.slane %v2005_v49, 7  ;;  %v1070_v13 = vor.u32 %v1068_v6, %v1066_v10 }
  0x6d   : > { %2365 = vrot.lane.b32.xlu0 %v2274_v45, %s6526_s15  ;;  %vm917_vm14 = vmpackc.low %vm836_vm11, %vm836_vm11  ;;  %v423_v37 = vadd.s32 136, %v6599_v2  ;;  %v1624_v51 = vshrl.u32 %v6038_v53, 16  ;;  %v1627_v35 = vshll.u32 %v6038_v53, 16  ;;  %v422_v48 = vadd.s32 128, %v6599_v2  ;;  %v7295_v53 = vld [vmem:[#allocation2 + $0x50] sm:$0xff] }
  0x6e   : > { %1871 = vrot.lane.b32.xlu1 %v1780_v32, %s6528_s21  ;;  %v949_v20 = vsel %vm917_vm14, 65537, %v9875_v1  ;;  %v2503_v52 = vor.u32 %v2501_v36, %v7250_v43  ;;  %v2010_v25 = vor.u32 %v2008_v18, %v7252_v46  ;;  %v383_v0 = vpack.c.bf16 %v362_v61, %v361_v47  ;;  %v7281_v36 = vld [vmem:[#allocation2 + $0x38] sm:$0xff] }
  0x6f   : > { %v7263_v10 = vcombine.low %v949_v20, %v6602_v3  ;;  %v561_v56 = vand.u32 15, %v423_v37  ;;  %v7265_v63 = vrot.slane %v1624_v51, 7  ;;  %v554_v60 = vand.u32 15, %v422_v48  ;;  %2178 = vst.msk [vmem:[#allocation3 + $0x80] sm:$0xff] %vm336_vm0, %v7281_v36 }
  0x70   : > { %v425_v4 = vadd.s32 152, %v6599_v2  ;;  %v2504_v6 = vsel %vm1177_vm12, %v7162_v55, %v2503_v52  ;;  %v2011_v45 = vsel %vm1177_vm12, %v7167_v12, %v2010_v25  ;;  %v1783_v32 = vor.u32 %v1781_v33, %v1779_v23  ;;  %399 = vst.msk [vmem:[#allocation2 + $0x60] sm:$0xff] %vm336_vm0, %v383_v0 }
  0x71   : > { %v1072_v9 = vshll.u32 %v7263_v10, 16  ;;  %vm871_vm14 = vcmp.lt.s32.totalorder %v561_v56, 15  ;;  %2595 = vrot.lane.b32.xlu0 %v2504_v6, %s6528_s21  ;;  %v1629_v7 = vor.u32 %v1627_v35, %v7265_v63  ;;  %vm838_vm11 = vcmp.gt.s32.totalorder %v554_v60, 0 }
  0x72   : > { %2102 = vrot.lane.b32.xlu1 %v2011_v45, %s6527_s16  ;;  %vm1473_vm9 = vmpackc.low %vm871_vm14, %vm871_vm14  ;;  %v575_v27 = vand.u32 15, %v425_v4  ;;  %v1076_v12 = vshrl.u32 %v7263_v10, 16  ;;  %v384_v26 = vpack.c.bf16 %v364_v24, %v363_v19  ;;  %v7290_v18 = vadd.s32 144, %v6599_v2 }
  0x73   : > { %v1074_v21 = vrot.slane %v1072_v9, 1  ;;  %v1505_v55 = vsel %vm1473_vm9, 65537, %v9875_v1  ;;  %vm919_vm7 = vmpackc.low %vm838_vm11, %vm838_vm11  ;;  %v7285_v49 = vsel %vm1177_vm12, %v7164_v62, %v1629_v7 }
  0x74   : > { %9977 = vst [vmem:[#allocation14_spill] sm:$0xff] %v7285_v49  ;;  %v6039_v23 = vcombine.low %v6602_v3, %v1505_v55  ;;  %v951_v33 = vsel %vm919_vm7, 65537, %v9875_v1  ;;  %vm9872_vm14 = vcmp.ne.s16.totalorder %v7285_v49, 0  ;;  %vm7303_vm9 = vcmp.lt.s32.totalorder %v575_v27, 15  ;;  %400 = vst.msk [vmem:[#allocation2 + $0x68] sm:$0xff] %vm336_vm0, %v384_v26 }
  0x75   : > { %v7298_v37 = vsel %vm1015_vm4, %v1070_v13, %v1074_v21  ;;  %v7301_v62 = vcombine.low %v951_v33, %v6602_v3  ;;  %2691 = vrot.lane.b32.xlu0 %v7133_v39, %s6527_s16  ;;  %v2213_v61 = vsel %vm9872_vm14, %v7192_v57, 0  ;;  %v2769_v13 = vsel %vm9872_vm14, %v7295_v53, 0  ;;  %vm1475_vm11 = vmpackc.low %vm7303_vm9, %vm7303_vm9  ;;  %v2957_v33 = vld [vmem:[#allocation3 + $0x70] sm:$0xff] }
  0x76   : > { %1386 = vrot.lane.b32.xlu1 %v7036_v5, %s6526_s15  ;;  %vm9924_vm7 = vcmp.ne.s16.totalorder %v7298_v37, 0  ;;  %v1719_v51 = vsel %vm9872_vm14, %v7133_v39, 0  ;;  %v2279_v35 = vshll.u32 %v2213_v61, 16  ;;  %v2835_v20 = vshll.u32 %v2769_v13, 16  ;;  %6394 = vmatprep.mubr.msk.bf16.mxu1 %vm336_vm0, %v2957_v33 }
  0x77   : > { %v2839_v48 = vshrl.u32 %v2769_v13, 16  ;;  %v2443_v52 = vsel %vm9924_vm7, %v7192_v57, 0  ;;  %v1785_v56 = vshll.u32 %v1719_v51, 16  ;;  %v1950_v5 = vsel %vm9924_vm7, %v7133_v39, 0  ;;  %v2960_v13 = vld [vmem:[#allocation3 + $0x88] sm:$0xff] }
  0x78   : > { %v2506_v25 = vshrl.u32 %v2443_v52, 16  ;;  %v2509_v10 = vshll.u32 %v2443_v52, 16  ;;  %v2281_v60 = vrot.slane %v2279_v35, 1  ;;  %v2837_v0 = vrot.slane %v2835_v20, 1  ;;  %6395 = vmatmul.mubr.msk.bf16.gmra.mrb[8].mxu1 %vm336_vm0, %v2960_v13  ;;  %v7402_v13 = vld [vmem:[#allocation2 + $0x48] sm:$0xff] }
  0x79   : > { %v2013_v4 = vshrl.u32 %v1950_v5, 16  ;;  %v2016_v19 = vshll.u32 %v1950_v5, 16  ;;  %v1787_v6 = vrot.slane %v1785_v56, 1  ;;  %v1632_v45 = vshrl.u32 %v6039_v23, 16  ;;  %2180 = vst.msk [vmem:[#allocation3 + $0xb0] sm:$0xff] %vm336_vm0, %v7402_v13 }
  0x7a   : > { %v7328_v24 = vrot.slane %v2506_v25, 7  ;;  %v1635_v9 = vshll.u32 %v6039_v23, 16  ;;  %v2282_v7 = vsel %vm1015_vm4, %v7247_v31, %v2281_v60  ;;  %v2838_v27 = vsel %vm1015_vm4, %v7244_v40, %v2837_v0 }
  0x7b   : > { %v7337_v55 = vrot.slane %v2013_v4, 7  ;;  %v1078_v26 = vor.u32 %v1076_v12, %v1074_v21  ;;  %2933 = vst.msk [vmem:[#allocation3 + $0xa0] sm:$0xff] %vm336_vm0, %v2838_v27  ;;  %2367 = vrot.lane.b32.xlu0 %v2282_v7, %s6526_s15  ;;  %v1788_v35 = vsel %vm1015_vm4, %v1783_v32, %v1787_v6  ;;  %v7343_v20 = vrot.slane %v1632_v45, 7  ;;  %v7365_v4 = vld [vmem:[#allocation2 + $0x40] sm:$0xff] }
  0x7c   : > { %v2511_v23 = vor.u32 %v2509_v10, %v7328_v24  ;;  %v2283_v52 = vshrl.u32 %v2213_v61, 16  ;;  %1873 = vrot.lane.b32.xlu1 %v1788_v35, %s6528_s21  ;;  %v1080_v31 = vshll.u32 %v7301_v62, 16  ;;  %v1789_v21 = vshrl.u32 %v1719_v51, 16  ;;  %2179 = vst.msk [vmem:[#allocation3 + $0x98] sm:$0xff] %vm336_vm0, %v7365_v4 }
  0x7d   : > { %v2018_v40 = vor.u32 %v2016_v19, %v7337_v55  ;;  %v1507_v12 = vsel %vm1475_vm11, 65537, %v9875_v1  ;;  %v2841_v32 = vor.u32 %v2839_v48, %v2837_v0  ;;  %v1637_v25 = vor.u32 %v1635_v9, %v7343_v20 }
  0x7e   : > { %v2512_v61 = vsel %vm1177_vm12, %v7250_v43, %v2511_v23  ;;  %v6040_v10 = vcombine.low %v6602_v3, %v1507_v12  ;;  %v2285_v56 = vor.u32 %v2283_v52, %v2281_v60  ;;  %v7362_v5 = vrot.slane %v1080_v31, 1 }
  0x7f   : > { %v2019_v51 = vsel %vm1177_vm12, %v7252_v46, %v2018_v40  ;;  %v568_v47 = vand.u32 15, %v7290_v18  ;;  %2597 = vrot.lane.b32.xlu0 %v2512_v61, %s6528_s21  ;;  %v7370_v48 = vsel %vm1177_vm12, %v7265_v63, %v1637_v25  ;;  %v1791_v43 = vor.u32 %v1789_v21, %v1787_v6  ;;  %v7376_v46 = vld [vmem:[#allocation2 + $0x58] sm:$0xff]  ;;  %v7412_v21 = vld [vmem:[#allocation2 + $0x50] sm:$0xff] }
  0x80   : > { %9980 = vst [vmem:[#allocation15_spill] sm:$0xff] %v7370_v48  ;;  %v1640_v0 = vshrl.u32 %v6040_v10, 16  ;;  %v1643_v19 = vshll.u32 %v6040_v10, 16  ;;  %2104 = vrot.lane.b32.xlu1 %v2019_v51, %s6527_s16  ;;  %vm9873_vm9 = vcmp.ne.s16.totalorder %v7370_v48, 0  ;;  %v7380_v18 = vsel %vm1015_vm4, %v1078_v26, %v7362_v5  ;;  %2181 = vst.msk [vmem:[#allocation3 + $0xc8] sm:$0xff] %vm336_vm0, %v7412_v21 }
  0x81   : > { %vm7382_vm11 = vcmp.gt.s32.totalorder %v568_v47, 0  ;;  %v7387_v63 = vadd.s32 168, %v6599_v2  ;;  %v2214_v6 = vsel %vm9873_vm9, %v7295_v53, 0  ;;  %v2770_v45 = vsel %vm9873_vm9, %v7376_v46, 0 }
  0x82   : > { %vm9920_vm14 = vcmp.ne.s16.totalorder %v7380_v18, 0  ;;  %v1720_v9 = vsel %vm9873_vm9, %v7192_v57, 0  ;;  %v2287_v7 = vshll.u32 %v2214_v6, 16  ;;  %v2843_v27 = vshll.u32 %v2770_v45, 16  ;;  %v2963_v23 = vld [vmem:[#allocation3 + $0xa0] sm:$0xff]  ;;  %vm921_vm9 = vmpackc.low %vm7382_vm11, %vm7382_vm11 }
  0x83   : > { %v2847_v26 = vshrl.u32 %v2770_v45, 16  ;;  %v2444_v33 = vsel %vm9920_vm14, %v7295_v53, 0  ;;  %2693 = vrot.lane.b32.xlu0 %v7192_v57, %s6527_s16  ;;  %v1793_v40 = vshll.u32 %v1720_v9, 16  ;;  %v1951_v31 = vsel %vm9920_vm14, %v7192_v57, 0  ;;  %6398 = vmatprep.mubr.msk.bf16.mxu1 %vm336_vm0, %v2963_v23 }
  0x84   : > { %v2514_v35 = vshrl.u32 %v2444_v33, 16  ;;  %v2517_v52 = vshll.u32 %v2444_v33, 16  ;;  %v2289_v12 = vrot.slane %v2287_v7, 1  ;;  %v2845_v61 = vrot.slane %v2843_v27, 1  ;;  %1388 = vrot.lane.b32.xlu1 %v7133_v39, %s6526_s15 }
  0x85   : > { %v2021_v25 = vshrl.u32 %v1951_v31, 16  ;;  %v2024_v10 = vshll.u32 %v1951_v31, 16  ;;  %v1795_v47 = vrot.slane %v1793_v40, 1  ;;  %v7420_v45 = vrot.slane %v1640_v0, 7 }
  0x86   : > { %v7418_v51 = vrot.slane %v2514_v35, 7  ;;  %v2291_v33 = vshrl.u32 %v2214_v6, 16  ;;  %v2290_v7 = vsel %vm1015_vm4, %v2285_v56, %v2289_v12  ;;  %v2846_v27 = vsel %vm1015_vm4, %v2841_v32, %v2845_v61 }
  0x87   : > { %v7427_v39 = vrot.slane %v2021_v25, 7  ;;  %v1084_v23 = vshrl.u32 %v7301_v62, 16  ;;  %v2849_v31 = vor.u32 %v2847_v26, %v2845_v61  ;;  %2934 = vst.msk [vmem:[#allocation3 + $0xb8] sm:$0xff] %vm336_vm0, %v2846_v27  ;;  %2369 = vrot.lane.b32.xlu0 %v2290_v7, %s6526_s15  ;;  %v1796_v6 = vsel %vm1015_vm4, %v1791_v43, %v1795_v47 }
  0x88   : > { %v2519_v0 = vor.u32 %v2517_v52, %v7418_v51  ;;  %v1645_v60 = vor.u32 %v1643_v19, %v7420_v45  ;;  %1875 = vrot.lane.b32.xlu1 %v1796_v6, %s6528_s21  ;;  %v2293_v32 = vor.u32 %v2291_v33, %v2289_v12  ;;  %v953_v35 = vsel %vm921_vm9, 65537, %v9875_v1  ;;  %v7451_v12 = vld [vmem:[#allocation2 + $0x60] sm:$0xff] }
  0x89   : > { %v2026_v56 = vor.u32 %v2024_v10, %v7427_v39  ;;  %v1797_v40 = vshrl.u32 %v1720_v9, 16  ;;  %v7445_v52 = vcombine.low %v953_v35, %v6602_v3  ;;  %v589_v43 = vand.u32 15, %v7387_v63  ;;  %v887_v10 = vld [vmem:[#allocation2 + $0x8] sm:$0xff] }
  0x8a   : > { %v2520_v62 = vsel %vm1177_vm12, %v7328_v24, %v2519_v0  ;;  %v7442_v26 = vsel %vm1177_vm12, %v7343_v20, %v1645_v60  ;;  %v1086_v9 = vor.u32 %v1084_v23, %v7362_v5  ;;  %v886_v24 = vld [vmem:[#allocation2] sm:$0x80]  ;;  %v7467_v5 = vpop.permute.xlu0 %1374 }
  0x8b   : > { %9983 = vst [vmem:[#allocation16_spill] sm:$0xff] %v7442_v26  ;;  %v2027_v19 = vsel %vm1177_vm12, %v7337_v55, %v2026_v56  ;;  %vm9874_vm11 = vcmp.ne.s16.totalorder %v7442_v26, 0  ;;  %v1799_v61 = vor.u32 %v1797_v40, %v1795_v47  ;;  %2599 = vrot.lane.b32.xlu0 %v2520_v62, %s6528_s21  ;;  %v1088_v55 = vshll.u32 %v7445_v52, 16 }
  0x8c   : > { %v2215_v20 = vsel %vm9874_vm11, %v7376_v46, 0  ;;  %v2771_v63 = vsel %vm9874_vm11, %v7451_v12, 0  ;;  %v7465_v25 = vsel %vm9874_vm11, %v7295_v53, 0  ;;  %2106 = vrot.lane.b32.xlu1 %v2027_v19, %s6527_s16  ;;  %vm875_vm9 = vcmp.lt.s32.totalorder %v589_v43, 15 }
  0x8d   : > { %v2295_v47 = vshll.u32 %v2215_v20, 16  ;;  %v2851_v33 = vshll.u32 %v2771_v63, 16  ;;  %v2855_v7 = vshrl.u32 %v2771_v63, 16  ;;  %v1801_v27 = vshll.u32 %v7465_v25, 16  ;;  %vm1477_vm11 = vmpackc.low %vm875_vm9, %vm875_vm9 }
  0x8e   : > { %v1090_v23 = vrot.slane %v1088_v55, 1  ;;  %v2299_v0 = vshrl.u32 %v2215_v20, 16  ;;  %v1160_v6 = vsel %vm9902_vm2, %v886_v24, 0  ;;  %v1161_v40 = vsel %vm9889_vm3, %v887_v10, 0  ;;  %v2966_v62 = vld [vmem:[#allocation3 + $0xb8] sm:$0xff] }
  0x8f   : > { %v2297_v60 = vrot.slane %v2295_v47, 1  ;;  %v2853_v56 = vrot.slane %v2851_v33, 1  ;;  %v1803_v35 = vrot.slane %v1801_v27, 1  ;;  %2695 = vrot.lane.b32.xlu0 %v7295_v53, %s6527_s16  ;;  %v1509_v43 = vsel %vm1477_vm11, 65537, %v9875_v1  ;;  %6399 = vmatmul.mubr.msk.bf16.gmra.mrb[12].mxu1 %vm336_vm0, %v2966_v62 }
  0x90   : > { %v7478_v19 = vsel %vm1015_vm4, %v1086_v9, %v1090_v23  ;;  %v1179_v20 = vshrl.u32 %v1160_v6, 16  ;;  %v1183_v63 = vshrl.u32 %v1161_v40, 16  ;;  %1390 = vrot.lane.b32.xlu1 %v7192_v57, %s6526_s15  ;;  %v7489_v10 = vpop.permute.xlu1 %1376  ;;  %v7491_v9 = vld [vmem:[#allocation2 + $0x58] sm:$0xff]  ;;  %v6041_v57 = vcombine.low %v6602_v3, %v1509_v43 }
  0x91   : > { %v2298_v24 = vsel %vm1015_vm4, %v2293_v32, %v2297_v60  ;;  %v2854_v55 = vsel %vm1015_vm4, %v2849_v31, %v2853_v56  ;;  %v7484_v47 = vor.u32 %v2855_v7, %v2853_v56  ;;  %vm9905_vm9 = vcmp.ne.s16.totalorder %v7478_v19, 0  ;;  %v7502_v7 = vpop.permute.xlu0 %2681  ;;  %2182 = vst.msk [vmem:[#allocation3 + $0xe0] sm:$0xff] %vm336_vm0, %v7491_v9 }
  0x92   : > { %2935 = vst.msk [vmem:[#allocation3 + $0xd0] sm:$0xff] %vm336_vm0, %v2854_v55  ;;  %v2445_v33 = vsel %vm9905_vm9, %v7376_v46, 0  ;;  %v1804_v32 = vsel %vm1015_vm4, %v1799_v61, %v1803_v35  ;;  %v1952_v31 = vsel %vm9905_vm9, %v7295_v53, 0  ;;  %vm1422_vm11 = vcmask 523520  }
  0x93   : > { %v2522_v27 = vshrl.u32 %v2445_v33, 16  ;;  %v2525_v6 = vshll.u32 %v2445_v33, 16  ;;  %v2029_v56 = vshrl.u32 %v1952_v31, 16  ;;  %v2032_v62 = vshll.u32 %v1952_v31, 16  ;;  %2371 = vrot.lane.b32.xlu0 %v2298_v24, %s6526_s15 }
  0x94   : > { %v1648_v55 = vshrl.u32 %v6041_v57, 16  ;;  %v1651_v61 = vshll.u32 %v6041_v57, 16  ;;  %v7507_v1 = vor.u32 %v2299_v0, %v2297_v60  ;;  %v1181_v26 = vrot.slane %v1179_v20, 7  ;;  %1877 = vrot.lane.b32.xlu1 %v1804_v32, %s6528_s21  ;;  %v7519_v57 = vpop.permute.xlu1 %1378 }
  0x95   : > { %v7509_v48 = vrot.slane %v2522_v27, 7  ;;  %v7512_v43 = vrot.slane %v2029_v56, 7  ;;  %v1185_v49 = vrot.slane %v1183_v63, 7  ;;  %v1186_v44 = vshll.u32 %v1161_v40, 16  ;;  %v7526_v40 = vpop.permute.xlu0 %2683 }
  0x96   : > { %v7514_v29 = vrot.slane %v1648_v55, 7  ;;  %v426_v33 = vadd.s32 160, %v6599_v2  ;;  %v1092_v31 = vshrl.u32 %v7445_v52, 16  ;;  %v1805_v24 = vshrl.u32 %v7465_v25, 16 }
  0x97   : > { %v2527_v0 = vor.u32 %v2525_v6, %v7509_v48  ;;  %v2034_v60 = vor.u32 %v2032_v62, %v7512_v43  ;;  %v1188_v20 = vor.u32 %v1186_v44, %v1185_v49  ;;  %v1162_v63 = vsel %vm9887_vm10, %v6777_v50, 0 }
  0x98   : > { %v1653_v32 = vor.u32 %v1651_v61, %v7514_v29  ;;  %v582_v27 = vand.u32 15, %v426_v33  ;;  %v1094_v52 = vor.u32 %v1092_v31, %v1090_v23  ;;  %v1807_v56 = vor.u32 %v1805_v24, %v1803_v35  ;;  %v366_v61 = vld [vmem:[%s6614_s14 + $0xc8] sm:$0xff] }
  0x99   : > { %v2528_v25 = vsel %vm1177_vm12, %v7418_v51, %v2527_v0  ;;  %v2035_v6 = vsel %vm1177_vm12, %v7427_v39, %v2034_v60  ;;  %v1189_v44 = vsel %vm1177_vm12, %v1181_v26, %v1188_v20  ;;  %v1191_v62 = vshrl.u32 %v1162_v63, 16  ;;  %v365_v39 = vld [vmem:[%s6614_s14 + $0xc0] sm:$0xff]  ;;  %v7546_v26 = vld [vmem:[#allocation2 + $0x68] sm:$0xff] }
  0x9a   : > { %2601 = vrot.lane.b32.xlu0 %v2528_v25, %s6528_s21  ;;  %2108 = vrot.lane.b32.xlu1 %v2035_v6, %s6527_s16  ;;  %v7538_v50 = vsel %vm1177_vm12, %v7420_v45, %v1653_v32  ;;  %1326 = vst.msk [vmem:[#allocation3] sm:$0xff] %vm336_vm0, %v1189_v44  ;;  %vm842_vm10 = vcmp.gt.s32.totalorder %v582_v27, 0  ;;  %v1194_v23 = vshll.u32 %v1162_v63, 16  ;;  %v1163_v51 = vsel %vm9901_vm8, %v6799_v15, 0 }
  0x9b   : > { %9984 = vst [vmem:[#allocation17_spill] sm:$0xff] %v7538_v50  ;;  %vm9900_vm6 = vcmp.ne.s16.totalorder %v7538_v50, 0  ;;  %1423 = vst.msk [vmem:[#allocation3] sm:$0xff] %vm1422_vm11, %v7467_v5  ;;  %v1193_v35 = vrot.slane %v1191_v62, 7  ;;  %v1199_v45 = vshrl.u32 %v1163_v51, 16  ;;  %v1202_v55 = vshll.u32 %v1163_v51, 16 }
  0x9c   : > { %vm923_vm3 = vmpackc.low %vm842_vm10, %vm842_vm10  ;;  %v2216_v33 = vsel %vm9900_vm6, %v7451_v12, 0  ;;  %v2772_v15 = vsel %vm9900_vm6, %v7546_v26, 0  ;;  %v9985_v31 = vmov 0   ;;  %v7561_v0 = vsel %vm9900_vm6, %v7376_v46, 0  ;;  %v2586_v5 = vpop.permute.xlu1 %2585 }
  0x9d   : > { %v955_v24 = vsel %vm923_vm3, 65537, %v9985_v31  ;;  %v2303_v60 = vshll.u32 %v2216_v33, 16  ;;  %v2859_v20 = vshll.u32 %v2772_v15, 16  ;;  %v2863_v63 = vshrl.u32 %v2772_v15, 16  ;;  %v2356_v27 = vpop.permute.xlu0 %2355 }
  0x9e   : > { %v6025_v32 = vcombine.low %v955_v24, %v6602_v3  ;;  %2697 = vrot.lane.b32.xlu0 %v7376_v46, %s6527_s16  ;;  %1392 = vrot.lane.b32.xlu1 %v7295_v53, %s6526_s15  ;;  %v1809_v25 = vshll.u32 %v7561_v0, 16  ;;  %v1196_v6 = vor.u32 %v1194_v23, %v1193_v35  ;;  %v7569_v44 = vrot.slane %v1199_v45, 7  ;;  %2403 = vst.msk [vmem:[#allocation3 + $0x8] sm:$0xff] %vm1422_vm11, %v2356_v27 }
  0x9f   : > { %v385_v62 = vpack.c.bf16 %v366_v61, %v365_v39  ;;  %v2305_v51 = vrot.slane %v2303_v60, 1  ;;  %v2861_v50 = vrot.slane %v2859_v20, 1  ;;  %v429_v24 = vadd.s32 184, %v6599_v2  ;;  %v368_v60 = vld [vmem:[%s6614_s14 + $0xd8] sm:$0xff] }
  0xa0   : > { %v1096_v15 = vshll.u32 %v6025_v32, 16  ;;  %v1811_v28 = vrot.slane %v1809_v25, 1  ;;  %v1197_v42 = vsel %vm1177_vm12, %v1185_v49, %v1196_v6  ;;  %v1204_v58 = vor.u32 %v1202_v55, %v7569_v44  ;;  %v2093_v8 = vpop.permute.xlu1 %2092 }
  0xa1   : > { %401 = vst.msk [vmem:[#allocation2 + $0x70] sm:$0xff] %vm336_vm0, %v385_v62  ;;  %v2307_v53 = vshrl.u32 %v2216_v33, 16  ;;  %v2306_v23 = vsel %vm1015_vm4, %v7507_v1, %v2305_v51  ;;  %v2862_v39 = vsel %vm1015_vm4, %v7484_v47, %v2861_v50  ;;  %v7580_v45 = vor.u32 %v2863_v63, %v2861_v50  ;;  %1327 = vst.msk [vmem:[#allocation3 + $0x18] sm:$0xff] %vm336_vm0, %v1197_v42 }
  0xa2   : > { %v1098_v61 = vrot.slane %v1096_v15, 1  ;;  %2936 = vst.msk [vmem:[#allocation3 + $0xe8] sm:$0xff] %vm336_vm0, %v2862_v39  ;;  %2373 = vrot.lane.b32.xlu0 %v2306_v23, %s6526_s15  ;;  %v1812_v49 = vsel %vm1015_vm4, %v1807_v56, %v1811_v28  ;;  %v1205_v1 = vsel %vm1177_vm12, %v1193_v35, %v1204_v58  ;;  %v603_v55 = vand.u32 15, %v429_v24  ;;  %v367_v56 = vld [vmem:[%s6614_s14 + $0xd0] sm:$0xff]  ;;  %v7608_v35 = vld [vmem:[#allocation2 + $0x60] sm:$0xff]  ;;  %v370_v15 = vld [vmem:[%s6614_s14 + $0xe8] sm:$0xff] }
  0xa3   : > { %1424 = vst.msk [vmem:[#allocation3 + $0x18] sm:$0xff] %vm1422_vm11, %v7489_v10  ;;  %v7589_v47 = vor.u32 %v2307_v53, %v2305_v51  ;;  %1879 = vrot.lane.b32.xlu1 %v1812_v49, %s6528_s21  ;;  %v428_v42 = vadd.s32 176, %v6599_v2  ;;  %v1100_v33 = vshrl.u32 %v6025_v32, 16  ;;  %vm1909_vm3 = vcmask 785920   ;;  %v369_v51 = vld [vmem:[%s6614_s14 + $0xe0] sm:$0xff] }
  0xa4   : > { %v7592_v50 = vsel %vm1015_vm4, %v1094_v52, %v1098_v61  ;;  %1328 = vst.msk [vmem:[#allocation3 + $0x30] sm:$0xff] %vm336_vm0, %v1205_v1  ;;  %vm7602_vm6 = vcmp.lt.s32.totalorder %v603_v55, 15  ;;  %vm2140_vm8 = vcmask 1048320   ;;  %v1813_v10 = vshrl.u32 %v7561_v0, 16  ;;  %v2969_v52 = vld [vmem:[#allocation3 + $0xd0] sm:$0xff]  ;;  %2183 = vst.msk [vmem:[#allocation3 + $0xf8] sm:$0xff] %vm336_vm0, %v7608_v35 }
  0xa5   : > { %vm9904_vm10 = vcmp.ne.s16.totalorder %v7592_v50, 0  ;;  %1425 = vst.msk [vmem:[#allocation3 + $0x30] sm:$0xff] %vm1422_vm11, %v7519_v57  ;;  %vm1479_vm2 = vmpackc.low %vm7602_vm6, %vm7602_vm6  ;;  %v7619_v63 = vor.u32 %v1100_v33, %v1098_v61  ;;  %v2358_v0 = vpop.permute.xlu0 %2357  ;;  %6402 = vmatprep.mubr.msk.bf16.mxu1 %vm336_vm0, %v2969_v52  ;;  %v431_v49 = vadd.s32 200, %v6599_v2  ;;  %v387_v55 = vpack.c.bf16 %v370_v15, %v369_v51 }
  0xa6   : > { %2633 = vst.msk [vmem:[#allocation3 + $0x8] sm:$0xff] %vm1909_vm3, %v2586_v5  ;;  %v2446_v20 = vsel %vm9904_vm10, %v7451_v12, 0  ;;  %v1953_v57 = vsel %vm9904_vm10, %v7376_v46, 0  ;;  %v596_v5 = vand.u32 15, %v428_v42  ;;  %v1862_v62 = vpop.permute.xlu1 %1861  ;;  %v1511_v24 = vsel %vm1479_vm2, 65537, %v9985_v31 }
  0xa7   : > { %2729 = vst.msk [vmem:[#allocation3 + $0x8] sm:$0xff] %vm2140_vm8, %v7502_v7  ;;  %v2530_v32 = vshrl.u32 %v2446_v20, 16  ;;  %v2533_v27 = vshll.u32 %v2446_v20, 16  ;;  %v2037_v25 = vshrl.u32 %v1953_v57, 16  ;;  %v2040_v6 = vshll.u32 %v1953_v57, 16 }
  0xa8   : > { %2404 = vst.msk [vmem:[#allocation3 + $0x20] sm:$0xff] %vm1422_vm11, %v2358_v0  ;;  %vm844_vm6 = vcmp.gt.s32.totalorder %v596_v5, 0  ;;  %v7630_v53 = vor.u32 %v1813_v10, %v1811_v28  ;;  %v386_v7 = vpack.c.bf16 %v368_v60, %v367_v56  ;;  %v6042_v61 = vcombine.low %v6602_v3, %v1511_v24 }
  0xa9   : > { %1910 = vst.msk [vmem:[#allocation3] sm:$0xff] %vm1909_vm3, %v1862_v62  ;;  %v7633_v23 = vrot.slane %v2530_v32, 7  ;;  %v7635_v39 = vrot.slane %v2037_v25, 7  ;;  %vm925_vm5 = vmpackc.low %vm844_vm6, %vm844_vm6  ;;  %v430_v28 = vadd.s32 192, %v6599_v2  ;;  %v433_v42 = vadd.s32 216, %v6599_v2  ;;  %v2972_v33 = vld [vmem:[#allocation3 + $0xe8] sm:$0xff] }
  0xaa   : > { %2141 = vst.msk [vmem:[#allocation3] sm:$0xff] %vm2140_vm8, %v2093_v8  ;;  %v957_v1 = vsel %vm925_vm5, 65537, %v9985_v31  ;;  %v1656_v58 = vshrl.u32 %v6042_v61, 16  ;;  %v1659_v10 = vshll.u32 %v6042_v61, 16  ;;  %v1864_v52 = vpop.permute.xlu1 %1863  ;;  %6403 = vmatmul.mubr.msk.bf16.gmra.mrb[16].mxu1 %vm336_vm0, %v2972_v33  ;;  %v617_v20 = vand.u32 15, %v431_v49 }
  0xab   : > { %402 = vst.msk [vmem:[#allocation2 + $0x78] sm:$0xff] %vm336_vm0, %v386_v7  ;;  %v2535_v56 = vor.u32 %v2533_v27, %v7633_v23  ;;  %v2042_v60 = vor.u32 %v2040_v6, %v7635_v39  ;;  %v6026_v8 = vcombine.low %v957_v1, %v6602_v3  ;;  %v610_v57 = vand.u32 15, %v430_v28  ;;  %403 = vst.msk [vmem:[#allocation2 + $0x80] sm:$0xff] %vm336_vm0, %v387_v55 }
  0xac   : > { %1911 = vst.msk [vmem:[#allocation3 + $0x18] sm:$0xff] %vm1909_vm3, %v1864_v52  ;;  %v631_v5 = vand.u32 15, %v433_v42  ;;  %v7654_v27 = vrot.slane %v1656_v58, 7  ;;  %v432_v6 = vadd.s32 208, %v6599_v2  ;;  %vm879_vm2 = vcmp.lt.s32.totalorder %v617_v20, 15 }
  0xad   : > { %v2536_v0 = vsel %vm1177_vm12, %v7509_v48, %v2535_v56  ;;  %v2043_v32 = vsel %vm1177_vm12, %v7512_v43, %v2042_v60  ;;  %v1104_v62 = vshll.u32 %v6026_v8, 16  ;;  %vm7659_vm5 = vcmp.gt.s32.totalorder %v610_v57, 0  ;;  %vm1481_vm6 = vmpackc.low %vm879_vm2, %vm879_vm2 }
  0xae   : > { %v2944_v25 = vld [vmem:[#allocation3 + $0x8] sm:$0xff]  ;;  %2603 = vrot.lane.b32.xlu0 %v2536_v0, %s6528_s21  ;;  %2110 = vrot.lane.b32.xlu1 %v2043_v32, %s6527_s16  ;;  %v1108_v15 = vshrl.u32 %v6026_v8, 16  ;;  %v1661_v48 = vor.u32 %v1659_v10, %v7654_v27  ;;  %vm7664_vm10 = vcmp.lt.s32.totalorder %v631_v5, 15  ;;  %v624_v24 = vand.u32 15, %v432_v6  ;;  %vm927_vm9 = vmpackc.low %vm7659_vm5, %vm7659_vm5 }
  0xaf   : > { %3222 = vmatprep.mubr.bf16.mxu0 %v2944_v25  ;;  %v7671_v7 = vsel %vm1147_vm15, %v7021_v59, 0  ;;  %v1106_v61 = vrot.slane %v1104_v62, 1  ;;  %v1513_v49 = vsel %vm1481_vm6, 65537, %v9985_v31  ;;  %v2588_v1 = vpop.permute.xlu0 %2587  ;;  %v959_v56 = vsel %vm927_vm9, 65537, %v9985_v31  ;;  %v7724_v32 = vld [vmem:[#allocation2 + $0x68] sm:$0xff]  ;;  %vm1483_vm6 = vmpackc.low %vm7664_vm10, %vm7664_vm10 }
  0xb0   : > { %v1207_v55 = vshrl.u32 %v7671_v7, 16  ;;  %v7681_v33 = vsel %vm1177_vm12, %v7514_v29, %v1661_v48  ;;  %v7684_v59 = vcombine.low %v6602_v3, %v1513_v49  ;;  %2634 = vst.msk [vmem:[#allocation3 + $0x20] sm:$0xff] %vm1909_vm3, %v2588_v1  ;;  %v2095_v60 = vpop.permute.xlu1 %2094  ;;  %vm7688_vm2 = vcmp.gt.s32.totalorder %v624_v24, 0  ;;  %v7695_v29 = vld [vmem:[#allocation2 + $0x70] sm:$0xff] }
  0xb1   : > { %v2943_v28 = vld [vmem:[#allocation3] sm:$0xff]  ;;  %9992 = vst [vmem:[#allocation18_spill] sm:$0xff] %v7681_v33  ;;  %vm9906_vm5 = vcmp.ne.s16.totalorder %v7681_v33, 0  ;;  %v7701_v10 = vsel %vm1015_vm4, %v7619_v63, %v1106_v61  ;;  %2730 = vst.msk [vmem:[#allocation3 + $0x20] sm:$0xff] %vm2140_vm8, %v7526_v40  ;;  %v7706_v52 = vcombine.low %v959_v56, %v6602_v3  ;;  %v7708_v8 = vor.u32 %v1108_v15, %v1106_v61 }
  0xb2   : > { %3223 = vmatmul.mubr.bf16.vlgmr.msra.gmra.mrb[0].mxu0 %v2943_v28  ;;  %2699 = vrot.lane.b32.xlu0 %v7451_v12, %s6527_s16  ;;  %2142 = vst.msk [vmem:[#allocation3 + $0x18] sm:$0xff] %vm2140_vm8, %v2095_v60  ;;  %v2217_v20 = vsel %vm9906_vm5, %v7546_v26, 0  ;;  %vm1154_vm9 = vcmp.ne.s16.totalorder %v7701_v10, 0  ;;  %v1723_v40 = vsel %vm9906_vm5, %v7451_v12, 0  ;;  %v1664_v28 = vshrl.u32 %v7684_v59, 16  ;;  %v7791_v58 = vld [vmem:[#allocation2 + $0x78] sm:$0xff] }
  0xb3   : > { %1394 = vrot.lane.b32.xlu1 %v7376_v46, %s6526_s15  ;;  %v2773_v46 = vsel %vm9906_vm5, %v7695_v29, 0  ;;  %v2311_v63 = vshll.u32 %v2217_v20, 16  ;;  %v2447_v0 = vsel %vm1154_vm9, %v7546_v26, 0  ;;  %v1817_v62 = vshll.u32 %v1723_v40, 16  ;;  %2184 = vst.msk [vmem:[#allocation3 + $0x110] sm:$0xff] %vm336_vm0, %v7724_v32  ;;  %vm929_vm5 = vmpackc.low %vm7688_vm2, %vm7688_vm2 }
  0xb4   : > { %v2867_v57 = vshll.u32 %v2773_v46, 16  ;;  %v2871_v5 = vshrl.u32 %v2773_v46, 16  ;;  %v2538_v25 = vshrl.u32 %v2447_v0, 16  ;;  %v2541_v6 = vshll.u32 %v2447_v0, 16 }
  0xb5   : > { %v1954_v51 = vsel %vm1154_vm9, %v7451_v12, 0  ;;  %v2313_v15 = vrot.slane %v2311_v63, 1  ;;  %v1819_v1 = vrot.slane %v1817_v62, 1  ;;  %v1667_v56 = vshll.u32 %v7684_v59, 16  ;;  %v2360_v60 = vpop.permute.xlu0 %2359 }
  0xb6   : > { %v2869_v48 = vrot.slane %v2867_v57, 1  ;;  %v2045_v24 = vshrl.u32 %v1954_v51, 16  ;;  %v2048_v61 = vshll.u32 %v1954_v51, 16  ;;  %v7731_v49 = vrot.slane %v2538_v25, 7  ;;  %2405 = vst.msk [vmem:[#allocation3 + $0x38] sm:$0xff] %vm1422_vm11, %v2360_v60  ;;  %v1866_v25 = vpop.permute.xlu1 %1865 }
  0xb7   : > { %v2314_v46 = vsel %vm1015_vm4, %v7589_v47, %v2313_v15  ;;  %v1820_v62 = vsel %vm1015_vm4, %v7630_v53, %v1819_v1  ;;  %v7752_v47 = vrot.slane %v1664_v28, 7  ;;  %v2315_v51 = vshrl.u32 %v2217_v20, 16  ;;  %1912 = vst.msk [vmem:[#allocation3 + $0x30] sm:$0xff] %vm1909_vm3, %v1866_v25 }
  0xb8   : > { %v2870_v63 = vsel %vm1015_vm4, %v7580_v45, %v2869_v48  ;;  %v7742_v57 = vor.u32 %v2871_v5, %v2869_v48  ;;  %v7744_v0 = vrot.slane %v2045_v24, 7  ;;  %2375 = vrot.lane.b32.xlu0 %v2314_v46, %s6526_s15  ;;  %v2543_v59 = vor.u32 %v2541_v6, %v7731_v49  ;;  %v2947_v45 = vld [vmem:[#allocation3 + $0x20] sm:$0xff]  ;;  %1881 = vrot.lane.b32.xlu1 %v1820_v62, %s6528_s21 }
  0xb9   : > { %2937 = vst.msk [vmem:[#allocation3 + $0x100] sm:$0xff] %vm336_vm0, %v2870_v63  ;;  %v2946_v5 = vld [vmem:[#allocation3 + $0x18] sm:$0xff]  ;;  %v1112_v6 = vshll.u32 %v7706_v52, 16  ;;  %v1821_v24 = vshrl.u32 %v1723_v40, 16  ;;  %3230 = vmatprep.mubr.bf16.mxu0 %v2947_v45  ;;  %v1515_v53 = vsel %vm1483_vm6, 65537, %v9985_v31  ;;  %v1669_v28 = vor.u32 %v1667_v56, %v7752_v47 }
  0xba   : > { %v2050_v48 = vor.u32 %v2048_v61, %v7744_v0  ;;  %v2544_v20 = vsel %vm1177_vm12, %v7633_v23, %v2543_v59  ;;  %v2317_v60 = vor.u32 %v2315_v51, %v2313_v15  ;;  %v2590_v46 = vpop.permute.xlu0 %2589  ;;  %v6044_v61 = vcombine.low %v6602_v3, %v1515_v53  ;;  %3231 = vmatmul.mubr.bf16.gmra.mrb[4].mxu0 %v2946_v5  ;;  %v2097_v43 = vpop.permute.xlu1 %2096 }
  0xbb   : > { %v1114_v63 = vrot.slane %v1112_v6, 1  ;;  %v1823_v25 = vor.u32 %v1821_v24, %v1819_v1  ;;  %2635 = vst.msk [vmem:[#allocation3 + $0x38] sm:$0xff] %vm1909_vm3, %v2590_v46  ;;  %v961_v23 = vsel %vm929_vm5, 65537, %v9985_v31  ;;  %v7783_v15 = vsel %vm1177_vm12, %v7654_v27, %v1669_v28 }
  0xbc   : > { %v2051_v40 = vsel %vm1177_vm12, %v7635_v39, %v2050_v48  ;;  %2605 = vrot.lane.b32.xlu0 %v2544_v20, %s6528_s21  ;;  %9995 = vst [vmem:[#allocation19_spill] sm:$0xff] %v7783_v15  ;;  %v1672_v56 = vshrl.u32 %v6044_v61, 16  ;;  %v1675_v39 = vshll.u32 %v6044_v61, 16  ;;  %2143 = vst.msk [vmem:[#allocation3 + $0x30] sm:$0xff] %vm2140_vm8, %v2097_v43  ;;  %v7787_v1 = vcombine.low %v961_v23, %v6602_v3  ;;  %v7818_v20 = vld [vmem:[#allocation2 + $0x70] sm:$0xff] }
  0xbd   : > { %2112 = vrot.lane.b32.xlu1 %v2051_v40, %s6527_s16  ;;  %vm9918_vm10 = vcmp.ne.s16.totalorder %v7783_v15, 0  ;;  %v7795_v59 = vsel %vm1015_vm4, %v7708_v8, %v1114_v63  ;;  %v1116_v27 = vshrl.u32 %v7706_v52, 16  ;;  %v7800_v62 = vrot.slane %v1207_v55, 7  ;;  %2185 = vst.msk [vmem:[#allocation3 + $0x128] sm:$0xff] %vm336_vm0, %v7818_v20 }
  0xbe   : > { %v2218_v51 = vsel %vm9918_vm10, %v7695_v29, 0  ;;  %v2774_v45 = vsel %vm9918_vm10, %v7791_v58, 0  ;;  %vm1155_vm2 = vcmp.ne.s16.totalorder %v7795_v59, 0  ;;  %v1724_v8 = vsel %vm9918_vm10, %v7546_v26, 0  ;;  %v2686_v5 = vpop.permute.xlu0 %2685  ;;  %v7816_v24 = vpop.permute.xlu1 %1380 }
  0xbf   : > { %v2319_v52 = vshll.u32 %v2218_v51, 16  ;;  %v2875_v48 = vshll.u32 %v2774_v45, 16  ;;  %v2879_v6 = vshrl.u32 %v2774_v45, 16  ;;  %v2448_v55 = vsel %vm1155_vm2, %v7695_v29, 0  ;;  %2731 = vst.msk [vmem:[#allocation3 + $0x38] sm:$0xff] %vm2140_vm8, %v2686_v5 }
  0xc0   : > { %v2975_v53 = vld [vmem:[#allocation3 + $0x100] sm:$0xff]  ;;  %2701 = vrot.lane.b32.xlu0 %v7546_v26, %s6527_s16  ;;  %v2546_v28 = vshrl.u32 %v2448_v55, 16  ;;  %v2549_v46 = vshll.u32 %v2448_v55, 16  ;;  %v1825_v61 = vshll.u32 %v1724_v8, 16  ;;  %v1955_v40 = vsel %vm1155_vm2, %v7546_v26, 0 }
  0xc1   : > { %6406 = vmatprep.mubr.msk.bf16.mxu1 %vm336_vm0, %v2975_v53  ;;  %v2321_v43 = vrot.slane %v2319_v52, 1  ;;  %v2877_v23 = vrot.slane %v2875_v48, 1  ;;  %1396 = vrot.lane.b32.xlu1 %v7451_v12, %s6526_s15  ;;  %v2053_v45 = vshrl.u32 %v1955_v40, 16  ;;  %v2056_v5 = vshll.u32 %v1955_v40, 16  ;;  %v371_v48 = vld [vmem:[%s6614_s14 + $0xf0] sm:$0xff] }
  0xc2   : > { %v7830_v55 = vrot.slane %v2546_v28, 7  ;;  %v1827_v42 = vrot.slane %v1825_v61, 1  ;;  %v7832_v15 = vrot.slane %v1672_v56, 7  ;;  %v2323_v33 = vshrl.u32 %v2218_v51, 16 }
  0xc3   : > { %v2322_v17 = vsel %vm1015_vm4, %v2317_v60, %v2321_v43  ;;  %v2878_v53 = vsel %vm1015_vm4, %v7742_v57, %v2877_v23  ;;  %v7837_v41 = vor.u32 %v2879_v6, %v2877_v23  ;;  %v7839_v52 = vrot.slane %v2053_v45, 7 }
  0xc4   : > { %2938 = vst.msk [vmem:[#allocation3 + $0x118] sm:$0xff] %vm336_vm0, %v2878_v53  ;;  %2377 = vrot.lane.b32.xlu0 %v2322_v17, %s6526_s15  ;;  %v2551_v12 = vor.u32 %v2549_v46, %v7830_v55  ;;  %v1828_v56 = vsel %vm1015_vm4, %v1823_v25, %v1827_v42  ;;  %v1677_v51 = vor.u32 %v1675_v39, %v7832_v15  ;;  %v2362_v28 = vpop.permute.xlu0 %2361  ;;  %v1120_v61 = vshll.u32 %v7787_v1, 16  ;;  %v2949_v17 = vld [vmem:[#allocation3 + $0x30] sm:$0xff] }
  0xc5   : > { %v2325_v60 = vor.u32 %v2323_v33, %v2321_v43  ;;  %1883 = vrot.lane.b32.xlu1 %v1828_v56, %s6528_s21  ;;  %v2058_v57 = vor.u32 %v2056_v5, %v7839_v52  ;;  %v1118_v6 = vor.u32 %v1116_v27, %v1114_v63  ;;  %v1829_v40 = vshrl.u32 %v1724_v8, 16  ;;  %2406 = vst.msk [vmem:[#allocation3 + $0x50] sm:$0xff] %vm1422_vm11, %v2362_v28  ;;  %v1868_v23 = vpop.permute.xlu1 %1867  ;;  %v7864_v8 = vld [vmem:[#allocation2 + $0x80] sm:$0xff] }
  0xc6   : > { %v2552_v46 = vsel %vm1177_vm12, %v7731_v49, %v2551_v12  ;;  %v7856_v25 = vsel %vm1177_vm12, %v7752_v47, %v1677_v51  ;;  %v9997_v33 = vshll.u32 %v7671_v7, 16  ;;  %v388_v43 = vpack.c.bf16 %v372_v30, %v371_v48  ;;  %v2950_v63 = vld [vmem:[#allocation3 + $0x38] sm:$0xff] }
  0xc7   : > { %9996 = vst [vmem:[#allocation20_spill] sm:$0xff] %v7856_v25  ;;  %v2059_v27 = vsel %vm1177_vm12, %v7744_v0, %v2058_v57  ;;  %vm9917_vm5 = vcmp.ne.s16.totalorder %v7856_v25, 0  ;;  %v7866_v45 = vrot.slane %v1120_v61, 1  ;;  %v1831_v49 = vor.u32 %v1829_v40, %v1827_v42  ;;  %3238 = vmatprep.mubr.bf16.mxu0 %v2950_v63 }
  0xc8   : > { %v1212_v39 = vor.u32 %v9997_v33, %v7800_v62  ;;  %2607 = vrot.lane.b32.xlu0 %v2552_v46, %s6528_s21  ;;  %v2219_v7 = vsel %vm9917_vm5, %v7791_v58, 0  ;;  %v2775_v30 = vsel %vm9917_vm5, %v7864_v8, 0  ;;  %v1725_v0 = vsel %vm9917_vm5, %v7695_v29, 0  ;;  %404 = vst.msk [vmem:[#allocation2 + $0x88] sm:$0xff] %vm336_vm0, %v388_v43  ;;  %3239 = vmatmul.mubr.bf16.gmra.mrb[8].mxu0 %v2949_v17  ;;  %v7899_v17 = vld [vmem:[#allocation2 + $0x78] sm:$0xff] }
  0xc9   : > { %2114 = vrot.lane.b32.xlu1 %v2059_v27, %s6527_s16  ;;  %v2327_v42 = vshll.u32 %v2219_v7, 16  ;;  %v2883_v5 = vshll.u32 %v2775_v30, 16  ;;  %v2887_v53 = vshrl.u32 %v2775_v30, 16  ;;  %v7884_v48 = vsel %vm1015_vm4, %v1118_v6, %v7866_v45  ;;  %2186 = vst.msk [vmem:[#allocation3 + $0x140] sm:$0xff] %vm336_vm0, %v7899_v17 }
  0xca   : > { %v1213_v47 = vsel %vm1177_vm12, %v7569_v44, %v1212_v39  ;;  %vm1156_vm6 = vcmp.ne.s16.totalorder %v7884_v48, 0  ;;  %v1833_v12 = vshll.u32 %v1725_v0, 16  ;;  %v2592_v44 = vpop.permute.xlu0 %2591  ;;  %v435_v56 = vadd.s32 232, %v6599_v2 }
  0xcb   : > { %1329 = vst.msk [vmem:[#allocation3 + $0x48] sm:$0xff] %vm336_vm0, %v1213_v47  ;;  %v2331_v51 = vshrl.u32 %v2219_v7, 16  ;;  %v2329_v28 = vrot.slane %v2327_v42, 1  ;;  %v2885_v57 = vrot.slane %v2883_v5, 1  ;;  %v2449_v61 = vsel %vm1156_vm6, %v7791_v58, 0  ;;  %v2099_v40 = vpop.permute.xlu1 %2098 }
  0xcc   : > { %1426 = vst.msk [vmem:[#allocation3 + $0x48] sm:$0xff] %vm1422_vm11, %v7816_v24  ;;  %v1956_v6 = vsel %vm1156_vm6, %v7695_v29, 0  ;;  %v2978_v24 = vld [vmem:[#allocation3 + $0x118] sm:$0xff]  ;;  %2703 = vrot.lane.b32.xlu0 %v7695_v29, %s6527_s16  ;;  %v2554_v46 = vshrl.u32 %v2449_v61, 16  ;;  %v2557_v33 = vshll.u32 %v2449_v61, 16  ;;  %v1835_v39 = vrot.slane %v1833_v12, 1 }
  0xcd   : > { %2636 = vst.msk [vmem:[#allocation3 + $0x50] sm:$0xff] %vm1909_vm3, %v2592_v44  ;;  %1913 = vst.msk [vmem:[#allocation3 + $0x48] sm:$0xff] %vm1909_vm3, %v1868_v23  ;;  %v2061_v43 = vshrl.u32 %v1956_v6, 16  ;;  %6407 = vmatmul.mubr.msk.bf16.gmra.mrb[20].mxu1 %vm336_vm0, %v2978_v24  ;;  %v2330_v23 = vsel %vm1015_vm4, %v2325_v60, %v2329_v28  ;;  %v2886_v63 = vsel %vm1015_vm4, %v7837_v41, %v2885_v57  ;;  %1398 = vrot.lane.b32.xlu1 %v7546_v26, %s6526_s15 }
  0xce   : > { %2144 = vst.msk [vmem:[#allocation3 + $0x48] sm:$0xff] %vm2140_vm8, %v2099_v40  ;;  %v7910_v27 = vor.u32 %v2887_v53, %v2885_v57  ;;  %v2064_v7 = vshll.u32 %v1956_v6, 16  ;;  %v7915_v30 = vrot.slane %v2554_v46, 7  ;;  %v1836_v47 = vsel %vm1015_vm4, %v1831_v49, %v1835_v39  ;;  %v2688_v12 = vpop.permute.xlu0 %2687 }
  0xcf   : > { %2939 = vst.msk [vmem:[#allocation3 + $0x130] sm:$0xff] %vm336_vm0, %v2886_v63  ;;  %v7918_v42 = vrot.slane %v2061_v43, 7  ;;  %v645_v5 = vand.u32 15, %v435_v56  ;;  %v7920_v60 = vor.u32 %v2331_v51, %v2329_v28  ;;  %v7922_v44 = vld [vmem:[#allocation2 + $0x88] sm:$0xff]  ;;  %v434_v41 = vadd.s32 224, %v6599_v2  ;;  %v1383_v57 = vpop.permute.xlu1 %1382 }
  0xd0   : > { %2732 = vst.msk [vmem:[#allocation3 + $0x50] sm:$0xff] %vm2140_vm8, %v2688_v12  ;;  %v1124_v26 = vshrl.u32 %v7787_v1, 16  ;;  %v1837_v53 = vshrl.u32 %v1725_v0, 16  ;;  %2379 = vrot.lane.b32.xlu0 %v2330_v23, %s6526_s15  ;;  %v2559_v49 = vor.u32 %v2557_v33, %v7915_v30  ;;  %v1165_v56 = vsel %vm9919_vm1, %v7103_v11, 0 }
  0xd1   : > { %v2066_v61 = vor.u32 %v2064_v7, %v7918_v42  ;;  %vm883_vm5 = vcmp.lt.s32.totalorder %v645_v5, 15  ;;  %2188 = vst.msk [vmem:[#allocation3 + $0x170] sm:$0xff] %vm336_vm0, %v7922_v44  ;;  %1885 = vrot.lane.b32.xlu1 %v1836_v47, %s6528_s21  ;;  %v638_v1 = vand.u32 15, %v434_v41  ;;  %v1215_v28 = vshrl.u32 %v1165_v56, 16 }
  0xd2   : > { %vm1485_vm10 = vmpackc.low %vm883_vm5, %vm883_vm5  ;;  %v7937_v0 = vor.u32 %v1124_v26, %v7866_v45  ;;  %v7939_v51 = vor.u32 %v1837_v53, %v1835_v39  ;;  %v2560_v6 = vsel %vm1177_vm12, %v7830_v55, %v2559_v49  ;;  %v1218_v24 = vshll.u32 %v1165_v56, 16 }
  0xd3   : > { %v2067_v40 = vsel %vm1177_vm12, %v7839_v52, %v2066_v61  ;;  %v1517_v11 = vsel %vm1485_vm10, 65537, %v9985_v31  ;;  %vm7947_vm1 = vcmp.gt.s32.totalorder %v638_v1, 0  ;;  %v2364_v45 = vpop.permute.xlu0 %2363  ;;  %v7951_v43 = vrot.slane %v1215_v28, 7 }
  0xd4   : > { %v6045_v46 = vcombine.low %v6602_v3, %v1517_v11  ;;  %v437_v39 = vadd.s32 248, %v6599_v2  ;;  %2609 = vrot.lane.b32.xlu0 %v2560_v6, %s6528_s21  ;;  %vm931_vm5 = vmpackc.low %vm7947_vm1, %vm7947_vm1  ;;  %2407 = vst.msk [vmem:[#allocation3 + $0x68] sm:$0xff] %vm1422_vm11, %v2364_v45  ;;  %v1870_v55 = vpop.permute.xlu1 %1869  ;;  %v436_v52 = vadd.s32 240, %v6599_v2  ;;  %v1166_v23 = vsel %vm9925_vm13, %v7211_v22, 0 }
  0xd5   : > { %v7966_v63 = vsel %vm9924_vm7, %v7281_v36, 0  ;;  %v7971_v7 = vsel %vm9920_vm14, %v7365_v4, 0  ;;  %2116 = vrot.lane.b32.xlu1 %v2067_v40, %s6527_s16  ;;  %v963_v12 = vsel %vm931_vm5, 65537, %v9985_v31  ;;  %v1220_v41 = vor.u32 %v1218_v24, %v7951_v43  ;;  %v2952_v26 = vld [vmem:[#allocation3 + $0x48] sm:$0xff] }
  0xd6   : > { %v1680_v47 = vshrl.u32 %v6045_v46, 16  ;;  %v1683_v5 = vshll.u32 %v6045_v46, 16  ;;  %v6029_v22 = vcombine.low %v963_v12, %v6602_v3  ;;  %v659_v49 = vand.u32 15, %v437_v39 }
  0xd7   : > { %v2953_v53 = vld [vmem:[#allocation3 + $0x50] sm:$0xff]  ;;  %v652_v36 = vand.u32 15, %v436_v52  ;;  %v1223_v61 = vshrl.u32 %v1166_v23, 16  ;;  %v1221_v4 = vsel %vm1177_vm12, %v7800_v62, %v1220_v41  ;;  %v2594_v1 = vpop.permute.xlu0 %2593  ;;  %v1226_v28 = vshll.u32 %v1166_v23, 16 }
  0xd8   : > { %v7977_v56 = vrot.slane %v1680_v47, 7  ;;  %3246 = vmatprep.mubr.bf16.mxu0 %v2953_v53  ;;  %v1231_v6 = vshrl.u32 %v7966_v63, 16  ;;  %2705 = vrot.lane.b32.xlu0 %v7791_v58, %s6527_s16  ;;  %v1128_v40 = vshll.u32 %v6029_v22, 16  ;;  %1330 = vst.msk [vmem:[#allocation3 + $0x60] sm:$0xff] %vm336_vm0, %v1221_v4  ;;  %vm885_vm1 = vcmp.lt.s32.totalorder %v659_v49, 15  ;;  %v2101_v11 = vpop.permute.xlu1 %2100 }
  0xd9   : > { %2637 = vst.msk [vmem:[#allocation3 + $0x68] sm:$0xff] %vm1909_vm3, %v2594_v1  ;;  %3247 = vmatmul.mubr.bf16.gmra.mrb[12].mxu0 %v2952_v26  ;;  %vm7986_vm10 = vcmp.gt.s32.totalorder %v652_v36, 0  ;;  %v1132_v62 = vshrl.u32 %v6029_v22, 16  ;;  %1400 = vrot.lane.b32.xlu1 %v7695_v29, %s6526_s15  ;;  %vm1487_vm5 = vmpackc.low %vm885_vm1, %vm885_vm1  ;;  %v7994_v33 = vrot.slane %v1223_v61, 7  ;;  %v2981_v36 = vld [vmem:[#allocation3 + $0x130] sm:$0xff]  ;;  %vm10011_vm7 = vcmp.ne.s16.totalorder %v7478_v19, 0 }
  0xda   : > { %v1685_v46 = vor.u32 %v1683_v5, %v7977_v56  ;;  %1427 = vst.msk [vmem:[#allocation3 + $0x60] sm:$0xff] %vm1422_vm11, %v1383_v57  ;;  %v7996_v45 = vrot.slane %v1231_v6, 7  ;;  %v1130_v52 = vrot.slane %v1128_v40, 1  ;;  %v1519_v23 = vsel %vm1487_vm5, 65537, %v9985_v31  ;;  %vm933_vm14 = vmpackc.low %vm7986_vm10, %vm7986_vm10  ;;  %6410 = vmatprep.mubr.msk.bf16.mxu1 %vm336_vm0, %v2981_v36 }
  0xdb   : > { %1914 = vst.msk [vmem:[#allocation3 + $0x60] sm:$0xff] %vm1909_vm3, %v1870_v55  ;;  %v6046_v5 = vcombine.low %v6602_v3, %v1519_v23  ;;  %v2690_v12 = vpop.permute.xlu0 %2689  ;;  %v965_v55 = vsel %vm933_vm14, 65537, %v9985_v31  ;;  %v1228_v41 = vor.u32 %v1226_v28, %v7994_v33  ;;  %v8039_v28 = vld [vmem:[#allocation2 + $0x80] sm:$0xff]  ;;  %vm10013_vm13 = vcmp.ne.s16.totalorder %v7592_v50, 0 }
  0xdc   : > { %v8008_v47 = vsel %vm1177_vm12, %v7832_v15, %v1685_v46  ;;  %2145 = vst.msk [vmem:[#allocation3 + $0x60] sm:$0xff] %vm2140_vm8, %v2101_v11  ;;  %v8017_v26 = vsel %vm1015_vm4, %v7937_v0, %v1130_v52  ;;  %2733 = vst.msk [vmem:[#allocation3 + $0x68] sm:$0xff] %vm2140_vm8, %v2690_v12  ;;  %v8021_v15 = vcombine.low %v965_v55, %v6602_v3  ;;  %v1385_v53 = vpop.permute.xlu1 %1384 }
  0xdd   : > { %10002 = vst [vmem:[#allocation21_spill] sm:$0xff] %v8008_v47  ;;  %vm9922_vm1 = vcmp.ne.s16.totalorder %v8008_v47, 0  ;;  %10003 = vst [vmem:[#allocation22_spill] sm:$0xff] %v8017_v26  ;;  %v8023_v22 = vor.u32 %v1132_v62, %v1130_v52  ;;  %vm1157_vm14 = vcmp.ne.s16.totalorder %v8017_v26, 0  ;;  %v1691_v57 = vshll.u32 %v6046_v5, 16 }
  0xde   : > { %v2220_v31 = vsel %vm9922_vm1, %v7864_v8, 0  ;;  %v2776_v49 = vsel %vm9922_vm1, %v7922_v44, 0  ;;  %v1726_v0 = vsel %vm9922_vm1, %v7791_v58, 0  ;;  %v2450_v1 = vsel %vm1157_vm14, %v7864_v8, 0  ;;  %2187 = vst.msk [vmem:[#allocation3 + $0x158] sm:$0xff] %vm336_vm0, %v8039_v28 }
  0xdf   : > { %v2335_v3 = vshll.u32 %v2220_v31, 16  ;;  %v2891_v61 = vshll.u32 %v2776_v49, 16  ;;  %v2895_v4 = vshrl.u32 %v2776_v49, 16  ;;  %v2562_v6 = vshrl.u32 %v2450_v1, 16  ;;  %v2366_v62 = vpop.permute.xlu0 %2365 }
  0xe0   : > { %v2565_v40 = vshll.u32 %v2450_v1, 16  ;;  %v1841_v11 = vshll.u32 %v1726_v0, 16  ;;  %v1957_v24 = vsel %vm1157_vm14, %v7791_v58, 0  ;;  %2408 = vst.msk [vmem:[#allocation3 + $0x80] sm:$0xff] %vm1422_vm11, %v2366_v62  ;;  %v1872_v55 = vpop.permute.xlu1 %1871  ;;  %v1688_v1 = vshrl.u32 %v6046_v5, 16 }
  0xe1   : > { %v2337_v46 = vrot.slane %v2335_v3, 1  ;;  %v2893_v52 = vrot.slane %v2891_v61, 1  ;;  %v2069_v23 = vshrl.u32 %v1957_v24, 16  ;;  %v2072_v12 = vshll.u32 %v1957_v24, 16  ;;  %v2205_v62 = vld [vmem:[#allocation2 + $0x90] sm:$0x1] }
  0xe2   : > { %v8047_v49 = vrot.slane %v2562_v6, 7  ;;  %v1843_v36 = vrot.slane %v1841_v11, 1  ;;  %v8062_v11 = vrot.slane %v1688_v1, 7 }
  0xe3   : > { %v2338_v29 = vsel %vm1015_vm4, %v7920_v60, %v2337_v46  ;;  %v2894_v39 = vsel %vm1015_vm4, %v7910_v27, %v2893_v52  ;;  %v8053_v2 = vor.u32 %v2895_v4, %v2893_v52  ;;  %v8055_v3 = vrot.slane %v2069_v23, 7  ;;  %v2955_v61 = vld [vmem:[#allocation3 + $0x60] sm:$0xff]  ;;  %v2956_v24 = vld [vmem:[#allocation3 + $0x68] sm:$0xff] }
  0xe4   : > { %2940 = vst.msk [vmem:[#allocation3 + $0x148] sm:$0xff] %vm336_vm0, %v2894_v39  ;;  %2381 = vrot.lane.b32.xlu0 %v2338_v29, %s6526_s15  ;;  %v2567_v6 = vor.u32 %v2565_v40, %v8047_v49  ;;  %v1844_v5 = vsel %vm1015_vm4, %v7939_v51, %v1843_v36  ;;  %10004 = vst [vmem:[#allocation23_spill] sm:$0xff] %v8062_v11  ;;  %v2339_v60 = vshrl.u32 %v2220_v31, 16  ;;  %v1136_v4 = vshll.u32 %v8021_v15, 16  ;;  %v2596_v29 = vpop.permute.xlu0 %2595  ;;  %v2103_v40 = vpop.permute.xlu1 %2102  ;;  %v1455_v23 = vld [vmem:[#allocation2 + $0x88] sm:$0x1] }
  0xe5   : > { %1887 = vrot.lane.b32.xlu1 %v1844_v5, %s6528_s21  ;;  %v2074_v27 = vor.u32 %v2072_v12, %v8055_v3  ;;  %v1845_v52 = vshrl.u32 %v1726_v0, 16  ;;  %v1229_v39 = vsel %vm1177_vm12, %v7951_v43, %v1228_v41  ;;  %3254 = vmatprep.mubr.bf16.mxu0 %v2956_v24  ;;  %v1693_v31 = vor.u32 %v1691_v57, %v8062_v11 }
  0xe6   : > { %v2568_v51 = vsel %vm1177_vm12, %v7915_v30, %v2567_v6  ;;  %v2341_v1 = vor.u32 %v2339_v60, %v2337_v46  ;;  %1331 = vst.msk [vmem:[#allocation3 + $0x78] sm:$0xff] %vm336_vm0, %v1229_v39  ;;  %vm9926_vm10 = vcmp.ne.s16.totalorder %v8062_v11, 0  ;;  %3255 = vmatmul.mubr.bf16.gmra.mrb[16].mxu0 %v2955_v61  ;;  %v1138_v41 = vrot.slane %v1136_v4, 1 }
  0xe7   : > { %2638 = vst.msk [vmem:[#allocation3 + $0x80] sm:$0xff] %vm1909_vm3, %v2596_v29  ;;  %v2075_v43 = vsel %vm1177_vm12, %v7918_v42, %v2074_v27  ;;  %v1847_v0 = vor.u32 %v1845_v52, %v1843_v36  ;;  %v2222_v30 = vsel %vm9926_vm10, %v2205_v62, 0  ;;  %v8083_v57 = vsel %vm1177_vm12, %v7977_v56, %v1693_v31 }
  0xe8   : > { %1428 = vst.msk [vmem:[#allocation3 + $0x78] sm:$0xff] %vm1422_vm11, %v1385_v53  ;;  %2611 = vrot.lane.b32.xlu0 %v2568_v51, %s6528_s21  ;;  %10005 = vst [vmem:[#allocation24_spill] sm:$0xff] %v8083_v57  ;;  %v2351_v46 = vshll.u32 %v2222_v30, 16  ;;  %v1140_v12 = vshrl.u32 %v8021_v15, 16  ;;  %v1728_v42 = vsel %vm9926_vm10, %v1455_v23, 0  ;;  %vm9923_vm5 = vcmp.ne.s16.totalorder %v8083_v57, 0  ;;  %v2692_v56 = vpop.permute.xlu0 %2691  ;;  %v1387_v60 = vpop.permute.xlu1 %1386 }
  0xe9   : > { %1915 = vst.msk [vmem:[#allocation3 + $0x78] sm:$0xff] %vm1909_vm3, %v1872_v55  ;;  %2118 = vrot.lane.b32.xlu1 %v2075_v43, %s6527_s16  ;;  %v8091_v53 = vld [vmem:[#allocation2 + $0x90] sm:$0xff]  ;;  %v8095_v36 = vsel %vm1015_vm4, %v8023_v22, %v1138_v41  ;;  %v1857_v55 = vshll.u32 %v1728_v42, 16  ;;  %v10007_v15 = vshll.u32 %v7966_v63, 16  ;;  %v2221_v6 = vsel %vm9923_vm5, %v7922_v44, 0 }
  0xea   : > { %10006 = vst [vmem:[#allocation25_spill] sm:$0xff] %v8095_v36  ;;  %2146 = vst.msk [vmem:[#allocation3 + $0x78] sm:$0xff] %vm2140_vm8, %v2103_v40  ;;  %v8107_v5 = vsel %vm9923_vm5, %v8091_v53, 0  ;;  %vm1158_vm1 = vcmp.ne.s16.totalorder %v8095_v36, 0  ;;  %v1727_v22 = vsel %vm9923_vm5, %v7864_v8, 0  ;;  %v2343_v63 = vshll.u32 %v2221_v6, 16 }
  0xeb   : > { %v1236_v61 = vor.u32 %v10007_v15, %v7996_v45  ;;  %2734 = vst.msk [vmem:[#allocation3 + $0x80] sm:$0xff] %vm2140_vm8, %v2692_v56  ;;  %v2899_v24 = vshll.u32 %v8107_v5, 16  ;;  %v2451_v62 = vsel %vm1158_vm1, %v7922_v44, 0  ;;  %v1849_v27 = vshll.u32 %v1727_v22, 16  ;;  %v2984_v4 = vld [vmem:[#allocation3 + $0x148] sm:$0xff] }
  0xec   : > { %2707 = vrot.lane.b32.xlu0 %v7864_v8, %s6527_s16  ;;  %v2570_v52 = vshrl.u32 %v2451_v62, 16  ;;  %v2573_v39 = vshll.u32 %v2451_v62, 16  ;;  %v1958_v29 = vsel %vm1158_vm1, %v7864_v8, 0  ;;  %v2347_v40 = vshrl.u32 %v2221_v6, 16  ;;  %6411 = vmatmul.mubr.msk.bf16.gmra.mrb[24].mxu1 %vm336_vm0, %v2984_v4 }
  0xed   : > { %v2345_v23 = vrot.slane %v2343_v63, 1  ;;  %v8124_v51 = vrot.slane %v2899_v24, 1  ;;  %1402 = vrot.lane.b32.xlu1 %v7791_v58, %s6526_s15  ;;  %v1851_v31 = vrot.slane %v1849_v27, 1  ;;  %v2077_v43 = vshrl.u32 %v1958_v29, 16  ;;  %v2368_v4 = vpop.permute.xlu0 %2367 }
  0xee   : > { %v8128_v30 = vrot.slane %v2570_v52, 7  ;;  %v2080_v42 = vshll.u32 %v1958_v29, 16  ;;  %v2353_v56 = vrot.slane %v2351_v46, 1  ;;  %v8130_v15 = vor.u32 %v1140_v12, %v1138_v41  ;;  %2409 = vst.msk [vmem:[#allocation3 + $0x98] sm:$0xff] %vm1422_vm11, %v2368_v4 }
  0xef   : > { %10008 = vst [vmem:[#allocation26_spill] sm:$0xff] %v8124_v51  ;;  %v2346_v62 = vsel %vm1015_vm4, %v2341_v1, %v2345_v23  ;;  %v2902_v6 = vsel %vm1015_vm4, %v8053_v2, %v8124_v51  ;;  %v1852_v63 = vsel %vm1015_vm4, %v1847_v0, %v1851_v31  ;;  %v8137_v24 = vrot.slane %v2077_v43, 7  ;;  %v1874_v1 = vpop.permute.xlu1 %1873 }
  0xf0   : > { %10009 = vst [vmem:[#allocation27_spill] sm:$0xff] %v8130_v15  ;;  %2941 = vst.msk [vmem:[#allocation3 + $0x160] sm:$0xff] %vm336_vm0, %v2902_v6  ;;  %2383 = vrot.lane.b32.xlu0 %v2346_v62, %s6526_s15  ;;  %v2575_v58 = vor.u32 %v2573_v39, %v8128_v30  ;;  %v2349_v46 = vor.u32 %v2347_v40, %v2345_v23  ;;  %vm9927_vm5 = vcmp.ne.s16.totalorder %v8130_v15, 0  ;;  %v1853_v41 = vshrl.u32 %v1727_v22, 16 }
  0xf1   : > { %v2958_v12 = vld [vmem:[#allocation3 + $0x78] sm:$0xff]  ;;  %1889 = vrot.lane.b32.xlu1 %v1852_v63, %s6528_s21  ;;  %v2082_v2 = vor.u32 %v2080_v42, %v8137_v24  ;;  %v2452_v0 = vsel %vm9927_vm5, %v8091_v53, 0  ;;  %v1859_v27 = vrot.slane %v1857_v55, 1  ;;  %v1237_v52 = vsel %vm1177_vm12, %v7994_v33, %v1236_v61  ;;  %v2598_v55 = vpop.permute.xlu0 %2597 }
  0xf2   : > { %v2959_v39 = vld [vmem:[#allocation3 + $0x80] sm:$0xff]  ;;  %v2576_v22 = vsel %vm1177_vm12, %v8047_v49, %v2575_v58  ;;  %v2354_v29 = vsel %vm1015_vm4, %v2349_v46, %v2353_v56  ;;  %v2578_v40 = vshrl.u32 %v2452_v0, 16  ;;  %v2581_v23 = vshll.u32 %v2452_v0, 16  ;;  %1332 = vst.msk [vmem:[#allocation3 + $0x90] sm:$0xff] %vm336_vm0, %v1237_v52 }
  0xf3   : > { %3262 = vmatprep.mubr.bf16.mxu0 %v2959_v39  ;;  %v2083_v43 = vsel %vm1177_vm12, %v8055_v3, %v2082_v2  ;;  %v1855_v42 = vor.u32 %v1853_v41, %v1851_v31  ;;  %1429 = vst.msk [vmem:[#allocation3 + $0x90] sm:$0xff] %vm1422_vm11, %v1387_v60  ;;  %v1959_v33 = vsel %vm9927_vm5, %v7922_v44, 0  ;;  %v10010_v49 = vshrl.u32 %v7971_v7, 16  ;;  %v2105_v3 = vpop.permute.xlu1 %2104 }
  0xf4   : > { %3263 = vmatmul.mubr.bf16.gmra.mrb[20].mxu0 %v2958_v12  ;;  %2613 = vrot.lane.b32.xlu0 %v2576_v22, %s6528_s21  ;;  %v2580_v56 = vrot.slane %v2578_v40, 7  ;;  %v2085_v62 = vshrl.u32 %v1959_v33, 16  ;;  %v2088_v6 = vshll.u32 %v1959_v33, 16  ;;  %2639 = vst.msk [vmem:[#allocation3 + $0x98] sm:$0xff] %vm1909_vm3, %v2598_v55  ;;  %1916 = vst.msk [vmem:[#allocation3 + $0x90] sm:$0xff] %vm1909_vm3, %v1874_v1  ;;  %v1169_v60 = vsel %vm10011_vm7, %v7402_v13, 0 }
  0xf5   : > { %v1241_v61 = vrot.slane %v10010_v49, 7  ;;  %2120 = vrot.lane.b32.xlu1 %v2083_v43, %s6527_s16  ;;  %v1860_v31 = vsel %vm1015_vm4, %v1855_v42, %v1859_v27  ;;  %2147 = vst.msk [vmem:[#allocation3 + $0x90] sm:$0xff] %vm2140_vm8, %v2105_v3  ;;  %v10012_v63 = vshll.u32 %v7971_v7, 16  ;;  %v1247_v58 = vshrl.u32 %v1169_v60, 16  ;;  %v2694_v2 = vpop.permute.xlu0 %2693 }
  0xf6   : > { %v1250_v46 = vshll.u32 %v1169_v60, 16  ;;  %v2583_v41 = vor.u32 %v2581_v23, %v2580_v56  ;;  %v2087_v12 = vrot.slane %v2085_v62, 7  ;;  %v1170_v1 = vsel %vm10013_vm13, %v7412_v21, 0  ;;  %2735 = vst.msk [vmem:[#allocation3 + $0x98] sm:$0xff] %vm2140_vm8, %v2694_v2 }
  0xf7   : > { %v1244_v4 = vor.u32 %v10012_v63, %v1241_v61  ;;  %v1171_v13 = vsel %vm1154_vm9, %v7491_v9, 0  ;;  %v1249_v27 = vrot.slane %v1247_v58, 7  ;;  %v1255_v52 = vshrl.u32 %v1170_v1, 16  ;;  %v2987_v39 = vld [vmem:[#allocation3 + $0x160] sm:$0xff]  ;;  %v1389_v21 = vpop.permute.xlu1 %1388  ;;  %v2761_v63 = vld [vmem:[#allocation2 + $0x98] sm:$0x1] }
  0xf8   : > { %v1258_v7 = vshll.u32 %v1170_v1, 16  ;;  %2709 = vrot.lane.b32.xlu0 %v7922_v44, %s6527_s16  ;;  %v2584_v22 = vsel %vm1177_vm12, %v8128_v30, %v2583_v41  ;;  %v2090_v40 = vor.u32 %v2088_v6, %v2087_v12  ;;  %v1263_v9 = vshrl.u32 %v1171_v13, 16  ;;  %6414 = vmatprep.mubr.msk.bf16.mxu1 %vm336_vm0, %v2987_v39 }
  0xf9   : > { %v1245_v0 = vsel %vm1177_vm12, %v7996_v45, %v1244_v4  ;;  %v1266_v23 = vshll.u32 %v1171_v13, 16  ;;  %1404 = vrot.lane.b32.xlu1 %v7864_v8, %s6526_s15  ;;  %v1252_v45 = vor.u32 %v1250_v46, %v1249_v27  ;;  %v1257_v44 = vrot.slane %v1255_v52, 7  ;;  %v2370_v56 = vpop.permute.xlu0 %2369 }
  0xfa   : > { %1333 = vst.msk [vmem:[#allocation3 + $0xa8] sm:$0xff] %vm336_vm0, %v1245_v0  ;;  %v1172_v30 = vsel %vm1155_vm2, %v7608_v35, 0  ;;  %v1173_v43 = vsel %vm1156_vm6, %v7724_v32, 0  ;;  %v2091_v42 = vsel %vm1177_vm12, %v8137_v24, %v2090_v40  ;;  %v1265_v33 = vrot.slane %v1263_v9, 7 }
  0xfb   : > { %1430 = vst.msk [vmem:[#allocation3 + $0xa8] sm:$0xff] %vm1422_vm11, %v1389_v21  ;;  %v1271_v55 = vshrl.u32 %v1172_v30, 16  ;;  %v1274_v49 = vshll.u32 %v1172_v30, 16  ;;  %v1253_v8 = vsel %vm1177_vm12, %v1241_v61, %v1252_v45  ;;  %v1260_v62 = vor.u32 %v1258_v7, %v1257_v44  ;;  %2410 = vst.msk [vmem:[#allocation3 + $0xb0] sm:$0xff] %vm1422_vm11, %v2370_v56  ;;  %v1876_v35 = vpop.permute.xlu1 %1875  ;;  %v4934_v7 = vld [vmem:[#allocation2 + $0x98] sm:$0x1] }
  0xfc   : > { %v1279_v6 = vshrl.u32 %v1173_v43, 16  ;;  %v1282_v3 = vshll.u32 %v1173_v43, 16  ;;  %2385 = vrot.lane.b32.xlu0 %v2354_v29, %s6526_s15  ;;  %1334 = vst.msk [vmem:[#allocation3 + $0xc0] sm:$0xff] %vm336_vm0, %v1253_v8  ;;  %v1268_v32 = vor.u32 %v1266_v23, %v1265_v33  ;;  %v1174_v24 = vsel %vm1157_vm14, %v7818_v20, 0  ;;  %v2961_v41 = vld [vmem:[#allocation3 + $0x90] sm:$0xff] }
  0xfd   : > { %v1273_v60 = vrot.slane %v1271_v55, 7  ;;  %v1175_v61 = vsel %vm1158_vm1, %v7899_v17, 0  ;;  %1891 = vrot.lane.b32.xlu1 %v1860_v31, %s6528_s21  ;;  %1917 = vst.msk [vmem:[#allocation3 + $0xa8] sm:$0xff] %vm1909_vm3, %v1876_v35  ;;  %v1261_v29 = vsel %vm1177_vm12, %v1249_v27, %v1260_v62  ;;  %v1287_v58 = vshrl.u32 %v1174_v24, 16  ;;  %v2600_v2 = vpop.permute.xlu0 %2599  ;;  %v2962_v17 = vld [vmem:[#allocation3 + $0x98] sm:$0xff] }
  0xfe   : > { %v1281_v4 = vrot.slane %v1279_v6, 7  ;;  %v1290_v46 = vshll.u32 %v1174_v24, 16  ;;  %1335 = vst.msk [vmem:[#allocation3 + $0xd8] sm:$0xff] %vm336_vm0, %v1261_v29  ;;  %v1269_v12 = vsel %vm1177_vm12, %v1257_v44, %v1268_v32  ;;  %v1295_v1 = vshrl.u32 %v1175_v61, 16  ;;  %3270 = vmatprep.mubr.bf16.mxu0 %v2962_v17 }
  0xff   : > { %v1276_v20 = vor.u32 %v1274_v49, %v1273_v60  ;;  %v1298_v13 = vshll.u32 %v1175_v61, 16  ;;  %1336 = vst.msk [vmem:[#allocation3 + $0xf0] sm:$0xff] %vm336_vm0, %v1269_v12  ;;  %v1289_v0 = vrot.slane %v1287_v58, 7  ;;  %v1176_v27 = vsel %vm9927_vm5, %v8039_v28, 0  ;;  %v2107_v39 = vpop.permute.xlu1 %2106  ;;  %3271 = vmatmul.mubr.bf16.gmra.mrb[24].mxu0 %v2961_v41 }
 0x100   : > { %v1284_v31 = vor.u32 %v1282_v3, %v1281_v4  ;;  %v2778_v52 = vsel %vm9926_vm10, %v2761_v63, 0  ;;  %2615 = vrot.lane.b32.xlu0 %v2584_v22, %s6528_s21  ;;  %2640 = vst.msk [vmem:[#allocation3 + $0xb0] sm:$0xff] %vm1909_vm3, %v2600_v2  ;;  %v1297_v21 = vrot.slane %v1295_v1, 7  ;;  %v1303_v9 = vshrl.u32 %v1176_v27, 16  ;;  %v8256_v2 = vld [vmem:[#allocation2 + $0x8] sm:$0xff] }
 0x101   : > { %v1277_v40 = vsel %vm1177_vm12, %v1265_v33, %v1276_v20  ;;  %v1306_v23 = vshll.u32 %v1176_v27, 16  ;;  %2122 = vrot.lane.b32.xlu1 %v2091_v42, %s6527_s16  ;;  %2148 = vst.msk [vmem:[#allocation3 + $0xa8] sm:$0xff] %vm2140_vm8, %v2107_v39  ;;  %v1292_v45 = vor.u32 %v1290_v46, %v1289_v0  ;;  %v2903_v22 = vshrl.u32 %v8107_v5, 16  ;;  %v2696_v55 = vpop.permute.xlu0 %2695 }
 0x102   : > { %1337 = vst.msk [vmem:[#allocation3 + $0x108] sm:$0xff] %vm336_vm0, %v1277_v40  ;;  %v1285_v28 = vsel %vm1177_vm12, %v1273_v60, %v1284_v31  ;;  %v2907_v44 = vshll.u32 %v2778_v52, 16  ;;  %v1300_v30 = vor.u32 %v1298_v13, %v1297_v21  ;;  %v1305_v43 = vrot.slane %v1303_v9, 7 }
 0x103   : > { %1338 = vst.msk [vmem:[#allocation3 + $0x120] sm:$0xff] %vm336_vm0, %v1285_v28  ;;  %v4951_v33 = vsel %vm9926_vm10, %v4934_v7, 0  ;;  %v1293_v42 = vsel %vm1177_vm12, %v1281_v4, %v1292_v45  ;;  %v2905_v49 = vor.u32 %v2903_v22, %v8124_v51  ;;  %v1391_v5 = vpop.permute.xlu1 %1390  ;;  %vm10014_vm13 = vcmp.ne.s16.totalorder %v6730_v16, 0 }
 0x104   : > { %v2909_v56 = vrot.slane %v2907_v44, 1  ;;  %v5080_v8 = vshll.u32 %v4951_v33, 16  ;;  %2711 = vrot.lane.b32.xlu0 %v8091_v53, %s6527_s16  ;;  %2736 = vst.msk [vmem:[#allocation3 + $0xb0] sm:$0xff] %vm2140_vm8, %v2696_v55  ;;  %v1301_v62 = vsel %vm1177_vm12, %v1289_v0, %v1300_v30  ;;  %v1308_v6 = vor.u32 %v1306_v23, %v1305_v43 }
 0x105   : > { %1339 = vst.msk [vmem:[#allocation3 + $0x138] sm:$0xff] %vm336_vm0, %v1293_v42  ;;  %1340 = vst.msk [vmem:[#allocation3 + $0x150] sm:$0xff] %vm336_vm0, %v1301_v62  ;;  %v2372_v32 = vpop.permute.xlu0 %2371  ;;  %3806 = vrot.lane.b32.xlu1 %v8256_v2, %s6526_s15  ;;  %vm10015_vm7 = vcmp.ne.s16.totalorder %v6700_v54, 0 }
 0x106   : > { %1431 = vst.msk [vmem:[#allocation3 + $0xc0] sm:$0xff] %vm1422_vm11, %v1391_v5  ;;  %v2910_v3 = vsel %vm1015_vm4, %v2905_v49, %v2909_v56  ;;  %v1309_v35 = vsel %vm1177_vm12, %v1297_v21, %v1308_v6  ;;  %v5082_v53 = vrot.slane %v5080_v8, 1  ;;  %2411 = vst.msk [vmem:[#allocation3 + $0xc8] sm:$0xff] %vm1422_vm11, %v2372_v32 }
 0x107   : > { %2942 = vst.msk [vmem:[#allocation3 + $0x178] sm:$0xff] %vm336_vm0, %v2910_v3  ;;  %1341 = vst.msk [vmem:[#allocation3 + $0x168] sm:$0xff] %vm336_vm0, %v1309_v35  ;;  %v1878_v60 = vpop.permute.xlu1 %1877 }
 0x108   : > { %1918 = vst.msk [vmem:[#allocation3 + $0xc0] sm:$0xff] %vm1909_vm3, %v1878_v60  ;;  %v2964_v24 = vld [vmem:[#allocation3 + $0xa8] sm:$0xff]  ;;  %v5083_v63 = vsel %vm1015_vm4, %v2905_v49, %v5082_v53 }
 0x10b   : > { %v2965_v61 = vld [vmem:[#allocation3 + $0xb0] sm:$0xff] }
 0x10c   : > { %3278 = vmatprep.mubr.bf16.mxu0 %v2965_v61  ;;  %v2602_v29 = vpop.permute.xlu0 %2601  ;;  %v2109_v4 = vpop.permute.xlu1 %2108 }
 0x10d   : > { %3279 = vmatmul.mubr.bf16.gmra.mrb[28].mxu0 %v2964_v24  ;;  %2641 = vst.msk [vmem:[#allocation3 + $0xc8] sm:$0xff] %vm1909_vm3, %v2602_v29 }
 0x10e   : > { %v2990_v58 = vld [vmem:[#allocation3 + $0x178] sm:$0xff]  ;;  %2149 = vst.msk [vmem:[#allocation3 + $0xc0] sm:$0xff] %vm2140_vm8, %v2109_v4 }
 0x10f   : > { %6415 = vmatmul.mubr.msk.bf16.gmra.mrb[28].mxu1 %vm336_vm0, %v2990_v58  ;;  %5115 = vst.msk [vmem:[#allocation3 + $0x178] sm:$0xff] %vm336_vm0, %v5083_v63 }
 0x110   : > { %v2698_v46 = vpop.permute.xlu0 %2697  ;;  %v1393_v41 = vpop.permute.xlu1 %1392 }
 0x111   : > { %2737 = vst.msk [vmem:[#allocation3 + $0xc8] sm:$0xff] %vm2140_vm8, %v2698_v46 }
 0x112   : > { %1432 = vst.msk [vmem:[#allocation3 + $0xd8] sm:$0xff] %vm1422_vm11, %v1393_v41 }
 0x114   : > { %v2374_v12 = vpop.permute.xlu0 %2373 }
 0x115   : > { %2412 = vst.msk [vmem:[#allocation3 + $0xe0] sm:$0xff] %vm1422_vm11, %v2374_v12  ;;  %v1880_v20 = vpop.permute.xlu1 %1879  ;;  %v2967_v1 = vld [vmem:[#allocation3 + $0xc0] sm:$0xff] }
 0x116   : > { %1919 = vst.msk [vmem:[#allocation3 + $0xd8] sm:$0xff] %vm1909_vm3, %v1880_v20 }
 0x118   : > { %v2968_v13 = vld [vmem:[#allocation3 + $0xc8] sm:$0xff] }
 0x119   : > { %3286 = vmatprep.mubr.bf16.mxu0 %v2968_v13  ;;  %v8309_v13 = vld [vmem:[%s9860_s3 + $0x80] sm:$0xff]  }
 0x11a   : > { %3287 = vmatmul.mubr.bf16.gmra.mrb[32].mxu0 %v2967_v1  ;;  %6418 = vmatprep.subr.bf16.mxu0 %v8309_v13 }
 0x11b   : > { %6419 = vmatpush3.bf16.msra.mxu0 %v8309_v13 }
 0x11c   : > { %v8264_v52 = vpop.f32.mrb[0].mxu1 }
 0x11d   : > { %v8266_v7 = vpop.f32.mrb[1].mxu1 }
 0x11e   : > { %v8268_v39 = vpop.f32.mrb[2].mxu1 }
 0x11f   : > { %v8270_v40 = vpop.f32.mrb[3].mxu1 }
 0x120   : > { %v2604_v17 = vpop.permute.xlu0 %2603  ;;  %v2111_v31 = vpop.permute.xlu1 %2110 }
 0x121   : > { %2642 = vst.msk [vmem:[#allocation3 + $0xe0] sm:$0xff] %vm1909_vm3, %v2604_v17  ;;  %v6492_v17 = vld [vmem:[%s9860_s3 + $0x88] sm:$0xff]  }
 0x122   : > { %2150 = vst.msk [vmem:[#allocation3 + $0xd8] sm:$0xff] %vm2140_vm8, %v2111_v31  ;;  %6420 = vmatprep.subr.bf16.mxu0 %v6492_v17 }
 0x123   : > { %6421 = vmatpush3.bf16.msra.mxu0 %v6492_v17 }
 0x124   : > { %v2700_v0 = vpop.permute.xlu0 %2699 }
 0x125   : > { %v1395_v27 = vpop.permute.xlu1 %1394  ;;  %2738 = vst.msk [vmem:[#allocation3 + $0xe0] sm:$0xff] %vm2140_vm8, %v2700_v0 }
 0x126   : > { %1433 = vst.msk [vmem:[#allocation3 + $0xf0] sm:$0xff] %vm1422_vm11, %v1395_v27 }
 0x129   : > { %v2970_v9 = vld [vmem:[#allocation3 + $0xd8] sm:$0xff] }
 0x12a   : > { %v2376_v21 = vpop.permute.xlu0 %2375  ;;  %v1882_v23 = vpop.permute.xlu1 %1881 }
 0x12b   : > { %2413 = vst.msk [vmem:[#allocation3 + $0xf8] sm:$0xff] %vm1422_vm11, %v2376_v21 }
 0x12c   : > { %v2971_v28 = vld [vmem:[#allocation3 + $0xe0] sm:$0xff]  ;;  %1920 = vst.msk [vmem:[#allocation3 + $0xf0] sm:$0xff] %vm1909_vm3, %v1882_v23 }
 0x12d   : > { %3294 = vmatprep.mubr.bf16.mxu0 %v2971_v28 }
 0x12e   : > { %3295 = vmatmul.mubr.bf16.gmra.mrb[36].mxu0 %v2970_v9  ;;  %v2606_v45 = vpop.permute.xlu0 %2605 }
 0x12f   : > { %2643 = vst.msk [vmem:[#allocation3 + $0xf8] sm:$0xff] %vm1909_vm3, %v2606_v45  ;;  %v2113_v22 = vpop.permute.xlu1 %2112 }
 0x130   : > { %2151 = vst.msk [vmem:[#allocation3 + $0xf0] sm:$0xff] %vm2140_vm8, %v2113_v22 }
 0x132   : > { %v2702_v44 = vpop.permute.xlu0 %2701 }
 0x133   : > { %2739 = vst.msk [vmem:[#allocation3 + $0xf8] sm:$0xff] %vm2140_vm8, %v2702_v44  ;;  %v1397_v30 = vpop.permute.xlu1 %1396  ;;  %v8281_v8 = vpop.f32.mrb[4].mxu1 }
 0x134   : > { %1434 = vst.msk [vmem:[#allocation3 + $0x108] sm:$0xff] %vm1422_vm11, %v1397_v30  ;;  %v8284_v5 = vpop.f32.mrb[5].mxu1 }
 0x135   : > { %v8286_v62 = vpop.f32.mrb[6].mxu1 }
 0x136   : > { %v2378_v43 = vpop.permute.xlu0 %2377  ;;  %v8288_v3 = vpop.f32.mrb[7].mxu1 }
 0x137   : > { %2414 = vst.msk [vmem:[#allocation3 + $0x110] sm:$0xff] %vm1422_vm11, %v2378_v43  ;;  %v1884_v33 = vpop.permute.xlu1 %1883  ;;  %v2973_v55 = vld [vmem:[#allocation3 + $0xf0] sm:$0xff] }
 0x138   : > { %1921 = vst.msk [vmem:[#allocation3 + $0x108] sm:$0xff] %vm1909_vm3, %v1884_v33 }
 0x13a   : > { %v2608_v42 = vpop.permute.xlu0 %2607  ;;  %v2974_v49 = vld [vmem:[#allocation3 + $0xf8] sm:$0xff] }
 0x13b   : > { %2644 = vst.msk [vmem:[#allocation3 + $0x110] sm:$0xff] %vm1909_vm3, %v2608_v42  ;;  %3302 = vmatprep.mubr.bf16.mxu0 %v2974_v49  ;;  %v2115_v56 = vpop.permute.xlu1 %2114 }
 0x13c   : > { %3303 = vmatmul.mubr.bf16.gmra.mrb[40].mxu0 %v2973_v55  ;;  %2152 = vst.msk [vmem:[#allocation3 + $0x108] sm:$0xff] %vm2140_vm8, %v2115_v56 }
 0x13e   : > { %v2704_v6 = vpop.permute.xlu0 %2703 }
 0x13f   : > { %2740 = vst.msk [vmem:[#allocation3 + $0x110] sm:$0xff] %vm2140_vm8, %v2704_v6  ;;  %v1399_v35 = vpop.permute.xlu1 %1398 }
 0x140   : > { %1435 = vst.msk [vmem:[#allocation3 + $0x120] sm:$0xff] %vm1422_vm11, %v1399_v35 }
 0x142   : > { %v2380_v32 = vpop.permute.xlu0 %2379 }
 0x143   : > { %2415 = vst.msk [vmem:[#allocation3 + $0x128] sm:$0xff] %vm1422_vm11, %v2380_v32  ;;  %v1886_v53 = vpop.permute.xlu1 %1885  ;;  %v2976_v60 = vld [vmem:[#allocation3 + $0x108] sm:$0xff] }
 0x144   : > { %1922 = vst.msk [vmem:[#allocation3 + $0x120] sm:$0xff] %vm1909_vm3, %v1886_v53 }
 0x146   : > { %v2610_v24 = vpop.permute.xlu0 %2609  ;;  %v2977_v61 = vld [vmem:[#allocation3 + $0x110] sm:$0xff] }
 0x147   : > { %2645 = vst.msk [vmem:[#allocation3 + $0x128] sm:$0xff] %vm1909_vm3, %v2610_v24  ;;  %3310 = vmatprep.mubr.bf16.mxu0 %v2977_v61  ;;  %v2117_v63 = vpop.permute.xlu1 %2116 }
 0x148   : > { %3311 = vmatmul.mubr.bf16.gmra.mrb[44].mxu0 %v2976_v60  ;;  %2153 = vst.msk [vmem:[#allocation3 + $0x120] sm:$0xff] %vm2140_vm8, %v2117_v63 }
 0x14a   : > { %v2706_v29 = vpop.permute.xlu0 %2705 }
 0x14b   : > { %2741 = vst.msk [vmem:[#allocation3 + $0x128] sm:$0xff] %vm2140_vm8, %v2706_v29  ;;  %v1401_v4 = vpop.permute.xlu1 %1400  ;;  %v8298_v58 = vpop.f32.mrb[8].mxu1 }
 0x14c   : > { %1436 = vst.msk [vmem:[#allocation3 + $0x138] sm:$0xff] %vm1422_vm11, %v1401_v4  ;;  %v8300_v41 = vpop.f32.mrb[9].mxu1 }
 0x14d   : > { %v8302_v20 = vpop.f32.mrb[10].mxu1 }
 0x14e   : > { %v8304_v1 = vpop.f32.mrb[11].mxu1 }
 0x14f   : > { %v2979_v46 = vld [vmem:[#allocation3 + $0x120] sm:$0xff] }
 0x152   : > { %v2980_v12 = vld [vmem:[#allocation3 + $0x128] sm:$0xff] }
 0x153   : > { %3318 = vmatprep.mubr.bf16.mxu0 %v2980_v12 }
 0x154   : > { %3319 = vmatmul.mubr.bf16.gmra.mrb[48].mxu0 %v2979_v46 }
 0x156   : > { %v2382_v31 = vpop.permute.xlu0 %2381 }
 0x157   : > { %2416 = vst.msk [vmem:[#allocation3 + $0x140] sm:$0xff] %vm1422_vm11, %v2382_v31  ;;  %v1888_v0 = vpop.permute.xlu1 %1887 }
 0x158   : > { %1923 = vst.msk [vmem:[#allocation3 + $0x138] sm:$0xff] %vm1909_vm3, %v1888_v0 }
 0x15a   : > { %v2612_v27 = vpop.permute.xlu0 %2611 }
 0x15b   : > { %2646 = vst.msk [vmem:[#allocation3 + $0x140] sm:$0xff] %vm1909_vm3, %v2612_v27  ;;  %v2119_v21 = vpop.permute.xlu1 %2118 }
 0x15c   : > { %2154 = vst.msk [vmem:[#allocation3 + $0x138] sm:$0xff] %vm2140_vm8, %v2119_v21  ;;  %v8352_v21 = vld [vmem:[%s9859_s2] ss:$0 sm:$0xff] }
 0x15e   : > { %v2708_v9 = vpop.permute.xlu0 %2707 }
 0x15f   : > { %2742 = vst.msk [vmem:[#allocation3 + $0x140] sm:$0xff] %vm2140_vm8, %v2708_v9  ;;  %v1403_v23 = vpop.permute.xlu1 %1402 }
 0x160   : > { %1437 = vst.msk [vmem:[#allocation3 + $0x150] sm:$0xff] %vm1422_vm11, %v1403_v23 }
 0x162   : > { %v2384_v28 = vpop.permute.xlu0 %2383  ;;  %v8324_v22 = vpop.f32.mrb[12].mxu1 }
 0x163   : > { %2417 = vst.msk [vmem:[#allocation3 + $0x158] sm:$0xff] %vm1422_vm11, %v2384_v28  ;;  %v1890_v45 = vpop.permute.xlu1 %1889  ;;  %v2982_v44 = vld [vmem:[#allocation3 + $0x138] sm:$0xff]  ;;  %v8326_v30 = vpop.f32.mrb[13].mxu1 }
 0x164   : > { %1924 = vst.msk [vmem:[#allocation3 + $0x150] sm:$0xff] %vm1909_vm3, %v1890_v45  ;;  %v8328_v55 = vpop.f32.mrb[14].mxu1 }
 0x165   : > { %v8331_v49 = vpop.f32.mrb[15].mxu1 }
 0x166   : > { %v2614_v43 = vpop.permute.xlu0 %2613  ;;  %v2983_v33 = vld [vmem:[#allocation3 + $0x140] sm:$0xff] }
 0x167   : > { %2647 = vst.msk [vmem:[#allocation3 + $0x158] sm:$0xff] %vm1909_vm3, %v2614_v43  ;;  %3326 = vmatprep.mubr.bf16.mxu0 %v2983_v33  ;;  %v2121_v42 = vpop.permute.xlu1 %2120 }
 0x168   : > { %3327 = vmatmul.mubr.bf16.gmra.mrb[52].mxu0 %v2982_v44  ;;  %2155 = vst.msk [vmem:[#allocation3 + $0x150] sm:$0xff] %vm2140_vm8, %v2121_v42 }
 0x16a   : > { %v2710_v56 = vpop.permute.xlu0 %2709 }
 0x16b   : > { %2743 = vst.msk [vmem:[#allocation3 + $0x158] sm:$0xff] %vm2140_vm8, %v2710_v56  ;;  %v1405_v6 = vpop.permute.xlu1 %1404 }
 0x16c   : > { %1438 = vst.msk [vmem:[#allocation3 + $0x168] sm:$0xff] %vm1422_vm11, %v1405_v6 }
 0x16e   : > { %v2386_v35 = vpop.permute.xlu0 %2385 }
 0x16f   : > { %2418 = vst.msk [vmem:[#allocation3 + $0x170] sm:$0xff] %vm1422_vm11, %v2386_v35  ;;  %v1892_v32 = vpop.permute.xlu1 %1891  ;;  %v2985_v53 = vld [vmem:[#allocation3 + $0x150] sm:$0xff] }
 0x170   : > { %1925 = vst.msk [vmem:[#allocation3 + $0x168] sm:$0xff] %vm1909_vm3, %v1892_v32 }
 0x172   : > { %v2616_v60 = vpop.permute.xlu0 %2615  ;;  %v2986_v24 = vld [vmem:[#allocation3 + $0x158] sm:$0xff] }
 0x173   : > { %2648 = vst.msk [vmem:[#allocation3 + $0x170] sm:$0xff] %vm1909_vm3, %v2616_v60  ;;  %3334 = vmatprep.mubr.bf16.mxu0 %v2986_v24  ;;  %v2123_v61 = vpop.permute.xlu1 %2122 }
 0x174   : > { %3335 = vmatmul.mubr.bf16.gmra.mrb[56].mxu0 %v2985_v53  ;;  %2156 = vst.msk [vmem:[#allocation3 + $0x168] sm:$0xff] %vm2140_vm8, %v2123_v61  ;;  %v3887_v53 = vsel %vm10014_vm13, %v8256_v2, 0  ;;  %v3577_v2 = vld [vmem:[#allocation2 + $0x8] sm:$0xff]  ;;  %vm10016_vm13 = vcmp.ne.s16.totalorder %v6728_v14, 0 }
 0x175   : > { %vm10019_vm5 = vmmov %vm10016_vm13 }
 0x176   : > { %v2712_v63 = vpop.permute.xlu0 %2711 }
 0x177   : > { %2744 = vst.msk [vmem:[#allocation3 + $0x170] sm:$0xff] %vm2140_vm8, %v2712_v63 }
 0x17b   : > { %v2988_v29 = vld [vmem:[#allocation3 + $0x168] sm:$0xff] }
 0x17d   : > { %v8341_v46 = vpop.f32.mrb[16].mxu1 }
 0x17e   : > { %v2989_v4 = vld [vmem:[#allocation3 + $0x170] sm:$0xff]  ;;  %v8343_v12 = vpop.f32.mrb[17].mxu1 }
 0x17f   : > { %3342 = vmatprep.mubr.bf16.mxu0 %v2989_v4  ;;  %v8345_v17 = vpop.f32.mrb[18].mxu1  ;;  %v3907_v4 = vshll.u32 %v3887_v53, 16 }
 0x180   : > { %3343 = vmatmul.mubr.bf16.gmra.mrb[60].mxu0 %v2988_v29  ;;  %v8347_v31 = vpop.f32.mrb[19].mxu1 }
 0x185   : > { %v6138_v0 = vpop.f32.mrb[0].mxu0 }
 0x186   : > { %v6139_v27 = vpop.f32.mrb[1].mxu0 }
 0x187   : > { %v6140_v9 = vadd.f32 %v6139_v27, %v6138_v0  ;;  %v6141_v23 = vpop.f32.mrb[2].mxu0  ;;  %v4100_v27 = vld [vmem:[#allocation2 + $0x8] sm:$0x80] }
 0x188   : > { %v6142_v28 = vpop.f32.mrb[3].mxu0 }
 0x189   : > { %v6143_v45 = vadd.f32 %v6142_v28, %v6141_v23  ;;  %v3225_v44 = vadd.f32 %v6140_v9, %v8352_v21  ;;  %v3905_v23 = vshrl.u32 %v3887_v53, 16  ;;  %v3909_v28 = vrot.slane %v3907_v4, 1 }
 0x18b   : > { %v3386_v43 = vadd.f32 %v8266_v7, %v3225_v44  ;;  %v3228_v33 = vadd.f32 %v6143_v45, %v8352_v21 }
 0x18d   : > { %v3389_v42 = vadd.f32 %v8270_v40, %v3228_v33  ;;  %v3512_v56 = vmax.f32 %v3386_v43, 0.0  ;;  %v6144_v35 = vpop.f32.mrb[4].mxu0  ;;  %v4117_v43 = vsel %vm10015_vm7, %v4100_v27, 0  ;;  %vm10020_vm7 = vcmp.ne.s16.totalorder %v6730_v16, 0 }
 0x18e   : > { %v6145_v32 = vpop.f32.mrb[5].mxu0 }
 0x18f   : > { %v3513_v6 = vmax.f32 %v3389_v42, 0.0  ;;  %v6146_v24 = vadd.f32 %v6145_v32, %v6144_v35  ;;  %v6147_v61 = vpop.f32.mrb[6].mxu0  ;;  %v8370_v42 = vsel %vm10016_vm13, %v3577_v2, 0  ;;  %v3910_v35 = vor.u32 %v3909_v28, %v3905_v23 }
 0x190   : > { %v6148_v63 = vpop.f32.mrb[7].mxu0 }
 0x191   : > { %v3544_v60 = vpack.c.bf16 %v3513_v6, %v3512_v56  ;;  %v3233_v7 = vadd.f32 %v6146_v24, %v8352_v21  ;;  %v6149_v29 = vadd.f32 %v6148_v63, %v6147_v61  ;;  %v10017_v6 = vld [vmem:[#allocation5_spill] sm:$0xff] }
 0x192   : > { %vm10018_vm10 = vcmp.ne.s16.totalorder %v10017_v6, 0 }
 0x193   : > { %3560 = vst.msk [vmem:[#allocation2 + $0x10] sm:$0xff] %vm336_vm0, %v3544_v60  ;;  %v3394_v40 = vadd.f32 %v8264_v52, %v3233_v7  ;;  %v3236_v0 = vadd.f32 %v6149_v29, %v8352_v21  ;;  %v4135_v60 = vshrl.u32 %v4117_v43, 16  ;;  %v3615_v7 = vshrl.u32 %v8370_v42, 16  ;;  %v10021_v29 = vld [vmem:[#allocation7_spill] sm:$0xff] }
 0x194   : > { %vm10022_vm13 = vcmp.ne.s16.totalorder %v10021_v29, 0 }
 0x195   : > { %v3397_v9 = vadd.f32 %v8268_v39, %v3236_v0  ;;  %v3514_v45 = vmax.f32 %v3394_v40, 0.0 }
 0x197   : > { %v3515_v44 = vmax.f32 %v3397_v9, 0.0 }
 0x199   : > { %v3545_v52 = vpack.c.bf16 %v3515_v44, %v3514_v45 }
 0x19a   : > { %v3775_v33 = vld [vmem:[#allocation2 + $0x10] sm:$0xff] }
 0x19b   : > { %v3578_v56 = vld [vmem:[#allocation2 + $0x10] sm:$0xff]  ;;  %3808 = vrot.lane.b32.xlu1 %v3775_v33, %s6526_s15  ;;  %v3888_v39 = vsel %vm10018_vm10, %v3775_v33, 0  ;;  %v4118_v32 = vsel %vm10019_vm5, %v3775_v33, 0  ;;  %v4379_v61 = vsel %vm10020_vm7, %v3775_v33, 0  ;;  %3561 = vst.msk [vmem:[#allocation2 + $0x18] sm:$0xff] %vm336_vm0, %v3545_v52  ;;  %v6150_v63 = vpop.f32.mrb[8].mxu0 }
 0x19c   : > { %4346 = vst.msk [vmem:[#allocation3 + $0x8] sm:$0xff] %vm336_vm0, %v3578_v56  ;;  %v3912_v53 = vshll.u32 %v3888_v39, 16  ;;  %v4139_v24 = vshrl.u32 %v4118_v32, 16  ;;  %v3595_v4 = vsel %vm10022_vm13, %v3578_v56, 0  ;;  %v6151_v40 = vpop.f32.mrb[9].mxu0  ;;  %v4142_v9 = vshll.u32 %v4118_v32, 16 }
 0x19d   : > { %v4592_v23 = vld [vmem:[#allocation2 + $0x10] sm:$0x80]  ;;  %v6152_v28 = vadd.f32 %v6151_v40, %v6150_v63  ;;  %v6153_v2 = vpop.f32.mrb[10].mxu0  ;;  %v4399_v45 = vshll.u32 %v4379_v61, 16  ;;  %v4137_v33 = vrot.slane %v4135_v60, 7  ;;  %v3623_v51 = vshrl.u32 %v3595_v4, 16 }
 0x19e   : > { %v3914_v0 = vrot.slane %v3912_v53, 1  ;;  %v8384_v27 = vrot.slane %v4139_v24, 7  ;;  %v6154_v44 = vpop.f32.mrb[11].mxu0  ;;  %vm10023_vm10 = vcmp.ne.s16.totalorder %v6700_v54, 0  ;;  %v4397_v53 = vshrl.u32 %v4379_v61, 16 }
 0x19f   : > { %v6155_v11 = vadd.f32 %v6154_v44, %v6153_v2  ;;  %v3241_v15 = vadd.f32 %v6152_v28, %v8352_v21  ;;  %v4609_v56 = vsel %vm10023_vm10, %v4592_v23, 0  ;;  %v3617_v63 = vrot.slane %v3615_v7, 7 }
 0x1a0   : > { %v3915_v43 = vsel %vm1015_vm4, %v3910_v35, %v3914_v0  ;;  %v4144_v52 = vor.u32 %v4142_v9, %v8384_v27  ;;  %v8392_v32 = vpop.f32.mrb[20].mxu1  ;;  %v4401_v40 = vrot.slane %v4399_v45, 1  ;;  %v3916_v9 = vshrl.u32 %v3888_v39, 16  ;;  %v10026_v39 = vld [vmem:[#allocation6_spill] sm:$0xff] }
 0x1a1   : > { %4036 = vrot.lane.b32.xlu1 %v3915_v43, %s6528_s21  ;;  %v8394_v24 = vpop.f32.mrb[21].mxu1  ;;  %v3402_v35 = vadd.f32 %v8284_v5, %v3241_v15  ;;  %v3244_v60 = vadd.f32 %v6155_v11, %v8352_v21  ;;  %v4627_v43 = vshrl.u32 %v4609_v56, 16  ;;  %v8403_v23 = vrot.slane %v3623_v51, 7 }
 0x1a2   : > { %v8398_v2 = vpop.f32.mrb[22].mxu1  ;;  %v4822_v28 = vld [vmem:[#allocation2 + $0x18] sm:$0xff]  ;;  %v4145_v44 = vsel %vm1177_vm12, %v4137_v33, %v4144_v52  ;;  %v3626_v61 = vshll.u32 %v3595_v4, 16  ;;  %vm10024_vm5 = vcmp.ne.s16.totalorder %v10017_v6, 0  ;;  %vm10025_vm7 = vcmp.ne.s16.totalorder %v6728_v14, 0 }
 0x1a3   : > { %v8401_v57 = vpop.f32.mrb[23].mxu1  ;;  %v3579_v36 = vld [vmem:[#allocation2 + $0x18] sm:$0xff]  ;;  %v3516_v47 = vmax.f32 %v3402_v35, 0.0  ;;  %v3405_v7 = vadd.f32 %v8288_v3, %v3244_v60  ;;  %4854 = vrot.lane.b32.xlu0 %v4822_v28, %s6527_s16  ;;  %v8410_v11 = vsel %vm10024_vm5, %v4822_v28, 0  ;;  %v4610_v15 = vsel %vm10025_vm7, %v4822_v28, 0 }
 0x1a4   : > { %4347 = vst.msk [vmem:[#allocation3 + $0x20] sm:$0xff] %vm336_vm0, %v3579_v36  ;;  %v4404_v51 = vshll.u32 %v8410_v11, 16  ;;  %v4631_v5 = vshrl.u32 %v4610_v15, 16  ;;  %vm10027_vm13 = vcmp.ne.s16.totalorder %v10026_v39, 0  ;;  %v3918_v3 = vor.u32 %v3916_v9, %v3914_v0 }
 0x1a5   : > { %4266 = vrot.lane.b32.xlu1 %v4145_v44, %s6527_s16  ;;  %v8418_v4 = vsel %vm10027_vm13, %v4822_v28, 0  ;;  %v3517_v45 = vmax.f32 %v3405_v7, 0.0  ;;  %v4402_v33 = vor.u32 %v4401_v40, %v4397_v53  ;;  %vm10028_vm10 = vcmp.ne.s16.totalorder %v10021_v29, 0 }
 0x1a6   : > { %v3920_v52 = vshll.u32 %v8418_v4, 16  ;;  %v4119_v56 = vsel %vm10028_vm10, %v4822_v28, 0  ;;  %v4406_v35 = vrot.slane %v4404_v51, 1  ;;  %v8423_v14 = vrot.slane %v4631_v5, 7  ;;  %v3576_v5 = vld [vmem:[#allocation2] sm:$0x80] }
 0x1a7   : > { %v4634_v60 = vshll.u32 %v4610_v15, 16  ;;  %v4147_v44 = vshrl.u32 %v4119_v56, 16  ;;  %v3546_v26 = vpack.c.bf16 %v3517_v45, %v3516_v47  ;;  %vm10029_vm5 = vcmp.ne.s16.totalorder %v6730_v16, 0  ;;  %v6493_v16 = vld [vmem:[%s9860_s3 + $0x40] sm:$0xff]  }
 0x1a8   : > { %v8426_v25 = vrot.slane %v3920_v52, 1  ;;  %v4935_v0 = vsel %vm10029_vm5, %v4822_v28, 0  ;;  %v3628_v53 = vor.u32 %v3626_v61, %v8403_v23  ;;  %v4407_v40 = vsel %vm1015_vm4, %v4402_v33, %v4406_v35  ;;  %v6495_v33 = vld [vmem:[%s9860_s3 + $0x48] sm:$0xff]   ;;  %6252 = vmatprep.subr.bf16.mxu1 %v6493_v16 }
 0x1a9   : > { %3810 = vrot.lane.b32.xlu1 %v4822_v28, %s6526_s15  ;;  %v4636_v9 = vor.u32 %v4634_v60, %v8423_v14  ;;  %v8433_v7 = vrot.slane %v4147_v44, 7  ;;  %v4150_v51 = vshll.u32 %v4119_v56, 16  ;;  %3562 = vst.msk [vmem:[#allocation2 + $0x20] sm:$0xff] %vm336_vm0, %v3546_v26  ;;  %4528 = vrot.lane.b32.xlu0 %v4407_v40, %s6526_s15  ;;  %v4629_v47 = vrot.slane %v4627_v43, 7  ;;  %v6494_v28 = vld [vmem:[%s9860_s3] sm:$0xff]   ;;  %v10031_v44 = vld [vmem:[#allocation9_spill] sm:$0xff] }
 0x1aa   : > { %v4955_v15 = vshll.u32 %v4935_v0, 16  ;;  %v3923_v61 = vsel %vm1015_vm4, %v3918_v3, %v8426_v25  ;;  %vm10030_vm7 = vcmp.ne.s16.totalorder %v6700_v54, 0  ;;  %v3618_v43 = vshll.u32 %v8370_v42, 16  ;;  %6253 = vmatpush3.bf16.msra.mxu1 %v6494_v28  ;;  %v6496_v42 = vld [vmem:[%s9860_s3 + $0x8] sm:$0xff]  }
 0x1ab   : > { %v4152_v45 = vor.u32 %v4150_v51, %v8433_v7  ;;  %v3593_v26 = vsel %vm10030_vm7, %v3576_v5, 0  ;;  %v3629_v60 = vsel %vm1177_vm12, %v3617_v63, %v3628_v53  ;;  %vm10032_vm13 = vcmp.ne.s16.totalorder %v10031_v44, 0  ;;  %6254 = vmatprep.subr.bf16.mxu1 %v6495_v33  ;;  %v6497_v33 = vld [vmem:[%s9860_s3 + $0x50] sm:$0xff]  }
 0x1ac   : > { %v6156_v52 = vpop.f32.mrb[12].mxu0  ;;  %v3611_v56 = vshrl.u32 %v3593_v26, 16  ;;  %v3596_v3 = vsel %vm10032_vm13, %v3579_v36, 0  ;;  %v4637_v54 = vsel %vm1177_vm12, %v4629_v47, %v4636_v9  ;;  %v4957_v51 = vrot.slane %v4955_v15, 1  ;;  %3759 = vst.msk [vmem:[#allocation3 + $0x18] sm:$0xff] %vm336_vm0, %v3629_v60 }
 0x1ad   : > { %4038 = vrot.lane.b32.xlu1 %v3923_v61, %s6528_s21  ;;  %v6157_v40 = vpop.f32.mrb[13].mxu0  ;;  %v3620_v5 = vor.u32 %v3618_v43, %v3617_v63  ;;  %v3631_v61 = vshrl.u32 %v3596_v3, 16  ;;  %4758 = vrot.lane.b32.xlu0 %v4637_v54, %s6528_s21  ;;  %v4153_v9 = vsel %vm1177_vm12, %v8384_v27, %v4152_v45  ;;  %v4408_v63 = vshrl.u32 %v8410_v11, 16  ;;  %v3807_v11 = vpop.permute.xlu1 %3806 }
 0x1ae   : > { %v6158_v26 = vadd.f32 %v6157_v40, %v6156_v52  ;;  %v6159_v16 = vpop.f32.mrb[14].mxu0  ;;  %v3613_v53 = vrot.slane %v3611_v56, 7  ;;  %v4953_v47 = vshrl.u32 %v4935_v0, 16  ;;  %v3924_v27 = vshrl.u32 %v8418_v4, 16  ;;  %6255 = vmatpush3.bf16.msra.mxu1 %v6496_v42 }
 0x1af   : > { %v6160_v36 = vpop.f32.mrb[15].mxu0  ;;  %v8465_v15 = vrot.slane %v3631_v61, 7  ;;  %v4410_v60 = vor.u32 %v4408_v63, %v4406_v35  ;;  %v3634_v0 = vshll.u32 %v3596_v3, 16  ;;  %vm10033_vm10 = vcmp.ne.s16.totalorder %v10026_v39, 0  ;;  %6256 = vmatprep.subr.bf16.mxu1 %v6497_v33  ;;  %v10036_v63 = vld [vmem:[#allocation8_spill] sm:$0xff]  ;;  %v6499_v33 = vld [vmem:[%s9860_s3 + $0x58] sm:$0xff]  }
 0x1b0   : > { %v3249_v28 = vadd.f32 %v6158_v26, %v8352_v21  ;;  %v6161_v43 = vadd.f32 %v6160_v36, %v6159_v16  ;;  %v3621_v52 = vsel %vm1177_vm12, %v3613_v53, %v3620_v5  ;;  %v4823_v56 = vld [vmem:[#allocation2 + $0x20] sm:$0xff]  ;;  %v4958_v40 = vor.u32 %v4957_v51, %v4953_v47  ;;  %v6498_v53 = vld [vmem:[%s9860_s3 + $0x10] sm:$0xff]  }
 0x1b1   : > { %4268 = vrot.lane.b32.xlu1 %v4153_v9, %s6527_s16  ;;  %3758 = vst.msk [vmem:[#allocation3] sm:$0xff] %vm336_vm0, %v3621_v52  ;;  %v3580_v45 = vld [vmem:[#allocation2 + $0x20] sm:$0xff]  ;;  %4856 = vrot.lane.b32.xlu0 %v4823_v56, %s6527_s16  ;;  %v8480_v5 = vsel %vm10033_vm10, %v4823_v56, 0  ;;  %vm10034_vm5 = vcmp.ne.s16.totalorder %v10017_v6, 0  ;;  %vm10035_vm7 = vcmp.ne.s16.totalorder %v10021_v29, 0  ;;  %v3636_v51 = vor.u32 %v3634_v0, %v8465_v15 }
 0x1b2   : > { %v3410_v54 = vadd.f32 %v8281_v8, %v3249_v28  ;;  %v3252_v61 = vadd.f32 %v6161_v43, %v8352_v21  ;;  %v8484_v35 = vsel %vm10034_vm5, %v4823_v56, 0  ;;  %3854 = vst.msk [vmem:[#allocation3] sm:$0xff] %vm1422_vm11, %v3807_v11  ;;  %v4412_v4 = vshll.u32 %v8480_v5, 16  ;;  %6257 = vmatpush3.bf16.msra.mxu1 %v6498_v53  ;;  %v6500_v11 = vld [vmem:[%s9860_s3 + $0x18] sm:$0xff]  }
 0x1b3   : > { %4348 = vst.msk [vmem:[#allocation3 + $0x38] sm:$0xff] %vm336_vm0, %v3580_v45  ;;  %v4960_v8 = vshll.u32 %v8484_v35, 16  ;;  %v4611_v3 = vsel %vm10035_vm7, %v4823_v56, 0  ;;  %vm10037_vm13 = vcmp.ne.s16.totalorder %v10036_v63, 0  ;;  %vm10038_vm10 = vcmp.ne.s16.totalorder %v10031_v44, 0  ;;  %6258 = vmatprep.subr.bf16.mxu1 %v6499_v33 }
 0x1b4   : > { %v3518_v42 = vmax.f32 %v3410_v54, 0.0  ;;  %v3413_v26 = vadd.f32 %v8286_v62, %v3252_v61  ;;  %v4639_v6 = vshrl.u32 %v4611_v3, 16  ;;  %v4642_v16 = vshll.u32 %v4611_v3, 16  ;;  %vm10040_vm5 = vmmov %vm10037_vm13 }
 0x1b5   : > { %3812 = vrot.lane.b32.xlu1 %v4823_v56, %s6526_s15  ;;  %v8498_v36 = vrot.slane %v4412_v4, 1  ;;  %v4962_v9 = vrot.slane %v4960_v8, 1  ;;  %v8502_v29 = vsel %vm10037_vm13, %v4823_v56, 0  ;;  %v4120_v47 = vsel %vm10038_vm10, %v4823_v56, 0  ;;  %vm10042_vm13 = vmmov %vm10038_vm10 }
 0x1b6   : > { %v3519_v28 = vmax.f32 %v3413_v26, 0.0  ;;  %v8506_v62 = vrot.slane %v4639_v6, 7  ;;  %v3928_v43 = vshll.u32 %v8502_v29, 16  ;;  %v4155_v52 = vshrl.u32 %v4120_v47, 16  ;;  %6259 = vmatpush3.bf16.msra.mxu1 %v6500_v11 }
 0x1b7   : > { %v4415_v0 = vsel %vm1015_vm4, %v4410_v60, %v8498_v36  ;;  %v4963_v56 = vsel %vm1015_vm4, %v4958_v40, %v4962_v9  ;;  %v3926_v54 = vor.u32 %v3924_v27, %v8426_v25  ;;  %v4158_v61 = vshll.u32 %v4120_v47, 16 }
 0x1b8   : > { %v3547_v4 = vpack.c.bf16 %v3519_v28, %v3518_v42  ;;  %4530 = vrot.lane.b32.xlu0 %v4415_v0, %s6526_s15  ;;  %5100 = vst.msk [vmem:[#allocation3 + $0x10] sm:$0xff] %vm336_vm0, %v4963_v56  ;;  %v4644_v8 = vor.u32 %v4642_v16, %v8506_v62  ;;  %v8522_v3 = vrot.slane %v3928_v43, 1  ;;  %v8524_v26 = vrot.slane %v4155_v52, 7  ;;  %v6502_v52 = vld [vmem:[%s9860_s3 + $0x20] sm:$0xff]  }
 0x1b9   : > { %v6162_v6 = vpop.f32.mrb[16].mxu0  ;;  %v3637_v60 = vsel %vm1177_vm12, %v8403_v23, %v3636_v51  ;;  %v3597_v25 = vsel %vm1147_vm15, %v3580_v45, 0  ;;  %v6501_v45 = vld [vmem:[%s9860_s3 + $0x60] sm:$0xff]   ;;  %vm10041_vm7 = vcmp.ne.s16.totalorder %v10026_v39, 0  ;;  %v6505_v39 = vld [vmem:[%s9860_s3 + $0x70] sm:$0xff]  }
 0x1ba   : > { %3563 = vst.msk [vmem:[#allocation2 + $0x28] sm:$0xff] %vm336_vm0, %v3547_v4  ;;  %v6163_v27 = vpop.f32.mrb[17].mxu0  ;;  %v3931_v42 = vsel %vm1015_vm4, %v3926_v54, %v8522_v3  ;;  %v4160_v16 = vor.u32 %v4158_v61, %v8524_v26  ;;  %3760 = vst.msk [vmem:[#allocation3 + $0x30] sm:$0xff] %vm336_vm0, %v3637_v60  ;;  %v3639_v53 = vshrl.u32 %v3597_v25, 16  ;;  %v4645_v23 = vsel %vm1177_vm12, %v8423_v14, %v4644_v8 }
 0x1bb   : > { %v6164_v47 = vadd.f32 %v6163_v27, %v6162_v6  ;;  %v6165_v28 = vpop.f32.mrb[18].mxu0  ;;  %4040 = vrot.lane.b32.xlu1 %v3931_v42, %s6528_s21  ;;  %v3642_v51 = vshll.u32 %v3597_v25, 16  ;;  %v4964_v14 = vshrl.u32 %v8484_v35, 16  ;;  %6260 = vmatprep.subr.bf16.mxu1 %v6501_v45  ;;  %v6503_v35 = vld [vmem:[%s9860_s3 + $0x68] sm:$0xff]  }
 0x1bc   : > { %v6166_v43 = vpop.f32.mrb[19].mxu0  ;;  %4760 = vrot.lane.b32.xlu0 %v4645_v23, %s6528_s21  ;;  %v8545_v33 = vrot.slane %v3639_v53, 7  ;;  %v4161_v56 = vsel %vm1177_vm12, %v8433_v7, %v4160_v16  ;;  %6261 = vmatpush3.bf16.msra.mxu1 %v6502_v52  ;;  %v4416_v7 = vshrl.u32 %v8480_v5, 16 }
 0x1bd   : > { %v6167_v11 = vadd.f32 %v6166_v43, %v6165_v28  ;;  %v3257_v0 = vadd.f32 %v6164_v47, %v8352_v21  ;;  %v4966_v16 = vor.u32 %v4964_v14, %v4962_v9  ;;  %v3932_v47 = vshrl.u32 %v8502_v29, 16  ;;  %6262 = vmatprep.subr.bf16.mxu1 %v6503_v35  ;;  %v10043_v9 = vld [vmem:[#allocation10_spill] sm:$0xff] }
 0x1be   : > { %v3644_v54 = vor.u32 %v3642_v51, %v8545_v33  ;;  %vm10044_vm10 = vcmp.ne.s16.totalorder %v10043_v9, 0  ;;  %v4418_v44 = vor.u32 %v4416_v7, %v8498_v36 }
 0x1bf   : > { %v3418_v61 = vadd.f32 %v8300_v41, %v3257_v0  ;;  %v3260_v4 = vadd.f32 %v6167_v11, %v8352_v21  ;;  %v5118_v8 = vld [vmem:[#allocation3 + $0x10] sm:$0xff]  ;;  %4270 = vrot.lane.b32.xlu1 %v4161_v56, %s6527_s16  ;;  %v8555_v6 = vpop.f32.mrb[24].mxu1  ;;  %v6504_v41 = vld [vmem:[%s9860_s3 + $0x28] sm:$0xff]  }
 0x1c0   : > { %6422 = vmatprep.mubr.msk.bf16.mxu0 %vm336_vm0, %v5118_v8  ;;  %v8562_v60 = vpop.f32.mrb[25].mxu1  ;;  %v3645_v25 = vsel %vm1177_vm12, %v8465_v15, %v3644_v54  ;;  %6263 = vmatpush3.bf16.msra.mxu1 %v6504_v41  ;;  %v6506_v54 = vld [vmem:[%s9860_s3 + $0x30] sm:$0xff]  }
 0x1c1   : > { %v3520_v27 = vmax.f32 %v3418_v61, 0.0  ;;  %v3421_v42 = vadd.f32 %v8304_v1, %v3260_v4  ;;  %v4824_v53 = vld [vmem:[#allocation2 + $0x28] sm:$0xff]  ;;  %v8571_v28 = vpop.f32.mrb[26].mxu1  ;;  %3761 = vst.msk [vmem:[#allocation3 + $0x48] sm:$0xff] %vm336_vm0, %v3645_v25  ;;  %6264 = vmatprep.subr.bf16.mxu1 %v6505_v39  ;;  %v3934_v25 = vor.u32 %v3932_v47, %v8522_v3 }
 0x1c2   : > { %v3581_v5 = vld [vmem:[#allocation2 + $0x28] sm:$0xff]  ;;  %4858 = vrot.lane.b32.xlu0 %v4824_v53, %s6527_s16  ;;  %v4382_v23 = vsel %vm10040_vm5, %v4824_v53, 0  ;;  %v4937_v15 = vsel %vm10041_vm7, %v4824_v53, 0  ;;  %v4612_v1 = vsel %vm10042_vm13, %v4824_v53, 0  ;;  %v8583_v29 = vsel %vm10044_vm10, %v4824_v53, 0  ;;  %v8585_v45 = vpop.f32.mrb[27].mxu1  ;;  %vm10046_vm7 = vmmov %vm10044_vm10 }
 0x1c3   : > { %4349 = vst.msk [vmem:[#allocation3 + $0x50] sm:$0xff] %vm336_vm0, %v3581_v5  ;;  %v3521_v51 = vmax.f32 %v3421_v42, 0.0  ;;  %v4420_v43 = vshll.u32 %v4382_v23, 16  ;;  %3814 = vrot.lane.b32.xlu1 %v4824_v53, %s6526_s15  ;;  %v4968_v52 = vshll.u32 %v4937_v15, 16  ;;  %v4647_v11 = vshrl.u32 %v4612_v1, 16 }
 0x1c4   : > { %v4650_v0 = vshll.u32 %v4612_v1, 16  ;;  %v3936_v14 = vshll.u32 %v8583_v29, 16  ;;  %v4121_v56 = vsel %vm1147_vm15, %v4824_v53, 0  ;;  %6265 = vmatpush3.bf16.msra.mxu1 %v6506_v54  ;;  %vm10045_vm5 = vcmp.ne.s16.totalorder %v7121_v34, 0 }
 0x1c5   : > { %v3548_v61 = vpack.c.bf16 %v3521_v51, %v3520_v27  ;;  %v4422_v4 = vrot.slane %v4420_v43, 1  ;;  %v4970_v8 = vrot.slane %v4968_v52, 1  ;;  %v8599_v35 = vrot.slane %v4647_v11, 7  ;;  %v6507_v51 = vld [vmem:[%s9860_s3 + $0x78] sm:$0xff]  }
 0x1c6   : > { %v8602_v36 = vrot.slane %v3936_v14, 1  ;;  %v4163_v7 = vshrl.u32 %v4121_v56, 16  ;;  %v4166_v11 = vshll.u32 %v4121_v56, 16  ;;  %6266 = vmatprep.subr.bf16.mxu1 %v6507_v51  ;;  %vm10047_vm13 = vcmp.ne.s16.totalorder %v10036_v63, 0 }
 0x1c7   : > { %v6168_v41 = vpop.f32.mrb[20].mxu0  ;;  %3564 = vst.msk [vmem:[#allocation2 + $0x30] sm:$0xff] %vm336_vm0, %v3548_v61  ;;  %v4423_v53 = vsel %vm1015_vm4, %v4418_v44, %v4422_v4  ;;  %v4971_v1 = vsel %vm1015_vm4, %v4966_v16, %v4970_v8  ;;  %v4652_v27 = vor.u32 %v4650_v0, %v8599_v35  ;;  %v6508_v16 = vld [vmem:[%s9860_s3 + $0x38] sm:$0xff]   ;;  %v3598_v44 = vsel %vm10045_vm5, %v3581_v5, 0 }
 0x1c8   : > { %v6169_v42 = vpop.f32.mrb[21].mxu0  ;;  %4532 = vrot.lane.b32.xlu0 %v4423_v53, %s6526_s15  ;;  %5101 = vst.msk [vmem:[#allocation3 + $0x28] sm:$0xff] %vm336_vm0, %v4971_v1  ;;  %v3939_v3 = vsel %vm1015_vm4, %v3934_v25, %v8602_v36  ;;  %v8615_v47 = vrot.slane %v4163_v7, 7  ;;  %6267 = vmatpush3.bf16.msra.mxu1 %v6508_v16  ;;  %v3647_v61 = vshrl.u32 %v3598_v44, 16  ;;  %v4972_v25 = vshrl.u32 %v4937_v15, 16 }
 0x1c9   : > { %v6170_v43 = vadd.f32 %v6169_v42, %v6168_v41  ;;  %v6171_v52 = vpop.f32.mrb[22].mxu0  ;;  %4042 = vrot.lane.b32.xlu1 %v3939_v3, %s6528_s21  ;;  %v4653_v56 = vsel %vm1177_vm12, %v8506_v62, %v4652_v27  ;;  %v4424_v41 = vshrl.u32 %v4382_v23, 16  ;;  %6454 = vmatprep.subr.bf16.mxu1 %v8309_v13  ;;  %v3940_v13 = vshrl.u32 %v8583_v29, 16 }
 0x1ca   : > { %v6172_v39 = vpop.f32.mrb[23].mxu0  ;;  %v4168_v54 = vor.u32 %v4166_v11, %v8615_v47  ;;  %v4974_v1 = vor.u32 %v4972_v25, %v4970_v8  ;;  %v8634_v51 = vrot.slane %v3647_v61, 7  ;;  %v10048_v8 = vld [vmem:[#allocation12_spill] sm:$0xff] }
 0x1cb   : > { %v3265_v0 = vadd.f32 %v6170_v43, %v8352_v21  ;;  %v6173_v14 = vadd.f32 %v6172_v39, %v6171_v52  ;;  %v4426_v53 = vor.u32 %v4424_v41, %v4422_v4  ;;  %vm10049_vm10 = vcmp.ne.s16.totalorder %v10048_v8, 0 }
 0x1cc   : > { %4762 = vrot.lane.b32.xlu0 %v4653_v56, %s6528_s21  ;;  %v4169_v5 = vsel %vm1177_vm12, %v8524_v26, %v4168_v54  ;;  %v3942_v56 = vor.u32 %v3940_v13, %v8602_v36 }
 0x1cd   : > { %v3426_v7 = vadd.f32 %v8298_v58, %v3265_v0  ;;  %v3268_v42 = vadd.f32 %v6173_v14, %v8352_v21  ;;  %4272 = vrot.lane.b32.xlu1 %v4169_v5, %s6527_s16  ;;  %v3650_v58 = vshll.u32 %v3598_v44, 16 }
 0x1ce   : > { %v4825_v15 = vld [vmem:[#allocation2 + $0x30] sm:$0xff] }
 0x1cf   : > { %v3522_v62 = vmax.f32 %v3426_v7, 0.0  ;;  %v3429_v23 = vadd.f32 %v8302_v20, %v3268_v42  ;;  %v3582_v27 = vld [vmem:[#allocation2 + $0x30] sm:$0xff]  ;;  %v5121_v43 = vld [vmem:[#allocation3 + $0x28] sm:$0xff]  ;;  %v4383_v52 = vsel %vm10046_vm7, %v4825_v15, 0  ;;  %v4938_v26 = vsel %vm10047_vm13, %v4825_v15, 0  ;;  %vm10051_vm7 = vmmov %vm10049_vm10 }
 0x1d0   : > { %v4613_v4 = vsel %vm1147_vm15, %v4825_v15, 0  ;;  %v3892_v3 = vsel %vm10049_vm10, %v4825_v15, 0  ;;  %4350 = vst.msk [vmem:[#allocation3 + $0x68] sm:$0xff] %vm336_vm0, %v3582_v27  ;;  %6423 = vmatmul.mubr.msk.bf16.vlgmr.msra.gmra.mrb[64].mxu0 %vm336_vm0, %v5121_v43  ;;  %4860 = vrot.lane.b32.xlu0 %v4825_v15, %s6527_s16  ;;  %v4428_v29 = vshll.u32 %v4383_v52, 16  ;;  %v4976_v11 = vshll.u32 %v4938_v26, 16  ;;  %vm10053_vm10 = vmmov %vm10045_vm5 }
 0x1d1   : > { %v3523_v20 = vmax.f32 %v3429_v23, 0.0  ;;  %v4655_v16 = vshrl.u32 %v4613_v4, 16  ;;  %3816 = vrot.lane.b32.xlu1 %v4825_v15, %s6526_s15  ;;  %v4658_v63 = vshll.u32 %v4613_v4, 16  ;;  %v3944_v39 = vshll.u32 %v3892_v3, 16 }
 0x1d2   : > { %v4122_v40 = vsel %vm10045_vm5, %v4825_v15, 0  ;;  %v3652_v44 = vor.u32 %v3650_v58, %v8634_v51  ;;  %v4430_v14 = vrot.slane %v4428_v29, 1  ;;  %v4978_v54 = vrot.slane %v4976_v11, 1  ;;  %v6174_v42 = vpop.f32.mrb[24].mxu0 }
 0x1d3   : > { %v3549_v0 = vpack.c.bf16 %v3523_v20, %v3522_v62  ;;  %v8653_v61 = vrot.slane %v4655_v16, 7  ;;  %v3946_v41 = vrot.slane %v3944_v39, 1  ;;  %v4171_v25 = vshrl.u32 %v4122_v40, 16  ;;  %v6175_v58 = vpop.f32.mrb[25].mxu0 }
 0x1d4   : > { %v4174_v7 = vshll.u32 %v4122_v40, 16  ;;  %v4431_v5 = vsel %vm1015_vm4, %v4426_v53, %v4430_v14  ;;  %v4979_v23 = vsel %vm1015_vm4, %v4974_v1, %v4978_v54  ;;  %v6176_v13 = vadd.f32 %v6175_v58, %v6174_v42  ;;  %v6177_v43 = vpop.f32.mrb[26].mxu0 }
 0x1d5   : > { %3565 = vst.msk [vmem:[#allocation2 + $0x38] sm:$0xff] %vm336_vm0, %v3549_v0  ;;  %v4660_v15 = vor.u32 %v4658_v63, %v8653_v61  ;;  %4534 = vrot.lane.b32.xlu0 %v4431_v5, %s6526_s15  ;;  %5102 = vst.msk [vmem:[#allocation3 + $0x40] sm:$0xff] %vm336_vm0, %v4979_v23  ;;  %v3947_v62 = vsel %vm1015_vm4, %v3942_v56, %v3946_v41  ;;  %v8663_v36 = vrot.slane %v4171_v25, 7  ;;  %v4432_v4 = vshrl.u32 %v4383_v52, 16  ;;  %v6178_v20 = vpop.f32.mrb[27].mxu0 }
 0x1d6   : > { %4044 = vrot.lane.b32.xlu1 %v3947_v62, %s6528_s21  ;;  %v3653_v53 = vsel %vm1177_vm12, %v8545_v33, %v3652_v44  ;;  %vm10050_vm15 = vcmp.ne.s16.totalorder %v7215_v38, 0  ;;  %v4980_v11 = vshrl.u32 %v4938_v26, 16  ;;  %v3948_v16 = vshrl.u32 %v3892_v3, 16 }
 0x1d7   : > { %v3599_v1 = vsel %vm10050_vm15, %v3582_v27, 0  ;;  %v4176_v29 = vor.u32 %v4174_v7, %v8663_v36  ;;  %3762 = vst.msk [vmem:[#allocation3 + $0x60] sm:$0xff] %vm336_vm0, %v3653_v53  ;;  %v6179_v39 = vadd.f32 %v6178_v20, %v6177_v43  ;;  %v3273_v40 = vadd.f32 %v6176_v13, %v8352_v21 }
 0x1d8   : > { %v3655_v63 = vshrl.u32 %v3599_v1, 16  ;;  %v4661_v52 = vsel %vm1177_vm12, %v8599_v35, %v4660_v15  ;;  %v3658_v3 = vshll.u32 %v3599_v1, 16  ;;  %v4434_v56 = vor.u32 %v4432_v4, %v4430_v14  ;;  %v10054_v15 = vld [vmem:[#allocation13_spill] sm:$0xff] }
 0x1d9   : > { %4764 = vrot.lane.b32.xlu0 %v4661_v52, %s6528_s21  ;;  %v4177_v33 = vsel %vm1177_vm12, %v8615_v47, %v4176_v29  ;;  %v3434_v27 = vadd.f32 %v8326_v30, %v3273_v40  ;;  %v3276_v44 = vadd.f32 %v6179_v39, %v8352_v21  ;;  %v4982_v25 = vor.u32 %v4980_v11, %v4978_v54 }
 0x1da   : > { %4274 = vrot.lane.b32.xlu1 %v4177_v33, %s6527_s16  ;;  %v8681_v26 = vrot.slane %v3655_v63, 7  ;;  %v3950_v7 = vor.u32 %v3948_v16, %v3946_v41  ;;  %vm10052_vm13 = vcmp.ne.s16.totalorder %v10043_v9, 0  ;;  %vm10055_vm5 = vcmp.ne.s16.totalorder %v10054_v15, 0 }
 0x1db   : > { %v3524_v35 = vmax.f32 %v3434_v27, 0.0  ;;  %v3437_v5 = vadd.f32 %v8331_v49, %v3276_v44 }
 0x1dc   : > { %v4826_v0 = vld [vmem:[#allocation2 + $0x38] sm:$0xff]  ;;  %v5124_v23 = vld [vmem:[#allocation3 + $0x40] sm:$0xff]  ;;  %v3660_v13 = vor.u32 %v3658_v3, %v8681_v26 }
 0x1dd   : > { %v3583_v42 = vld [vmem:[#allocation2 + $0x38] sm:$0xff]  ;;  %v4384_v47 = vsel %vm10051_vm7, %v4826_v0, 0  ;;  %v4939_v30 = vsel %vm10052_vm13, %v4826_v0, 0  ;;  %6426 = vmatprep.mubr.msk.bf16.mxu0 %vm336_vm0, %v5124_v23  ;;  %4862 = vrot.lane.b32.xlu0 %v4826_v0, %s6527_s16  ;;  %v4614_v41 = vsel %vm10053_vm10, %v4826_v0, 0  ;;  %v8695_v49 = vsel %vm10055_vm5, %v4826_v0, 0  ;;  %vm10057_vm13 = vmmov %vm10055_vm5 }
 0x1de   : > { %4351 = vst.msk [vmem:[#allocation3 + $0x80] sm:$0xff] %vm336_vm0, %v3583_v42  ;;  %v4436_v14 = vshll.u32 %v4384_v47, 16  ;;  %v4984_v54 = vshll.u32 %v4939_v30, 16  ;;  %v3525_v58 = vmax.f32 %v3437_v5, 0.0  ;;  %3818 = vrot.lane.b32.xlu1 %v4826_v0, %s6526_s15  ;;  %v4663_v9 = vshrl.u32 %v4614_v41, 16  ;;  %vm10059_vm5 = vmmov %vm10050_vm15 }
 0x1df   : > { %v3952_v62 = vshll.u32 %v8695_v49, 16  ;;  %v4666_v53 = vshll.u32 %v4614_v41, 16  ;;  %v4123_v1 = vsel %vm10050_vm15, %v4826_v0, 0  ;;  %v3661_v23 = vsel %vm1177_vm12, %v8634_v51, %v3660_v13 }
 0x1e0   : > { %v4438_v43 = vrot.slane %v4436_v14, 1  ;;  %v4986_v4 = vrot.slane %v4984_v54, 1  ;;  %v3550_v34 = vpack.c.bf16 %v3525_v58, %v3524_v35  ;;  %v6180_v20 = vpop.f32.mrb[28].mxu0  ;;  %v8702_v29 = vrot.slane %v4663_v9, 7  ;;  %3763 = vst.msk [vmem:[#allocation3 + $0x78] sm:$0xff] %vm336_vm0, %v3661_v23 }
 0x1e1   : > { %v8704_v11 = vrot.slane %v3952_v62, 1  ;;  %v4179_v16 = vshrl.u32 %v4123_v1, 16  ;;  %v6181_v63 = vpop.f32.mrb[29].mxu0  ;;  %v4182_v52 = vshll.u32 %v4123_v1, 16  ;;  %vm10056_vm7 = vcmp.ne.s16.totalorder %v7298_v37, 0 }
 0x1e2   : > { %v4439_v39 = vsel %vm1015_vm4, %v4434_v56, %v4438_v43  ;;  %v4987_v40 = vsel %vm1015_vm4, %v4982_v25, %v4986_v4  ;;  %v8708_v33 = vpop.f32.mrb[28].mxu1  ;;  %3566 = vst.msk [vmem:[#allocation2 + $0x40] sm:$0xff] %vm336_vm0, %v3550_v34  ;;  %v6182_v27 = vadd.f32 %v6181_v63, %v6180_v20  ;;  %v6183_v44 = vpop.f32.mrb[30].mxu0  ;;  %v4668_v3 = vor.u32 %v4666_v53, %v8702_v29 }
 0x1e3   : > { %4536 = vrot.lane.b32.xlu0 %v4439_v39, %s6526_s15  ;;  %5103 = vst.msk [vmem:[#allocation3 + $0x58] sm:$0xff] %vm336_vm0, %v4987_v40  ;;  %v3955_v0 = vsel %vm1015_vm4, %v3950_v7, %v8704_v11  ;;  %v8716_v35 = vrot.slane %v4179_v16, 7  ;;  %v8718_v56 = vpop.f32.mrb[29].mxu1  ;;  %v6184_v25 = vpop.f32.mrb[31].mxu0  ;;  %v3600_v14 = vsel %vm10056_vm7, %v3583_v42, 0  ;;  %v4440_v13 = vshrl.u32 %v4384_v47, 16 }
 0x1e4   : > { %4046 = vrot.lane.b32.xlu1 %v3955_v0, %s6528_s21  ;;  %v8721_v5 = vpop.f32.mrb[30].mxu1  ;;  %v3281_v54 = vadd.f32 %v6182_v27, %v8352_v21  ;;  %v6185_v41 = vadd.f32 %v6184_v25, %v6183_v44  ;;  %v4669_v9 = vsel %vm1177_vm12, %v8653_v61, %v4668_v3  ;;  %v3663_v62 = vshrl.u32 %v3600_v14, 16  ;;  %v10060_v0 = vld [vmem:[#allocation14_spill] sm:$0xff] }
 0x1e5   : > { %v4184_v7 = vor.u32 %v4182_v52, %v8716_v35  ;;  %v8729_v58 = vpop.f32.mrb[31].mxu1  ;;  %v4988_v1 = vshrl.u32 %v4939_v30, 16  ;;  %v4442_v20 = vor.u32 %v4440_v13, %v4438_v43  ;;  %v3956_v40 = vshrl.u32 %v8695_v49, 16 }
 0x1e6   : > { %v3442_v53 = vadd.f32 %v8324_v22, %v3281_v54  ;;  %v3284_v51 = vadd.f32 %v6185_v41, %v8352_v21  ;;  %v8741_v16 = vrot.slane %v3663_v62, 7  ;;  %v3666_v52 = vshll.u32 %v3600_v14, 16 }
 0x1e7   : > { %4766 = vrot.lane.b32.xlu0 %v4669_v9, %s6528_s21  ;;  %v4185_v42 = vsel %vm1177_vm12, %v8663_v36, %v4184_v7  ;;  %v4990_v22 = vor.u32 %v4988_v1, %v4986_v4  ;;  %vm10058_vm10 = vcmp.ne.s16.totalorder %v10048_v8, 0  ;;  %vm10061_vm15 = vcmp.ne.s16.totalorder %v10060_v0, 0 }
 0x1e8   : > { %4276 = vrot.lane.b32.xlu1 %v4185_v42, %s6527_s16  ;;  %v3445_v34 = vadd.f32 %v8328_v55, %v3284_v51  ;;  %v3526_v61 = vmax.f32 %v3442_v53, 0.0  ;;  %v3668_v23 = vor.u32 %v3666_v52, %v8741_v16  ;;  %v3958_v9 = vor.u32 %v3956_v40, %v8704_v11 }
 0x1e9   : > { %v4827_v39 = vld [vmem:[#allocation2 + $0x40] sm:$0xff] }
 0x1ea   : > { %v5127_v63 = vld [vmem:[#allocation3 + $0x58] sm:$0xff]  ;;  %v3584_v27 = vld [vmem:[#allocation2 + $0x40] sm:$0xff]  ;;  %v3527_v44 = vmax.f32 %v3445_v34, 0.0  ;;  %v4385_v36 = vsel %vm10057_vm13, %v4827_v39, 0  ;;  %v4940_v55 = vsel %vm10058_vm10, %v4827_v39, 0  ;;  %v4615_v47 = vsel %vm10059_vm5, %v4827_v39, 0  ;;  %vm10063_vm10 = vmmov %vm10061_vm15 }
 0x1eb   : > { %6427 = vmatmul.mubr.msk.bf16.gmra.mrb[68].mxu0 %vm336_vm0, %v5127_v63  ;;  %4864 = vrot.lane.b32.xlu0 %v4827_v39, %s6527_s16  ;;  %4352 = vst.msk [vmem:[#allocation3 + $0x98] sm:$0xff] %vm336_vm0, %v3584_v27  ;;  %v4444_v30 = vshll.u32 %v4385_v36, 16  ;;  %v4992_v49 = vshll.u32 %v4940_v55, 16  ;;  %v4671_v43 = vshrl.u32 %v4615_v47, 16  ;;  %v4674_v4 = vshll.u32 %v4615_v47, 16 }
 0x1ec   : > { %3820 = vrot.lane.b32.xlu1 %v4827_v39, %s6526_s15  ;;  %v3551_v3 = vpack.c.bf16 %v3527_v44, %v3526_v61  ;;  %v8756_v25 = vsel %vm10061_vm15, %v4827_v39, 0  ;;  %v4124_v8 = vsel %vm10056_vm7, %v4827_v39, 0  ;;  %v4448_v40 = vshrl.u32 %v4385_v36, 16  ;;  %vm10065_vm15 = vmmov %vm10056_vm7 }
 0x1ed   : > { %v4446_v38 = vrot.slane %v4444_v30, 1  ;;  %v4994_v14 = vrot.slane %v4992_v49, 1  ;;  %v8761_v54 = vrot.slane %v4671_v43, 7  ;;  %v3960_v41 = vshll.u32 %v8756_v25, 16  ;;  %v6186_v7 = vpop.f32.mrb[32].mxu0 }
 0x1ee   : > { %3567 = vst.msk [vmem:[#allocation2 + $0x48] sm:$0xff] %vm336_vm0, %v3551_v3  ;;  %v4187_v62 = vshrl.u32 %v4124_v8, 16  ;;  %v4190_v53 = vshll.u32 %v4124_v8, 16  ;;  %v6187_v51 = vpop.f32.mrb[33].mxu0  ;;  %v4996_v44 = vshrl.u32 %v4940_v55, 16  ;;  %vm10062_vm13 = vcmp.ne.s16.totalorder %v7380_v18, 0 }
 0x1ef   : > { %v4447_v42 = vsel %vm1015_vm4, %v4442_v20, %v4446_v38  ;;  %v4995_v13 = vsel %vm1015_vm4, %v4990_v22, %v4994_v14  ;;  %v4676_v1 = vor.u32 %v4674_v4, %v8761_v54  ;;  %v3962_v34 = vrot.slane %v3960_v41, 1  ;;  %v6189_v63 = vpop.f32.mrb[34].mxu0 }
 0x1f0   : > { %v6188_v61 = vadd.f32 %v6187_v51, %v6186_v7  ;;  %4538 = vrot.lane.b32.xlu0 %v4447_v42, %s6526_s15  ;;  %5104 = vst.msk [vmem:[#allocation3 + $0x70] sm:$0xff] %vm336_vm0, %v4995_v13  ;;  %v8771_v39 = vrot.slane %v4187_v62, 7  ;;  %v6190_v52 = vpop.f32.mrb[35].mxu0  ;;  %v3669_v20 = vsel %vm1177_vm12, %v8681_v26, %v3668_v23  ;;  %v3601_v49 = vsel %vm10062_vm13, %v3584_v27, 0 }
 0x1f1   : > { %v3963_v11 = vsel %vm1015_vm4, %v3958_v9, %v3962_v34  ;;  %v6191_v22 = vadd.f32 %v6190_v52, %v6189_v63  ;;  %3764 = vst.msk [vmem:[#allocation3 + $0x90] sm:$0xff] %vm336_vm0, %v3669_v20  ;;  %v4677_v43 = vsel %vm1177_vm12, %v8702_v29, %v4676_v1  ;;  %v3964_v26 = vshrl.u32 %v8756_v25, 16 }
 0x1f2   : > { %v3289_v47 = vadd.f32 %v6188_v61, %v8352_v21  ;;  %4048 = vrot.lane.b32.xlu1 %v3963_v11, %s6528_s21  ;;  %v4192_v30 = vor.u32 %v4190_v53, %v8771_v39  ;;  %v3671_v4 = vshrl.u32 %v3601_v49, 16  ;;  %v4450_v23 = vor.u32 %v4448_v40, %v4446_v38 }
 0x1f3   : > { %v3292_v55 = vadd.f32 %v6191_v22, %v8352_v21  ;;  %v4998_v41 = vor.u32 %v4996_v44, %v4994_v14  ;;  %v3674_v7 = vshll.u32 %v3601_v49, 16  ;;  %vm10064_vm5 = vcmp.ne.s16.totalorder %v10054_v15, 0  ;;  %v10066_v14 = vld [vmem:[#allocation15_spill] sm:$0xff] }
 0x1f4   : > { %v3450_v36 = vadd.f32 %v8343_v12, %v3289_v47  ;;  %4768 = vrot.lane.b32.xlu0 %v4677_v43, %s6528_s21  ;;  %v4193_v8 = vsel %vm1177_vm12, %v8716_v35, %v4192_v30  ;;  %vm10067_vm7 = vcmp.ne.s16.totalorder %v10066_v14, 0  ;;  %v8803_v15 = vrot.slane %v3671_v4, 7 }
 0x1f5   : > { %v4828_v3 = vld [vmem:[#allocation2 + $0x48] sm:$0xff]  ;;  %v3453_v29 = vadd.f32 %v8347_v31, %v3292_v55  ;;  %v3966_v22 = vor.u32 %v3964_v26, %v3962_v34 }
 0x1f6   : > { %v3585_v27 = vld [vmem:[#allocation2 + $0x48] sm:$0xff]  ;;  %v3528_v9 = vmax.f32 %v3450_v36, 0.0  ;;  %4278 = vrot.lane.b32.xlu1 %v4193_v8, %s6527_s16  ;;  %v4386_v12 = vsel %vm10063_vm10, %v4828_v3, 0  ;;  %v4941_v21 = vsel %vm10064_vm5, %v4828_v3, 0  ;;  %v4616_v38 = vsel %vm10065_vm15, %v4828_v3, 0  ;;  %vm10069_vm5 = vmmov %vm10067_vm7 }
 0x1f7   : > { %4353 = vst.msk [vmem:[#allocation3 + $0xb0] sm:$0xff] %vm336_vm0, %v3585_v27  ;;  %v5130_v25 = vld [vmem:[#allocation3 + $0x70] sm:$0xff]  ;;  %v4452_v62 = vshll.u32 %v4386_v12, 16  ;;  %v5000_v35 = vshll.u32 %v4941_v21, 16  ;;  %v3895_v53 = vsel %vm10067_vm7, %v4828_v3, 0  ;;  %v3529_v31 = vmax.f32 %v3453_v29, 0.0  ;;  %vm10071_vm7 = vmmov %vm10062_vm13 }
 0x1f8   : > { %6430 = vmatprep.mubr.msk.bf16.mxu0 %vm336_vm0, %v5130_v25  ;;  %4866 = vrot.lane.b32.xlu0 %v4828_v3, %s6527_s16  ;;  %v4679_v51 = vshrl.u32 %v4616_v38, 16  ;;  %v3968_v42 = vshll.u32 %v3895_v53, 16  ;;  %v4682_v61 = vshll.u32 %v4616_v38, 16  ;;  %v4125_v63 = vsel %vm10062_vm13, %v4828_v3, 0 }
 0x1f9   : > { %v4454_v13 = vrot.slane %v4452_v62, 1  ;;  %v5002_v1 = vrot.slane %v5000_v35, 1  ;;  %v3552_v37 = vpack.c.bf16 %v3529_v31, %v3528_v9  ;;  %v4195_v40 = vshrl.u32 %v4125_v63, 16 }
 0x1fa   : > { %3822 = vrot.lane.b32.xlu1 %v4828_v3, %s6526_s15  ;;  %v8808_v52 = vrot.slane %v4679_v51, 7  ;;  %v3970_v11 = vrot.slane %v3968_v42, 1  ;;  %v4198_v49 = vshll.u32 %v4125_v63, 16  ;;  %v3676_v36 = vor.u32 %v3674_v7, %v8803_v15  ;;  %v8856_v63 = vld [vmem:[%s9859_s2] ss:$0 sm:$0xff] }
 0x1fb   : > { %v4455_v44 = vsel %vm1015_vm4, %v4450_v23, %v4454_v13  ;;  %v5003_v20 = vsel %vm1015_vm4, %v4998_v41, %v5002_v1  ;;  %3568 = vst.msk [vmem:[#allocation2 + $0x50] sm:$0xff] %vm336_vm0, %v3552_v37  ;;  %v8816_v30 = vrot.slane %v4195_v40, 7  ;;  %vm10068_vm10 = vcmp.ne.s16.totalorder %v7478_v19, 0 }
 0x1fc   : > { %4540 = vrot.lane.b32.xlu0 %v4455_v44, %s6526_s15  ;;  %5105 = vst.msk [vmem:[#allocation3 + $0x88] sm:$0xff] %vm336_vm0, %v5003_v20  ;;  %v4684_v47 = vor.u32 %v4682_v61, %v8808_v52  ;;  %v3971_v43 = vsel %vm1015_vm4, %v3966_v22, %v3970_v11  ;;  %v3602_v34 = vsel %vm10068_vm10, %v3585_v27, 0  ;;  %v3677_v4 = vsel %vm1177_vm12, %v8741_v16, %v3676_v36 }
 0x1fd   : > { %v4200_v55 = vor.u32 %v4198_v49, %v8816_v30  ;;  %v3679_v3 = vshrl.u32 %v3602_v34, 16  ;;  %v4456_v8 = vshrl.u32 %v4386_v12, 16  ;;  %v5004_v23 = vshrl.u32 %v4941_v21, 16  ;;  %3765 = vst.msk [vmem:[#allocation3 + $0xa8] sm:$0xff] %vm336_vm0, %v3677_v4 }
 0x1fe   : > { %4050 = vrot.lane.b32.xlu1 %v3971_v43, %s6528_s21  ;;  %v4685_v26 = vsel %vm1177_vm12, %v8761_v54, %v4684_v47  ;;  %v3972_v9 = vshrl.u32 %v3895_v53, 16  ;;  %v3682_v27 = vshll.u32 %v3602_v34, 16  ;;  %vm10070_vm15 = vcmp.ne.s16.totalorder %v10060_v0, 0 }
 0x1ff   : > { %v4201_v7 = vsel %vm1177_vm12, %v8771_v39, %v4200_v55  ;;  %v8832_v29 = vrot.slane %v3679_v3, 7  ;;  %v4458_v54 = vor.u32 %v4456_v8, %v4454_v13  ;;  %v5006_v12 = vor.u32 %v5004_v23, %v5002_v1  ;;  %v10072_v1 = vld [vmem:[#allocation16_spill] sm:$0xff] }
 0x200   : > { %4770 = vrot.lane.b32.xlu0 %v4685_v26, %s6528_s21  ;;  %v3974_v21 = vor.u32 %v3972_v9, %v3970_v11  ;;  %vm10073_vm13 = vcmp.ne.s16.totalorder %v10072_v1, 0 }
 0x201   : > { %v6192_v41 = vpop.f32.mrb[36].mxu0  ;;  %v3684_v31 = vor.u32 %v3682_v27, %v8832_v29 }
 0x202   : > { %v6193_v25 = vpop.f32.mrb[37].mxu0  ;;  %4280 = vrot.lane.b32.xlu1 %v4201_v7, %s6527_s16  ;;  %v4829_v38 = vld [vmem:[#allocation2 + $0x50] sm:$0xff] }
 0x203   : > { %v6194_v16 = vadd.f32 %v6193_v25, %v6192_v41  ;;  %v6195_v62 = vpop.f32.mrb[38].mxu0  ;;  %v5133_v35 = vld [vmem:[#allocation3 + $0x88] sm:$0xff]  ;;  %v3586_v51 = vld [vmem:[#allocation2 + $0x50] sm:$0xff]  ;;  %v8840_v39 = vsel %vm10069_vm5, %v4829_v38, 0  ;;  %v8844_v53 = vsel %vm10070_vm15, %v4829_v38, 0  ;;  %v4617_v13 = vsel %vm10071_vm7, %v4829_v38, 0  ;;  %vm10075_vm15 = vmmov %vm10073_vm13 }
 0x204   : > { %v6196_v42 = vpop.f32.mrb[39].mxu0  ;;  %6431 = vmatmul.mubr.msk.bf16.gmra.mrb[72].mxu0 %vm336_vm0, %v5133_v35  ;;  %4868 = vrot.lane.b32.xlu0 %v4829_v38, %s6527_s16  ;;  %v8850_v61 = vsel %vm10073_vm13, %v4829_v38, 0  ;;  %4354 = vst.msk [vmem:[#allocation3 + $0xc8] sm:$0xff] %vm336_vm0, %v3586_v51  ;;  %v4460_v0 = vshll.u32 %v8840_v39, 16  ;;  %v5008_v40 = vshll.u32 %v8844_v53, 16  ;;  %v4687_v18 = vshrl.u32 %v4617_v13, 16  ;;  %vm10077_vm13 = vmmov %vm10068_vm10 }
 0x205   : > { %v3297_v37 = vadd.f32 %v8856_v63, %v6194_v16  ;;  %v6197_v11 = vadd.f32 %v6196_v42, %v6195_v62  ;;  %v4690_v44 = vshll.u32 %v4617_v13, 16  ;;  %v3976_v20 = vshll.u32 %v8850_v61, 16 }
 0x206   : > { %3824 = vrot.lane.b32.xlu1 %v4829_v38, %s6526_s15  ;;  %v4126_v22 = vsel %vm10068_vm10, %v4829_v38, 0  ;;  %v4462_v43 = vrot.slane %v4460_v0, 1  ;;  %v5010_v36 = vrot.slane %v5008_v40, 1  ;;  %v8867_v55 = vrot.slane %v4687_v18, 7 }
 0x207   : > { %v3458_v47 = vadd.f32 %v8341_v46, %v3297_v37  ;;  %v3300_v49 = vadd.f32 %v8856_v63, %v6197_v11  ;;  %v8869_v34 = vrot.slane %v3976_v20, 1  ;;  %v4203_v26 = vshrl.u32 %v4126_v22, 16 }
 0x208   : > { %v4206_v4 = vshll.u32 %v4126_v22, 16  ;;  %v4463_v8 = vsel %vm1015_vm4, %v4458_v54, %v4462_v43  ;;  %v5011_v23 = vsel %vm1015_vm4, %v5006_v12, %v5010_v36  ;;  %v4692_v46 = vor.u32 %v4690_v44, %v8867_v55 }
 0x209   : > { %v3461_v3 = vadd.f32 %v8345_v17, %v3300_v49  ;;  %4542 = vrot.lane.b32.xlu0 %v4463_v8, %s6526_s15  ;;  %5106 = vst.msk [vmem:[#allocation3 + $0xa0] sm:$0xff] %vm336_vm0, %v5011_v23  ;;  %v3979_v41 = vsel %vm1015_vm4, %v3974_v21, %v8869_v34  ;;  %v8879_v7 = vrot.slane %v4203_v26, 7  ;;  %v3530_v9 = vmax.f32 %v3458_v47, 0.0  ;;  %v10078_v8 = vld [vmem:[#allocation17_spill] sm:$0xff] }
 0x20a   : > { %4052 = vrot.lane.b32.xlu1 %v3979_v41, %s6528_s21  ;;  %v3685_v17 = vsel %vm1177_vm12, %v8803_v15, %v3684_v31  ;;  %vm10074_vm5 = vcmp.ne.s16.totalorder %v7592_v50, 0  ;;  %v4693_v35 = vsel %vm1177_vm12, %v8808_v52, %v4692_v46  ;;  %v4464_v11 = vshrl.u32 %v8840_v39, 16 }
 0x20b   : > { %v3531_v27 = vmax.f32 %v3461_v3, 0.0  ;;  %v4208_v25 = vor.u32 %v4206_v4, %v8879_v7  ;;  %3766 = vst.msk [vmem:[#allocation3 + $0xc0] sm:$0xff] %vm336_vm0, %v3685_v17  ;;  %v3603_v16 = vsel %vm10074_vm5, %v3586_v51, 0  ;;  %v3980_v22 = vshrl.u32 %v8850_v61, 16 }
 0x20c   : > { %v3687_v38 = vshrl.u32 %v3603_v16, 16  ;;  %v3690_v12 = vshll.u32 %v3603_v16, 16  ;;  %vm10076_vm7 = vcmp.ne.s16.totalorder %v10066_v14, 0  ;;  %vm10079_vm10 = vcmp.ne.s16.totalorder %v10078_v8, 0 }
 0x20d   : > { %v3809_v54 = vpop.permute.xlu1 %3808  ;;  %v3553_v62 = vpack.c.bf16 %v3531_v27, %v3530_v9  ;;  %4772 = vrot.lane.b32.xlu0 %v4693_v35, %s6528_s21  ;;  %v4209_v15 = vsel %vm1177_vm12, %v8816_v30, %v4208_v25  ;;  %v5012_v30 = vshrl.u32 %v8844_v53, 16  ;;  %v4466_v53 = vor.u32 %v4464_v11, %v4462_v43 }
 0x20e   : > { %3855 = vst.msk [vmem:[#allocation3 + $0x18] sm:$0xff] %vm1422_vm11, %v3809_v54  ;;  %4282 = vrot.lane.b32.xlu1 %v4209_v15, %s6527_s16  ;;  %v8896_v21 = vrot.slane %v3687_v38, 7  ;;  %v3982_v19 = vor.u32 %v3980_v22, %v8869_v34 }
 0x20f   : > { %3569 = vst.msk [vmem:[#allocation2 + $0x58] sm:$0xff] %vm336_vm0, %v3553_v62  ;;  %v6198_v31 = vpop.f32.mrb[40].mxu0  ;;  %v5014_v26 = vor.u32 %v5012_v30, %v5010_v36 }
 0x210   : > { %v6199_v51 = vpop.f32.mrb[41].mxu0  ;;  %v5136_v42 = vld [vmem:[#allocation3 + $0xa0] sm:$0xff]  ;;  %v3692_v52 = vor.u32 %v3690_v12, %v8896_v21 }
 0x211   : > { %v6200_v13 = vadd.f32 %v6199_v51, %v6198_v31  ;;  %v6201_v37 = vpop.f32.mrb[42].mxu0  ;;  %6434 = vmatprep.mubr.msk.bf16.mxu0 %vm336_vm0, %v5136_v42 }
 0x212   : > { %v6202_v40 = vpop.f32.mrb[43].mxu0  ;;  %v3693_v18 = vsel %vm1177_vm12, %v8832_v29, %v3692_v52 }
 0x213   : > { %v4037_v0 = vpop.permute.xlu1 %4036  ;;  %v6203_v44 = vadd.f32 %v6202_v40, %v6201_v37  ;;  %v3305_v20 = vadd.f32 %v8856_v63, %v6200_v13  ;;  %3767 = vst.msk [vmem:[#allocation3 + $0xd8] sm:$0xff] %vm336_vm0, %v3693_v18 }
 0x214   : > { %4084 = vst.msk [vmem:[#allocation3] sm:$0xff] %vm1909_vm3, %v4037_v0 }
 0x215   : > { %v3466_v47 = vadd.f32 %v8394_v24, %v3305_v20  ;;  %v3308_v39 = vadd.f32 %v8856_v63, %v6203_v44  ;;  %v4855_v41 = vpop.permute.xlu0 %4854 }
 0x216   : > { %v4830_v49 = vld [vmem:[#allocation2 + $0x58] sm:$0xff] }
 0x217   : > { %v4267_v4 = vpop.permute.xlu1 %4266  ;;  %v3587_v3 = vld [vmem:[#allocation2 + $0x58] sm:$0xff]  ;;  %4870 = vrot.lane.b32.xlu0 %v4830_v49, %s6527_s16  ;;  %v8913_v29 = vsel %vm10075_vm15, %v4830_v49, 0  ;;  %3826 = vrot.lane.b32.xlu1 %v4830_v49, %s6526_s15  ;;  %v8918_v61 = vsel %vm10076_vm7, %v4830_v49, 0  ;;  %v4618_v24 = vsel %vm10077_vm13, %v4830_v49, 0  ;;  %v8924_v43 = vsel %vm10079_vm10, %v4830_v49, 0  ;;  %vm10080_vm15 = vmmov %vm10079_vm10 }
 0x218   : > { %4314 = vst.msk [vmem:[#allocation3] sm:$0xff] %vm2140_vm8, %v4267_v4  ;;  %v3532_v36 = vmax.f32 %v3466_v47, 0.0  ;;  %v3469_v23 = vadd.f32 %v8401_v57, %v3308_v39  ;;  %v4468_v46 = vshll.u32 %v8913_v29, 16  ;;  %v5016_v14 = vshll.u32 %v8918_v61, 16  ;;  %vm10082_vm13 = vmmov %vm10074_vm5 }
 0x219   : > { %4355 = vst.msk [vmem:[#allocation3 + $0xe0] sm:$0xff] %vm336_vm0, %v3587_v3  ;;  %v4695_v9 = vshrl.u32 %v4618_v24, 16  ;;  %v3984_v27 = vshll.u32 %v8924_v43, 16  ;;  %v4127_v17 = vsel %vm10074_vm5, %v4830_v49, 0  ;;  %v4698_v38 = vshll.u32 %v4618_v24, 16 }
 0x21a   : > { %v3533_v25 = vmax.f32 %v3469_v23, 0.0  ;;  %v4470_v54 = vrot.slane %v4468_v46, 1  ;;  %v8935_v16 = vrot.slane %v5016_v14, 1  ;;  %v4211_v62 = vshrl.u32 %v4127_v17, 16 }
 0x21b   : > { %v3811_v35 = vpop.permute.xlu1 %3810  ;;  %v8937_v57 = vrot.slane %v4695_v9, 7  ;;  %v8939_v15 = vrot.slane %v3984_v27, 1  ;;  %v4214_v12 = vshll.u32 %v4127_v17, 16  ;;  %v6204_v31 = vpop.f32.mrb[44].mxu0  ;;  %v3604_v20 = vsel %vm1154_vm9, %v3587_v3, 0 }
 0x21c   : > { %3856 = vst.msk [vmem:[#allocation3 + $0x30] sm:$0xff] %vm1422_vm11, %v3811_v35  ;;  %v3554_v34 = vpack.c.bf16 %v3533_v25, %v3532_v36  ;;  %v4471_v51 = vsel %vm1015_vm4, %v4466_v53, %v4470_v54  ;;  %v5019_v42 = vsel %vm1015_vm4, %v5014_v26, %v8935_v16  ;;  %v8945_v52 = vrot.slane %v4211_v62, 7  ;;  %v4529_v13 = vpop.permute.xlu0 %4528  ;;  %v6205_v37 = vpop.f32.mrb[45].mxu0 }
 0x21d   : > { %4544 = vrot.lane.b32.xlu0 %v4471_v51, %s6526_s15  ;;  %5107 = vst.msk [vmem:[#allocation3 + $0xb8] sm:$0xff] %vm336_vm0, %v5019_v42  ;;  %v4700_v11 = vor.u32 %v4698_v38, %v8937_v57  ;;  %v3987_v30 = vsel %vm1015_vm4, %v3982_v19, %v8939_v15  ;;  %v6206_v0 = vadd.f32 %v6205_v37, %v6204_v31  ;;  %v6207_v40 = vpop.f32.mrb[46].mxu0  ;;  %v3695_v47 = vshrl.u32 %v3604_v20, 16  ;;  %v10083_v42 = vld [vmem:[#allocation18_spill] sm:$0xff] }
 0x21e   : > { %4576 = vst.msk [vmem:[#allocation3 + $0x8] sm:$0xff] %vm1422_vm11, %v4529_v13  ;;  %4054 = vrot.lane.b32.xlu1 %v3987_v30, %s6528_s21  ;;  %v4216_v18 = vor.u32 %v4214_v12, %v8945_v52  ;;  %v6208_v22 = vpop.f32.mrb[47].mxu0  ;;  %v3698_v3 = vshll.u32 %v3604_v20, 16  ;;  %v4472_v46 = vshrl.u32 %v8913_v29, 16  ;;  %v5020_v25 = vshrl.u32 %v8918_v61, 16 }
 0x21f   : > { %3570 = vst.msk [vmem:[#allocation2 + $0x60] sm:$0xff] %vm336_vm0, %v3554_v34  ;;  %v4039_v44 = vpop.permute.xlu1 %4038  ;;  %v3313_v39 = vadd.f32 %v8856_v63, %v6206_v0  ;;  %v6209_v49 = vadd.f32 %v6208_v22, %v6207_v40  ;;  %v4701_v53 = vsel %vm1177_vm12, %v8867_v55, %v4700_v11  ;;  %v8966_v24 = vrot.slane %v3695_v47, 7 }
 0x220   : > { %4085 = vst.msk [vmem:[#allocation3 + $0x18] sm:$0xff] %vm1909_vm3, %v4039_v44  ;;  %v4759_v26 = vpop.permute.xlu0 %4758  ;;  %v4217_v4 = vsel %vm1177_vm12, %v8879_v7, %v4216_v18  ;;  %v4474_v19 = vor.u32 %v4472_v46, %v4470_v54  ;;  %v3988_v29 = vshrl.u32 %v8924_v43, 16  ;;  %vm10081_vm7 = vcmp.ne.s16.totalorder %v10072_v1, 0 }
 0x221   : > { %4774 = vrot.lane.b32.xlu0 %v4701_v53, %s6528_s21  ;;  %4806 = vst.msk [vmem:[#allocation3 + $0x8] sm:$0xff] %vm1909_vm3, %v4759_v26  ;;  %v3474_v36 = vadd.f32 %v8392_v32, %v3313_v39  ;;  %v3316_v23 = vadd.f32 %v8856_v63, %v6209_v49  ;;  %v3700_v7 = vor.u32 %v3698_v3, %v8966_v24  ;;  %vm10084_vm10 = vcmp.ne.s16.totalorder %v10083_v42, 0  ;;  %v5116_v49 = vld [vmem:[#allocation3] sm:$0xff] }
 0x222   : > { %4284 = vrot.lane.b32.xlu1 %v4217_v4, %s6527_s16  ;;  %4902 = vst.msk [vmem:[#allocation3 + $0x8] sm:$0xff] %vm2140_vm8, %v4855_v41  ;;  %v5022_v51 = vor.u32 %v5020_v25, %v8935_v16  ;;  %v3990_v16 = vor.u32 %v3988_v29, %v8939_v15  ;;  %vm10085_vm5 = vmmov %vm10084_vm10 }
 0x223   : > { %v4269_v55 = vpop.permute.xlu1 %4268  ;;  %v3477_v14 = vadd.f32 %v8398_v2, %v3316_v23  ;;  %v3534_v32 = vmax.f32 %v3474_v36, 0.0  ;;  %v3701_v41 = vsel %vm1177_vm12, %v8896_v21, %v3700_v7  ;;  %v6514_v7 = vld [vmem:[%s9860_s3 + $0x80] sm:$0xff]  }
 0x224   : > { %4315 = vst.msk [vmem:[#allocation3 + $0x18] sm:$0xff] %vm2140_vm8, %v4269_v55  ;;  %v5139_v9 = vld [vmem:[#allocation3 + $0xb8] sm:$0xff]  ;;  %v8976_v27 = vpop.permute.xlu0 %4856 }
 0x225   : > { %6435 = vmatmul.mubr.msk.bf16.gmra.mrb[76].mxu0 %vm336_vm0, %v5139_v9  ;;  %v3535_v35 = vmax.f32 %v3477_v14, 0.0  ;;  %3768 = vst.msk [vmem:[#allocation3 + $0xf0] sm:$0xff] %vm336_vm0, %v3701_v41 }
 0x226   : > { %v4831_v17 = vld [vmem:[#allocation2 + $0x60] sm:$0xff] }
 0x227   : > { %v3588_v62 = vld [vmem:[#allocation2 + $0x60] sm:$0xff]  ;;  %4872 = vrot.lane.b32.xlu0 %v4831_v17, %s6527_s16  ;;  %v8986_v2 = vsel %vm10080_vm15, %v4831_v17, 0  ;;  %3828 = vrot.lane.b32.xlu1 %v4831_v17, %s6526_s15  ;;  %v8991_v54 = vsel %vm10081_vm7, %v4831_v17, 0  ;;  %v4619_v61 = vsel %vm10082_vm13, %v4831_v17, 0  ;;  %v3813_v43 = vpop.permute.xlu1 %3812  ;;  %v3555_v31 = vpack.c.bf16 %v3535_v35, %v3534_v32  ;;  %v6210_v1 = vpop.f32.mrb[48].mxu0  ;;  %v6515_v32 = vld [vmem:[%s9860_s3 + $0x88] sm:$0xff]   ;;  %vm10089_vm13 = vmmov %vm10085_vm5 }
 0x228   : > { %4356 = vst.msk [vmem:[#allocation3 + $0xf8] sm:$0xff] %vm336_vm0, %v3588_v62  ;;  %v4476_v21 = vshll.u32 %v8986_v2, 16  ;;  %v5024_v38 = vshll.u32 %v8991_v54, 16  ;;  %v4703_v12 = vshrl.u32 %v4619_v61, 16  ;;  %v4706_v34 = vshll.u32 %v4619_v61, 16  ;;  %v6211_v37 = vpop.f32.mrb[49].mxu0 }
 0x229   : > { %3857 = vst.msk [vmem:[#allocation3 + $0x48] sm:$0xff] %vm1422_vm11, %v3813_v43  ;;  %v9003_v50 = vsel %vm10084_vm10, %v4831_v17, 0  ;;  %v4128_v13 = vsel %vm1154_vm9, %v4831_v17, 0  ;;  %v5117_v18 = vld [vmem:[#allocation3 + $0x8] sm:$0xff]  ;;  %v6212_v44 = vadd.f32 %v6211_v37, %v6210_v1  ;;  %v6213_v20 = vpop.f32.mrb[50].mxu0  ;;  %v4480_v55 = vshrl.u32 %v8986_v2, 16 }
 0x22a   : > { %v4478_v11 = vrot.slane %v4476_v21, 1  ;;  %v5026_v30 = vrot.slane %v5024_v38, 1  ;;  %v9007_v0 = vrot.slane %v4703_v12, 7  ;;  %v3992_v40 = vshll.u32 %v9003_v50, 16  ;;  %3571 = vst.msk [vmem:[#allocation2 + $0x68] sm:$0xff] %vm336_vm0, %v3555_v31  ;;  %v4531_v39 = vpop.permute.xlu0 %4530  ;;  %5395 = vmatprep.mubr.bf16.mxu1 %v5117_v18  ;;  %v6214_v53 = vpop.f32.mrb[51].mxu0 }
 0x22b   : > { %v4219_v22 = vshrl.u32 %v4128_v13, 16  ;;  %v4222_v47 = vshll.u32 %v4128_v13, 16  ;;  %4577 = vst.msk [vmem:[#allocation3 + $0x20] sm:$0xff] %vm1422_vm11, %v4531_v39  ;;  %5396 = vmatmul.mubr.bf16.vlgmr.msra.gmra.mrb[32].mxu1 %v5116_v49  ;;  %v6215_v23 = vadd.f32 %v6214_v53, %v6213_v20  ;;  %v3321_v15 = vadd.f32 %v8856_v63, %v6212_v44 }
 0x22c   : > { %v4479_v26 = vsel %vm1015_vm4, %v4474_v19, %v4478_v11  ;;  %v5027_v4 = vsel %vm1015_vm4, %v5022_v51, %v5026_v30  ;;  %v4708_v3 = vor.u32 %v4706_v34, %v9007_v0  ;;  %v9015_v36 = vrot.slane %v3992_v40, 1  ;;  %6456 = vmatpush3.bf16.msra.mxu1 %v6514_v7  ;;  %v10086_v40 = vld [vmem:[#allocation19_spill] sm:$0xff] }
 0x22d   : > { %4546 = vrot.lane.b32.xlu0 %v4479_v26, %s6526_s15  ;;  %5108 = vst.msk [vmem:[#allocation3 + $0xd0] sm:$0xff] %vm336_vm0, %v5027_v4  ;;  %v9021_v46 = vrot.slane %v4219_v22, 7  ;;  %v5028_v9 = vshrl.u32 %v8991_v54, 16  ;;  %v4041_v19 = vpop.permute.xlu1 %4040  ;;  %6455 = vmatprep.subr.bf16.mxu1 %v6515_v32  ;;  %v3482_v17 = vadd.f32 %v8562_v60, %v3321_v15  ;;  %v3324_v25 = vadd.f32 %v8856_v63, %v6215_v23 }
 0x22e   : > { %v3995_v14 = vsel %vm1015_vm4, %v3990_v16, %v9015_v36  ;;  %v4761_v41 = vpop.permute.xlu0 %4760  ;;  %4086 = vst.msk [vmem:[#allocation3 + $0x30] sm:$0xff] %vm1909_vm3, %v4041_v19  ;;  %v3605_v35 = vsel %vm1155_vm2, %v3588_v62, 0  ;;  %v4709_v2 = vsel %vm1177_vm12, %v8937_v57, %v4708_v3  ;;  %v4482_v43 = vor.u32 %v4480_v55, %v4478_v11 }
 0x22f   : > { %4056 = vrot.lane.b32.xlu1 %v3995_v14, %s6528_s21  ;;  %v4224_v29 = vor.u32 %v4222_v47, %v9021_v46  ;;  %4807 = vst.msk [vmem:[#allocation3 + $0x20] sm:$0xff] %vm1909_vm3, %v4761_v41  ;;  %v3703_v54 = vshrl.u32 %v3605_v35, 16  ;;  %v3536_v61 = vmax.f32 %v3482_v17, 0.0  ;;  %v3485_v60 = vadd.f32 %v8585_v45, %v3324_v25 }
 0x230   : > { %4903 = vst.msk [vmem:[#allocation3 + $0x20] sm:$0xff] %vm2140_vm8, %v8976_v27  ;;  %6457 = vmatpush3.bf16.msra.mxu1 %v6515_v32  ;;  %v5030_v38 = vor.u32 %v5028_v9, %v5026_v30  ;;  %v3996_v57 = vshrl.u32 %v9003_v50, 16  ;;  %v3706_v34 = vshll.u32 %v3605_v35, 16  ;;  %vm10087_vm7 = vcmp.ne.s16.totalorder %v10086_v40, 0 }
 0x231   : > { %4776 = vrot.lane.b32.xlu0 %v4709_v2, %s6528_s21  ;;  %v4832_v21 = vld [vmem:[#allocation2 + $0x68] sm:$0xff]  ;;  %v4225_v62 = vsel %vm1177_vm12, %v8945_v52, %v4224_v29  ;;  %v4271_v12 = vpop.permute.xlu1 %4270  ;;  %v3537_v1 = vmax.f32 %v3485_v60, 0.0  ;;  %v9059_v11 = vrot.slane %v3703_v54, 7 }
 0x232   : > { %v3589_v31 = vld [vmem:[#allocation2 + $0x68] sm:$0xff]  ;;  %v4390_v45 = vsel %vm10085_vm5, %v4832_v21, 0  ;;  %v4945_v27 = vsel %vm10080_vm15, %v4832_v21, 0  ;;  %v4620_v51 = vsel %vm1154_vm9, %v4832_v21, 0  ;;  %4316 = vst.msk [vmem:[#allocation3 + $0x30] sm:$0xff] %vm2140_vm8, %v4271_v12  ;;  %v3899_v10 = vsel %vm10087_vm7, %v4832_v21, 0  ;;  %vm10088_vm9 = vmmov %vm10087_vm7 }
 0x233   : > { %4286 = vrot.lane.b32.xlu1 %v4225_v62, %s6527_s16  ;;  %4357 = vst.msk [vmem:[#allocation3 + $0x110] sm:$0xff] %vm336_vm0, %v3589_v31  ;;  %v4484_v50 = vshll.u32 %v4390_v45, 16  ;;  %v5032_v13 = vshll.u32 %v4945_v27, 16  ;;  %v4711_v37 = vshrl.u32 %v4620_v51, 16  ;;  %v3556_v30 = vpack.c.bf16 %v3537_v1, %v3536_v61  ;;  %vm10094_vm5 = vmmov %vm10087_vm7 }
 0x234   : > { %v5142_v52 = vld [vmem:[#allocation3 + $0xd0] sm:$0xff]  ;;  %v4714_v8 = vshll.u32 %v4620_v51, 16  ;;  %v4129_v18 = vsel %vm1155_vm2, %v4832_v21, 0  ;;  %v9067_v44 = vpop.permute.xlu0 %4858  ;;  %v4000_v47 = vshll.u32 %v3899_v10, 16  ;;  %v3998_v49 = vor.u32 %v3996_v57, %v9015_v36  ;;  %v5119_v36 = vld [vmem:[#allocation3 + $0x18] sm:$0xff]  ;;  %v10090_v51 = vld [vmem:[#allocation20_spill] sm:$0xff] }
 0x235   : > { %6438 = vmatprep.mubr.msk.bf16.mxu0 %vm336_vm0, %v5142_v52  ;;  %4874 = vrot.lane.b32.xlu0 %v4832_v21, %s6527_s16  ;;  %v4486_v20 = vrot.slane %v4484_v50, 1  ;;  %v5034_v16 = vrot.slane %v5032_v13, 1  ;;  %v9069_v22 = vrot.slane %v4711_v37, 7  ;;  %v3815_v39 = vpop.permute.xlu1 %3814  ;;  %3572 = vst.msk [vmem:[#allocation2 + $0x70] sm:$0xff] %vm336_vm0, %v3556_v30  ;;  %v4227_v53 = vshrl.u32 %v4129_v18, 16 }
 0x236   : > { %3858 = vst.msk [vmem:[#allocation3 + $0x60] sm:$0xff] %vm1422_vm11, %v3815_v39  ;;  %v4002_v23 = vrot.slane %v4000_v47, 1  ;;  %v4230_v7 = vshll.u32 %v4129_v18, 16  ;;  %v3708_v14 = vor.u32 %v3706_v34, %v9059_v11  ;;  %v4488_v19 = vshrl.u32 %v4390_v45, 16 }
 0x237   : > { %3830 = vrot.lane.b32.xlu1 %v4832_v21, %s6526_s15  ;;  %v4487_v26 = vsel %vm1015_vm4, %v4482_v43, %v4486_v20  ;;  %v5035_v4 = vsel %vm1015_vm4, %v5030_v38, %v5034_v16  ;;  %v4716_v3 = vor.u32 %v4714_v8, %v9069_v22  ;;  %v5120_v15 = vld [vmem:[#allocation3 + $0x20] sm:$0xff]  ;;  %v9080_v55 = vrot.slane %v4227_v53, 7 }
 0x238   : > { %5109 = vst.msk [vmem:[#allocation3 + $0xe8] sm:$0xff] %vm336_vm0, %v5035_v4  ;;  %5403 = vmatprep.mubr.bf16.mxu1 %v5120_v15  ;;  %v4003_v9 = vsel %vm1015_vm4, %v3998_v49, %v4002_v23  ;;  %v9086_v32 = vsel %vm1156_vm6, %v3589_v31, 0  ;;  %v5036_v25 = vshrl.u32 %v4945_v27, 16  ;;  %v3709_v41 = vsel %vm1177_vm12, %v8966_v24, %v3708_v14 }
 0x239   : > { %4548 = vrot.lane.b32.xlu0 %v4487_v26, %s6526_s15  ;;  %5404 = vmatmul.mubr.bf16.gmra.mrb[36].mxu1 %v5119_v36  ;;  %v4232_v17 = vor.u32 %v4230_v7, %v9080_v55  ;;  %v3711_v35 = vshrl.u32 %v9086_v32, 16  ;;  %v4717_v54 = vsel %vm1177_vm12, %v9007_v0, %v4716_v3  ;;  %v4004_v61 = vshrl.u32 %v3899_v10, 16  ;;  %3769 = vst.msk [vmem:[#allocation3 + $0x108] sm:$0xff] %vm336_vm0, %v3709_v41 }
 0x23a   : > { %v4533_v29 = vpop.permute.xlu0 %4532  ;;  %v4490_v21 = vor.u32 %v4488_v19, %v4486_v20  ;;  %v5038_v62 = vor.u32 %v5036_v25, %v5034_v16  ;;  %vm10091_vm10 = vcmp.ne.s16.totalorder %v10090_v51, 0  ;;  %v3714_v36 = vshll.u32 %v9086_v32, 16  ;;  %v10100_v51 = vld [vmem:[#allocation24_spill] sm:$0xff] }
 0x23b   : > { %4058 = vrot.lane.b32.xlu1 %v4003_v9, %s6528_s21  ;;  %v6216_v2 = vpop.f32.mrb[52].mxu0  ;;  %4578 = vst.msk [vmem:[#allocation3 + $0x38] sm:$0xff] %vm1422_vm11, %v4533_v29  ;;  %v4043_v60 = vpop.permute.xlu1 %4042  ;;  %v4233_v12 = vsel %vm1177_vm12, %v9021_v46, %v4232_v17  ;;  %v4006_v0 = vor.u32 %v4004_v61, %v4002_v23  ;;  %v9101_v34 = vrot.slane %v3711_v35, 7 }
 0x23c   : > { %v6217_v43 = vpop.f32.mrb[53].mxu0  ;;  %4087 = vst.msk [vmem:[#allocation3 + $0x48] sm:$0xff] %vm1909_vm3, %v4043_v60  ;;  %v4833_v57 = vld [vmem:[#allocation2 + $0x70] sm:$0xff] }
 0x23d   : > { %4778 = vrot.lane.b32.xlu0 %v4717_v54, %s6528_s21  ;;  %v6218_v24 = vadd.f32 %v6217_v43, %v6216_v2  ;;  %v6219_v38 = vpop.f32.mrb[54].mxu0  ;;  %v9106_v1 = vsel %vm10088_vm9, %v4833_v57, 0  ;;  %v9110_v45 = vsel %vm10089_vm13, %v4833_v57, 0  ;;  %v4621_v27 = vsel %vm1155_vm2, %v4833_v57, 0  ;;  %4358 = vst.msk [vmem:[#allocation3 + $0x128] sm:$0xff] %vm336_vm0, %v4833_v57  ;;  %vm10093_vm2 = vmmov %vm10091_vm10 }
 0x23e   : > { %v6220_v31 = vpop.f32.mrb[55].mxu0  ;;  %v9116_v46 = vsel %vm10091_vm10, %v4833_v57, 0  ;;  %v4763_v52 = vpop.permute.xlu0 %4762  ;;  %v4492_v30 = vshll.u32 %v9106_v1, 16  ;;  %v5040_v42 = vshll.u32 %v9110_v45, 16  ;;  %v4719_v59 = vshrl.u32 %v4621_v27, 16  ;;  %vm10099_vm7 = vmmov %vm10093_vm2 }
 0x23f   : > { %4288 = vrot.lane.b32.xlu1 %v4233_v12, %s6527_s16  ;;  %v3329_v50 = vadd.f32 %v8856_v63, %v6218_v24  ;;  %v6221_v13 = vadd.f32 %v6220_v31, %v6219_v38  ;;  %v5145_v37 = vld [vmem:[#allocation3 + $0xe8] sm:$0xff]  ;;  %4808 = vst.msk [vmem:[#allocation3 + $0x38] sm:$0xff] %vm1909_vm3, %v4763_v52  ;;  %v4273_v8 = vpop.permute.xlu1 %4272  ;;  %v4722_v10 = vshll.u32 %v4621_v27, 16  ;;  %v4008_v18 = vshll.u32 %v9116_v46, 16 }
 0x240   : > { %6439 = vmatmul.mubr.msk.bf16.gmra.mrb[80].mxu0 %vm336_vm0, %v5145_v37  ;;  %v4130_v20 = vsel %vm1156_vm6, %v4833_v57, 0  ;;  %4904 = vst.msk [vmem:[#allocation3 + $0x38] sm:$0xff] %vm2140_vm8, %v9067_v44  ;;  %4317 = vst.msk [vmem:[#allocation3 + $0x48] sm:$0xff] %vm2140_vm8, %v4273_v8  ;;  %v9133_v39 = vrot.slane %v4492_v30, 1  ;;  %v9135_v49 = vrot.slane %v5040_v42, 1  ;;  %v9138_v53 = vrot.slane %v4719_v59, 7 }
 0x241   : > { %4876 = vrot.lane.b32.xlu0 %v4833_v57, %s6527_s16  ;;  %v3490_v16 = vadd.f32 %v8555_v6, %v3329_v50  ;;  %v3332_v47 = vadd.f32 %v8856_v63, %v6221_v13  ;;  %v9140_v26 = vrot.slane %v4008_v18, 1  ;;  %v4235_v4 = vshrl.u32 %v4130_v20, 16 }
 0x242   : > { %v4238_v3 = vshll.u32 %v4130_v20, 16  ;;  %v4861_v23 = vpop.permute.xlu0 %4860  ;;  %v4495_v6 = vsel %vm1015_vm4, %v4490_v21, %v9133_v39  ;;  %v5043_v15 = vsel %vm1015_vm4, %v5038_v62, %v9135_v49  ;;  %v4724_v14 = vor.u32 %v4722_v10, %v9138_v53  ;;  %v5122_v62 = vld [vmem:[#allocation3 + $0x30] sm:$0xff] }
 0x243   : > { %3832 = vrot.lane.b32.xlu1 %v4833_v57, %s6526_s15  ;;  %v3493_v44 = vadd.f32 %v8571_v28, %v3332_v47  ;;  %v3817_v7 = vpop.permute.xlu1 %3816  ;;  %5110 = vst.msk [vmem:[#allocation3 + $0x100] sm:$0xff] %vm336_vm0, %v5043_v15  ;;  %v9151_v9 = vrot.slane %v4235_v4, 7  ;;  %v3538_v28 = vmax.f32 %v3490_v16, 0.0  ;;  %v4011_v17 = vsel %vm1015_vm4, %v4006_v0, %v9140_v26 }
 0x244   : > { %3859 = vst.msk [vmem:[#allocation3 + $0x78] sm:$0xff] %vm1422_vm11, %v3817_v7  ;;  %v3716_v25 = vor.u32 %v3714_v36, %v9101_v34  ;;  %v3607_v41 = vsel %vm1157_vm14, %v4833_v57, 0  ;;  %v4725_v54 = vsel %vm1177_vm12, %v9069_v22, %v4724_v14  ;;  %v4496_v37 = vshrl.u32 %v9106_v1, 16  ;;  %v10095_v36 = vld [vmem:[#allocation21_spill] sm:$0xff] }
 0x245   : > { %4550 = vrot.lane.b32.xlu0 %v4495_v6, %s6526_s15  ;;  %v3539_v19 = vmax.f32 %v3493_v44, 0.0  ;;  %v4240_v32 = vor.u32 %v4238_v3, %v9151_v9  ;;  %v3719_v38 = vshrl.u32 %v3607_v41, 16  ;;  %v3722_v57 = vshll.u32 %v3607_v41, 16 }
 0x246   : > { %v3717_v43 = vsel %vm1177_vm12, %v9059_v11, %v3716_v25  ;;  %v5044_v59 = vshrl.u32 %v9110_v45, 16  ;;  %v4012_v47 = vshrl.u32 %v9116_v46, 16  ;;  %vm10096_vm15 = vcmp.ne.s16.totalorder %v10095_v36, 0 }
 0x247   : > { %4060 = vrot.lane.b32.xlu1 %v4011_v17, %s6528_s21  ;;  %v3557_v35 = vpack.c.bf16 %v3539_v19, %v3538_v28  ;;  %v6222_v2 = vpop.f32.mrb[56].mxu0  ;;  %v4535_v61 = vpop.permute.xlu0 %4534  ;;  %v5123_v60 = vld [vmem:[#allocation3 + $0x38] sm:$0xff]  ;;  %3770 = vst.msk [vmem:[#allocation3 + $0x120] sm:$0xff] %vm336_vm0, %v3717_v43  ;;  %v4241_v0 = vsel %vm1177_vm12, %v9080_v55, %v4240_v32  ;;  %v9173_v31 = vrot.slane %v3719_v38, 7  ;;  %vm10101_vm9 = vcmp.ne.s16.totalorder %v10100_v51, 0 }
 0x248   : > { %v6223_v21 = vpop.f32.mrb[57].mxu0  ;;  %4579 = vst.msk [vmem:[#allocation3 + $0x50] sm:$0xff] %vm1422_vm11, %v4535_v61  ;;  %5411 = vmatprep.mubr.bf16.mxu1 %v5123_v60  ;;  %v4045_v24 = vpop.permute.xlu1 %4044  ;;  %v5125_v61 = vld [vmem:[#allocation3 + $0x48] sm:$0xff]  ;;  %vm10105_vm10 = vmmov %vm10101_vm9  ;;  %v4378_v51 = vld [vmem:[#allocation2 + $0x90] sm:$0x1] }
 0x249   : > { %4780 = vrot.lane.b32.xlu0 %v4725_v54, %s6528_s21  ;;  %3573 = vst.msk [vmem:[#allocation2 + $0x78] sm:$0xff] %vm336_vm0, %v3557_v35  ;;  %v6224_v22 = vadd.f32 %v6223_v21, %v6222_v2  ;;  %v6225_v12 = vpop.f32.mrb[58].mxu0  ;;  %5412 = vmatmul.mubr.bf16.gmra.mrb[40].mxu1 %v5122_v62  ;;  %v3724_v30 = vor.u32 %v3722_v57, %v9173_v31 }
 0x24a   : > { %4088 = vst.msk [vmem:[#allocation3 + $0x60] sm:$0xff] %vm1909_vm3, %v4045_v24  ;;  %v6226_v11 = vpop.f32.mrb[59].mxu0  ;;  %v5148_v50 = vld [vmem:[#allocation3 + $0x100] sm:$0xff]  ;;  %v4014_v2 = vor.u32 %v4012_v47, %v9140_v26 }
 0x24b   : > { %4290 = vrot.lane.b32.xlu1 %v4241_v0, %s6527_s16  ;;  %v6227_v27 = vadd.f32 %v6226_v11, %v6225_v12  ;;  %v3337_v52 = vadd.f32 %v8856_v63, %v6224_v22  ;;  %v4765_v13 = vpop.permute.xlu0 %4764  ;;  %6442 = vmatprep.mubr.msk.bf16.mxu0 %vm336_vm0, %v5148_v50  ;;  %v3725_v10 = vsel %vm1177_vm12, %v9101_v34, %v3724_v30 }
 0x24c   : > { %4809 = vst.msk [vmem:[#allocation3 + $0x50] sm:$0xff] %vm1909_vm3, %v4765_v13  ;;  %v4275_v55 = vpop.permute.xlu1 %4274 }
 0x24d   : > { %v3498_v42 = vadd.f32 %v8718_v56, %v3337_v52  ;;  %v3340_v8 = vadd.f32 %v8856_v63, %v6227_v27  ;;  %4905 = vst.msk [vmem:[#allocation3 + $0x50] sm:$0xff] %vm2140_vm8, %v4861_v23  ;;  %4318 = vst.msk [vmem:[#allocation3 + $0x60] sm:$0xff] %vm2140_vm8, %v4275_v55  ;;  %v4498_v56 = vor.u32 %v4496_v37, %v9133_v39 }
 0x24e   : > { %3771 = vst.msk [vmem:[#allocation3 + $0x138] sm:$0xff] %vm336_vm0, %v3725_v10  ;;  %v5046_v39 = vor.u32 %v5044_v59, %v9135_v49 }
 0x24f   : > { %v3540_v18 = vmax.f32 %v3498_v42, 0.0  ;;  %v3501_v1 = vadd.f32 %v8729_v58, %v3340_v8  ;;  %v9188_v20 = vpop.permute.xlu0 %4862 }
 0x250   : > { %v4834_v16 = vld [vmem:[#allocation2 + $0x78] sm:$0xff]  ;;  %v3819_v4 = vpop.permute.xlu1 %3818 }
 0x251   : > { %v3541_v3 = vmax.f32 %v3501_v1, 0.0  ;;  %4878 = vrot.lane.b32.xlu0 %v4834_v16, %s6527_s16  ;;  %v4392_v45 = vsel %vm10093_vm2, %v4834_v16, 0  ;;  %3834 = vrot.lane.b32.xlu1 %v4834_v16, %s6526_s15  ;;  %v9199_v58 = vsel %vm10094_vm5, %v4834_v16, 0  ;;  %v4622_v34 = vsel %vm1156_vm6, %v4834_v16, 0  ;;  %3860 = vst.msk [vmem:[#allocation3 + $0x90] sm:$0xff] %vm1422_vm11, %v3819_v4  ;;  %vm10098_vm6 = vmmov %vm10096_vm15 }
 0x252   : > { %4359 = vst.msk [vmem:[#allocation3 + $0x140] sm:$0xff] %vm336_vm0, %v4834_v16  ;;  %v4500_v46 = vshll.u32 %v4392_v45, 16  ;;  %v5048_v23 = vshll.u32 %v9199_v58, 16  ;;  %v4727_v44 = vshrl.u32 %v4622_v34, 16  ;;  %v4730_v7 = vshll.u32 %v4622_v34, 16  ;;  %vm10108_vm5 = vmmov %vm10098_vm6 }
 0x253   : > { %v3558_v6 = vpack.c.bf16 %v3541_v3, %v3540_v18  ;;  %v6228_v15 = vpop.f32.mrb[60].mxu0  ;;  %v9209_v40 = vsel %vm10096_vm15, %v4834_v16, 0  ;;  %v4131_v48 = vsel %vm1157_vm14, %v4834_v16, 0  ;;  %v4504_v11 = vshrl.u32 %v4392_v45, 16 }
 0x254   : > { %v6229_v14 = vpop.f32.mrb[61].mxu0  ;;  %v4502_v28 = vrot.slane %v4500_v46, 1  ;;  %v5050_v19 = vrot.slane %v5048_v23, 1  ;;  %v9213_v17 = vrot.slane %v4727_v44, 7  ;;  %v4016_v49 = vshll.u32 %v9209_v40, 16  ;;  %v5126_v32 = vld [vmem:[#allocation3 + $0x50] sm:$0xff] }
 0x255   : > { %v4537_v25 = vpop.permute.xlu0 %4536  ;;  %3574 = vst.msk [vmem:[#allocation2 + $0x80] sm:$0xff] %vm336_vm0, %v3558_v6  ;;  %v6230_v41 = vadd.f32 %v6229_v14, %v6228_v15  ;;  %v6231_v35 = vpop.f32.mrb[62].mxu0  ;;  %v4243_v54 = vshrl.u32 %v4131_v48, 16  ;;  %5419 = vmatprep.mubr.bf16.mxu1 %v5126_v32  ;;  %v4246_v12 = vshll.u32 %v4131_v48, 16  ;;  %v3608_v30 = vsel %vm1158_vm1, %v4834_v16, 0  ;;  %v9277_v48 = vld [vmem:[#allocation2 + $0x90] sm:$0xff] }
 0x256   : > { %4580 = vst.msk [vmem:[#allocation3 + $0x68] sm:$0xff] %vm1422_vm11, %v4537_v25  ;;  %v4047_v60 = vpop.permute.xlu1 %4046  ;;  %v6232_v43 = vpop.f32.mrb[63].mxu0  ;;  %v4503_v21 = vsel %vm1015_vm4, %v4498_v56, %v4502_v28  ;;  %v5051_v62 = vsel %vm1015_vm4, %v5046_v39, %v5050_v19  ;;  %v4732_v24 = vor.u32 %v4730_v7, %v9213_v17  ;;  %v4018_v38 = vrot.slane %v4016_v49, 1  ;;  %5420 = vmatmul.mubr.bf16.gmra.mrb[44].mxu1 %v5125_v61  ;;  %v5128_v61 = vld [vmem:[#allocation3 + $0x60] sm:$0xff] }
 0x257   : > { %4089 = vst.msk [vmem:[#allocation3 + $0x78] sm:$0xff] %vm1909_vm3, %v4047_v60  ;;  %v3345_v57 = vadd.f32 %v8856_v63, %v6230_v41  ;;  %v6233_v26 = vadd.f32 %v6232_v43, %v6231_v35  ;;  %4552 = vrot.lane.b32.xlu0 %v4503_v21, %s6526_s15  ;;  %v9226_v22 = vrot.slane %v4243_v54, 7  ;;  %v5052_v8 = vshrl.u32 %v9199_v58, 16  ;;  %v10102_v43 = vld [vmem:[#allocation27_spill] sm:$0xff] }
 0x258   : > { %5111 = vst.msk [vmem:[#allocation3 + $0x118] sm:$0xff] %vm336_vm0, %v5051_v62  ;;  %v4019_v0 = vsel %vm1015_vm4, %v4014_v2, %v4018_v38  ;;  %v4733_v42 = vsel %vm1177_vm12, %v9138_v53, %v4732_v24  ;;  %v3727_v59 = vshrl.u32 %v3608_v30, 16  ;;  %v4020_v53 = vshrl.u32 %v9209_v40, 16 }
 0x259   : > { %v4767_v27 = vpop.permute.xlu0 %4766  ;;  %v3506_v52 = vadd.f32 %v8708_v33, %v3345_v57  ;;  %v3348_v50 = vadd.f32 %v8856_v63, %v6233_v26  ;;  %4062 = vrot.lane.b32.xlu1 %v4019_v0, %s6528_s21  ;;  %v4248_v13 = vor.u32 %v4246_v12, %v9226_v22  ;;  %v4506_v63 = vor.u32 %v4504_v11, %v4502_v28 }
 0x25a   : > { %4810 = vst.msk [vmem:[#allocation3 + $0x68] sm:$0xff] %vm1909_vm3, %v4767_v27  ;;  %v4277_v37 = vpop.permute.xlu1 %4276  ;;  %v5054_v16 = vor.u32 %v5052_v8, %v5050_v19  ;;  %v9272_v44 = vrot.slane %v3727_v59, 7  ;;  %v4022_v14 = vor.u32 %v4020_v53, %v4018_v38  ;;  %v3730_v25 = vshll.u32 %v3608_v30, 16 }
 0x25b   : > { %4906 = vst.msk [vmem:[#allocation3 + $0x68] sm:$0xff] %vm2140_vm8, %v9188_v20  ;;  %4319 = vst.msk [vmem:[#allocation3 + $0x78] sm:$0xff] %vm2140_vm8, %v4277_v37  ;;  %v3509_v33 = vadd.f32 %v8721_v5, %v3348_v50  ;;  %4782 = vrot.lane.b32.xlu0 %v4733_v42, %s6528_s21  ;;  %v3542_v10 = vmax.f32 %v3506_v52, 0.0  ;;  %v4249_v1 = vsel %vm1177_vm12, %v9151_v9, %v4248_v13 }
 0x25c   : > { %v4835_v18 = vld [vmem:[#allocation2 + $0x80] sm:$0xff]  ;;  %v3732_v62 = vor.u32 %v3730_v25, %v9272_v44 }
 0x25d   : > { %v9247_v56 = vpop.permute.xlu0 %4864  ;;  %v3543_v47 = vmax.f32 %v3509_v33, 0.0  ;;  %4292 = vrot.lane.b32.xlu1 %v4249_v1, %s6527_s16  ;;  %v9252_v5 = vsel %vm10098_vm6, %v4835_v18, 0  ;;  %v9256_v20 = vsel %vm10099_vm7, %v4835_v18, 0  ;;  %v4623_v4 = vsel %vm1157_vm14, %v4835_v18, 0  ;;  %4360 = vst.msk [vmem:[#allocation3 + $0x158] sm:$0xff] %vm336_vm0, %v4835_v18  ;;  %v10106_v1 = vld [vmem:[#allocation23_spill] sm:$0xff] }
 0x25e   : > { %v3821_v9 = vpop.permute.xlu1 %3820  ;;  %v4508_v45 = vshll.u32 %v9252_v5, 16  ;;  %v5056_v58 = vshll.u32 %v9256_v20, 16  ;;  %v4735_v34 = vshrl.u32 %v4623_v4, 16  ;;  %v4738_v46 = vshll.u32 %v4623_v4, 16 }
 0x25f   : > { %v5151_v3 = vld [vmem:[#allocation3 + $0x118] sm:$0xff]  ;;  %3861 = vst.msk [vmem:[#allocation3 + $0xa8] sm:$0xff] %vm1422_vm11, %v3821_v9  ;;  %v3559_v39 = vpack.c.bf16 %v3543_v47, %v3542_v10  ;;  %4880 = vrot.lane.b32.xlu0 %v4835_v18, %s6527_s16  ;;  %v9268_v29 = vsel %vm10101_vm9, %v4835_v18, 0  ;;  %v4132_v23 = vsel %vm1158_vm1, %v4835_v18, 0  ;;  %vm10103_vm14 = vcmp.ne.s16.totalorder %v10102_v43, 0 }
 0x260   : > { %6443 = vmatmul.mubr.msk.bf16.gmra.mrb[84].mxu0 %vm336_vm0, %v5151_v3  ;;  %v4510_v6 = vrot.slane %v4508_v45, 1  ;;  %v5058_v15 = vrot.slane %v5056_v58, 1  ;;  %v9274_v7 = vrot.slane %v4735_v34, 7  ;;  %v4024_v40 = vshll.u32 %v9268_v29, 16  ;;  %vm10104_vm13 = vmmov %vm10103_vm14 }
 0x261   : > { %3575 = vst.msk [vmem:[#allocation2 + $0x88] sm:$0xff] %vm336_vm0, %v3559_v39  ;;  %3836 = vrot.lane.b32.xlu1 %v4835_v18, %s6526_s15  ;;  %v4251_v28 = vshrl.u32 %v4132_v23, 16  ;;  %v4254_v19 = vshll.u32 %v4132_v23, 16  ;;  %v9292_v21 = vsel %vm10103_vm14, %v9277_v48, 0  ;;  %v4512_v38 = vshrl.u32 %v9252_v5, 16  ;;  %vm10109_vm15 = vmmov %vm10104_vm13 }
 0x262   : > { %v5129_v49 = vld [vmem:[#allocation3 + $0x68] sm:$0xff]  ;;  %v4511_v32 = vsel %vm1015_vm4, %v4506_v63, %v4510_v6  ;;  %v5059_v41 = vsel %vm1015_vm4, %v5054_v16, %v5058_v15  ;;  %v4740_v35 = vor.u32 %v4738_v46, %v9274_v7  ;;  %v4026_v2 = vrot.slane %v4024_v40, 1  ;;  %v4539_v54 = vpop.permute.xlu0 %4538 }
 0x263   : > { %5427 = vmatprep.mubr.bf16.mxu1 %v5129_v49  ;;  %4554 = vrot.lane.b32.xlu0 %v4511_v32, %s6526_s15  ;;  %5112 = vst.msk [vmem:[#allocation3 + $0x130] sm:$0xff] %vm336_vm0, %v5059_v41  ;;  %v9286_v60 = vrot.slane %v4251_v28, 7  ;;  %v5060_v57 = vshrl.u32 %v9256_v20, 16  ;;  %v3609_v12 = vsel %vm10104_vm13, %v4835_v18, 0  ;;  %v3733_v11 = vsel %vm1177_vm12, %v9173_v31, %v3732_v62 }
 0x264   : > { %4581 = vst.msk [vmem:[#allocation3 + $0x80] sm:$0xff] %vm1422_vm11, %v4539_v54  ;;  %5428 = vmatmul.mubr.bf16.gmra.mrb[48].mxu1 %v5128_v61  ;;  %v4027_v24 = vsel %vm1015_vm4, %v4022_v14, %v4026_v2  ;;  %v4049_v26 = vpop.permute.xlu1 %4048  ;;  %v3735_v27 = vshrl.u32 %v3609_v12, 16  ;;  %v4741_v52 = vsel %vm1177_vm12, %v9213_v17, %v4740_v35  ;;  %v4028_v13 = vshrl.u32 %v9268_v29, 16  ;;  %v5131_v54 = vld [vmem:[#allocation3 + $0x78] sm:$0xff] }
 0x265   : > { %4064 = vrot.lane.b32.xlu1 %v4027_v24, %s6528_s21  ;;  %v4256_v0 = vor.u32 %v4254_v19, %v9286_v60  ;;  %4090 = vst.msk [vmem:[#allocation3 + $0x90] sm:$0xff] %vm1909_vm3, %v4049_v26  ;;  %v4751_v37 = vshrl.u32 %v9292_v21, 16  ;;  %v3738_v42 = vshll.u32 %v3609_v12, 16  ;;  %v4514_v33 = vor.u32 %v4512_v38, %v4510_v6 }
 0x266   : > { %v4769_v50 = vpop.permute.xlu0 %4768  ;;  %3772 = vst.msk [vmem:[#allocation3 + $0x150] sm:$0xff] %vm336_vm0, %v3733_v11  ;;  %v3737_v30 = vrot.slane %v3735_v27, 7  ;;  %v5062_v17 = vor.u32 %v5060_v57, %v5058_v15  ;;  %v4754_v59 = vshll.u32 %v9292_v21, 16  ;;  %vm10107_vm2 = vcmp.ne.s16.totalorder %v10106_v1, 0  ;;  %v10111_v21 = vld [vmem:[#allocation26_spill] sm:$0xff] }
 0x267   : > { %4784 = vrot.lane.b32.xlu0 %v4741_v52, %s6528_s21  ;;  %4811 = vst.msk [vmem:[#allocation3 + $0x80] sm:$0xff] %vm1909_vm3, %v4769_v50  ;;  %v4257_v31 = vsel %vm1177_vm12, %v9226_v22, %v4256_v0  ;;  %v4030_v36 = vor.u32 %v4028_v13, %v4026_v2  ;;  %v4753_v6 = vrot.slane %v4751_v37, 7 }
 0x268   : > { %v4836_v8 = vld [vmem:[#allocation2 + $0x88] sm:$0xff]  ;;  %4907 = vst.msk [vmem:[#allocation3 + $0x80] sm:$0xff] %vm2140_vm8, %v9247_v56  ;;  %v4279_v10 = vpop.permute.xlu1 %4278  ;;  %v3740_v45 = vor.u32 %v3738_v42, %v3737_v30 }
 0x269   : > { %v3886_v63 = vld [vmem:[#allocation2 + $0x88] sm:$0x1]  ;;  %4294 = vrot.lane.b32.xlu1 %v4257_v31, %s6527_s16  ;;  %v9320_v18 = vsel %vm10105_vm10, %v4836_v8, 0  ;;  %v4949_v22 = vsel %vm10108_vm5, %v4836_v8, 0  ;;  %v4624_v53 = vsel %vm1158_vm1, %v4836_v8, 0  ;;  %4320 = vst.msk [vmem:[#allocation3 + $0x90] sm:$0xff] %vm2140_vm8, %v4279_v10  ;;  %vm10110_vm1 = vmmov %vm10107_vm2  ;;  %v4756_v38 = vor.u32 %v4754_v59, %v4753_v6 }
 0x26a   : > { %v3903_v16 = vsel %vm10107_vm2, %v3886_v63, 0  ;;  %4361 = vst.msk [vmem:[#allocation3 + $0x170] sm:$0xff] %vm336_vm0, %v4836_v8  ;;  %v5154_v56 = vld [vmem:[#allocation3 + $0x130] sm:$0xff]  ;;  %v4516_v47 = vshll.u32 %v9320_v18, 16  ;;  %v5064_v20 = vshll.u32 %v4949_v22, 16  ;;  %v4743_v4 = vshrl.u32 %v4624_v53, 16  ;;  %v4867_v9 = vpop.permute.xlu0 %4866 }
 0x26b   : > { %v4032_v5 = vshll.u32 %v3903_v16, 16  ;;  %6446 = vmatprep.mubr.msk.bf16.mxu0 %vm336_vm0, %v5154_v56  ;;  %4882 = vrot.lane.b32.xlu0 %v4836_v8, %s6527_s16  ;;  %v4746_v3 = vshll.u32 %v4624_v53, 16  ;;  %v4133_v55 = vsel %vm10109_vm15, %v4836_v8, 0  ;;  %v3741_v15 = vsel %vm1177_vm12, %v9272_v44, %v3740_v45 }
 0x26c   : > { %v4518_v58 = vrot.slane %v4516_v47, 1  ;;  %v5066_v46 = vrot.slane %v5064_v20, 1  ;;  %v4745_v39 = vrot.slane %v4743_v4, 7  ;;  %v3823_v29 = vpop.permute.xlu1 %3822  ;;  %v4259_v23 = vshrl.u32 %v4133_v55, 16  ;;  %3773 = vst.msk [vmem:[#allocation3 + $0x168] sm:$0xff] %vm336_vm0, %v3741_v15 }
 0x26d   : > { %v4034_v34 = vrot.slane %v4032_v5, 1  ;;  %3862 = vst.msk [vmem:[#allocation3 + $0xc0] sm:$0xff] %vm1422_vm11, %v3823_v29  ;;  %v5068_v40 = vshrl.u32 %v4949_v22, 16  ;;  %v4262_v41 = vshll.u32 %v4133_v55, 16  ;;  %v4395_v44 = vsel %vm10110_vm1, %v4378_v51, 0 }
 0x26e   : > { %v4519_v14 = vsel %vm1015_vm4, %v4514_v33, %v4518_v58  ;;  %v5067_v19 = vsel %vm1015_vm4, %v5062_v17, %v5066_v46  ;;  %v4748_v49 = vor.u32 %v4746_v3, %v4745_v39  ;;  %v4541_v25 = vpop.permute.xlu0 %4540  ;;  %v4261_v32 = vrot.slane %v4259_v23, 7 }
 0x26f   : > { %v4035_v28 = vsel %vm1015_vm4, %v4030_v36, %v4034_v34  ;;  %4556 = vrot.lane.b32.xlu0 %v4519_v14, %s6526_s15  ;;  %5113 = vst.msk [vmem:[#allocation3 + $0x148] sm:$0xff] %vm336_vm0, %v5067_v19  ;;  %v5132_v35 = vld [vmem:[#allocation3 + $0x80] sm:$0xff]  ;;  %v5070_v2 = vor.u32 %v5068_v40, %v5066_v46  ;;  %v4524_v57 = vshll.u32 %v4395_v44, 16  ;;  %v4520_v0 = vshrl.u32 %v9320_v18, 16 }
 0x270   : > { %4066 = vrot.lane.b32.xlu1 %v4035_v28, %s6528_s21  ;;  %4582 = vst.msk [vmem:[#allocation3 + $0x98] sm:$0xff] %vm1422_vm11, %v4541_v25  ;;  %5435 = vmatprep.mubr.bf16.mxu1 %v5132_v35  ;;  %v4051_v61 = vpop.permute.xlu1 %4050  ;;  %v4264_v43 = vor.u32 %v4262_v41, %v4261_v32  ;;  %v4749_v24 = vsel %vm1177_vm12, %v9274_v7, %v4748_v49  ;;  %v5134_v8 = vld [vmem:[#allocation3 + $0x90] sm:$0xff] }
 0x271   : > { %5436 = vmatmul.mubr.bf16.gmra.mrb[52].mxu1 %v5131_v54  ;;  %4091 = vst.msk [vmem:[#allocation3 + $0xa8] sm:$0xff] %vm1909_vm3, %v4051_v61  ;;  %v5075_v62 = vsel %vm1015_vm4, %v5070_v2, %v10111_v21  ;;  %v4757_v27 = vsel %vm1177_vm12, %v4745_v39, %v4756_v38  ;;  %v4522_v52 = vor.u32 %v4520_v0, %v4518_v58  ;;  %v4526_v50 = vrot.slane %v4524_v57, 1 }
 0x272   : > { %v4771_v26 = vpop.permute.xlu0 %4770  ;;  %5114 = vst.msk [vmem:[#allocation3 + $0x160] sm:$0xff] %vm336_vm0, %v5075_v62  ;;  %v4265_v12 = vsel %vm1177_vm12, %v9286_v60, %v4264_v43 }
 0x273   : > { %4786 = vrot.lane.b32.xlu0 %v4749_v24, %s6528_s21  ;;  %4812 = vst.msk [vmem:[#allocation3 + $0x98] sm:$0xff] %vm1909_vm3, %v4771_v26  ;;  %v4527_v37 = vsel %vm1015_vm4, %v4522_v52, %v4526_v50  ;;  %vm5758_vm4 = vcmask 254976  }
 0x274   : > { %4296 = vrot.lane.b32.xlu1 %v4265_v12, %s6527_s16  ;;  %4908 = vst.msk [vmem:[#allocation3 + $0x98] sm:$0xff] %vm2140_vm8, %v4867_v9  ;;  %v4281_v11 = vpop.permute.xlu1 %4280 }
 0x275   : > { %4321 = vst.msk [vmem:[#allocation3 + $0xa8] sm:$0xff] %vm2140_vm8, %v4281_v11 }
 0x276   : > { %v5157_v7 = vld [vmem:[#allocation3 + $0x148] sm:$0xff]  ;;  %v4869_v13 = vpop.permute.xlu0 %4868 }
 0x277   : > { %6447 = vmatmul.mubr.msk.bf16.gmra.mrb[88].mxu0 %vm336_vm0, %v5157_v7  ;;  %4788 = vrot.lane.b32.xlu0 %v4757_v27, %s6528_s21 }
 0x278   : > { %v3825_v60 = vpop.permute.xlu1 %3824 }
 0x279   : > { %3863 = vst.msk [vmem:[#allocation3 + $0xd8] sm:$0xff] %vm1422_vm11, %v3825_v60 }
 0x27b   : > { %4558 = vrot.lane.b32.xlu0 %v4527_v37, %s6526_s15  ;;  %v5135_v30 = vld [vmem:[#allocation3 + $0x98] sm:$0xff]  ;;  %v4543_v42 = vpop.permute.xlu0 %4542 }
 0x27c   : > { %5443 = vmatprep.mubr.bf16.mxu1 %v5135_v30  ;;  %4583 = vst.msk [vmem:[#allocation3 + $0xb0] sm:$0xff] %vm1422_vm11, %v4543_v42  ;;  %v4053_v31 = vpop.permute.xlu1 %4052  ;;  %v5137_v18 = vld [vmem:[#allocation3 + $0xa8] sm:$0xff] }
 0x27d   : > { %5444 = vmatmul.mubr.bf16.gmra.mrb[56].mxu1 %v5134_v8  ;;  %4092 = vst.msk [vmem:[#allocation3 + $0xc0] sm:$0xff] %vm1909_vm3, %v4053_v31 }
 0x27f   : > { %4884 = vrot.lane.b32.xlu0 %v9277_v48, %s6527_s16  ;;  %v4773_v33 = vpop.permute.xlu0 %4772 }
 0x280   : > { %4813 = vst.msk [vmem:[#allocation3 + $0xb0] sm:$0xff] %vm1909_vm3, %v4773_v33  ;;  %v4283_v63 = vpop.permute.xlu1 %4282 }
 0x281   : > { %4909 = vst.msk [vmem:[#allocation3 + $0xb0] sm:$0xff] %vm2140_vm8, %v4869_v13  ;;  %4322 = vst.msk [vmem:[#allocation3 + $0xc0] sm:$0xff] %vm2140_vm8, %v4283_v63 }
 0x288   : > { %v5138_v10 = vld [vmem:[#allocation3 + $0xb0] sm:$0xff]  ;;  %v5140_v5 = vld [vmem:[#allocation3 + $0xc0] sm:$0xff] }
 0x289   : > { %v4871_v17 = vpop.permute.xlu0 %4870  ;;  %v3827_v59 = vpop.permute.xlu1 %3826  ;;  %5451 = vmatprep.mubr.bf16.mxu1 %v5138_v10 }
 0x28a   : > { %3864 = vst.msk [vmem:[#allocation3 + $0xf0] sm:$0xff] %vm1422_vm11, %v3827_v59  ;;  %5452 = vmatmul.mubr.bf16.gmra.mrb[60].mxu1 %v5137_v18 }
 0x28f   : > { %v4545_v1 = vpop.permute.xlu0 %4544 }
 0x290   : > { %4584 = vst.msk [vmem:[#allocation3 + $0xc8] sm:$0xff] %vm1422_vm11, %v4545_v1  ;;  %v4055_v48 = vpop.permute.xlu1 %4054 }
 0x291   : > { %4093 = vst.msk [vmem:[#allocation3 + $0xd8] sm:$0xff] %vm1909_vm3, %v4055_v48 }
 0x293   : > { %v4775_v16 = vpop.permute.xlu0 %4774 }
 0x294   : > { %4814 = vst.msk [vmem:[#allocation3 + $0xc8] sm:$0xff] %vm1909_vm3, %v4775_v16  ;;  %v4285_v22 = vpop.permute.xlu1 %4284 }
 0x295   : > { %4910 = vst.msk [vmem:[#allocation3 + $0xc8] sm:$0xff] %vm2140_vm8, %v4871_v17  ;;  %4323 = vst.msk [vmem:[#allocation3 + $0xd8] sm:$0xff] %vm2140_vm8, %v4285_v22 }
 0x299   : > { %v4873_v53 = vpop.permute.xlu0 %4872  ;;  %v3829_v56 = vpop.permute.xlu1 %3828 }
 0x29a   : > { %3865 = vst.msk [vmem:[#allocation3 + $0x108] sm:$0xff] %vm1422_vm11, %v3829_v56 }
 0x29c   : > { %v5141_v47 = vld [vmem:[#allocation3 + $0xc8] sm:$0xff]  ;;  %v5143_v29 = vld [vmem:[#allocation3 + $0xd8] sm:$0xff] }
 0x29d   : > { %5459 = vmatprep.mubr.bf16.mxu1 %v5141_v47 }
 0x29e   : > { %5460 = vmatmul.mubr.bf16.gmra.mrb[64].mxu1 %v5140_v5 }
 0x29f   : > { %v4547_v20 = vpop.permute.xlu0 %4546 }
 0x2a0   : > { %4585 = vst.msk [vmem:[#allocation3 + $0xe0] sm:$0xff] %vm1422_vm11, %v4547_v20 }
 0x2a1   : > { %v4057_v4 = vpop.permute.xlu1 %4056 }
 0x2a2   : > { %4094 = vst.msk [vmem:[#allocation3 + $0xf0] sm:$0xff] %vm1909_vm3, %v4057_v4  ;;  %v5160_v4 = vld [vmem:[#allocation3 + $0x160] sm:$0xff] }
 0x2a3   : > { %v4777_v9 = vpop.permute.xlu0 %4776  ;;  %v9385_v36 = vpop.f32.mrb[64].mxu0 }
 0x2a4   : > { %4815 = vst.msk [vmem:[#allocation3 + $0xe0] sm:$0xff] %vm1909_vm3, %v4777_v9  ;;  %v9388_v55 = vpop.f32.mrb[65].mxu0 }
 0x2a5   : > { %4911 = vst.msk [vmem:[#allocation3 + $0xe0] sm:$0xff] %vm2140_vm8, %v4873_v53  ;;  %v4287_v3 = vpop.permute.xlu1 %4286  ;;  %v9391_v45 = vpop.f32.mrb[66].mxu0 }
 0x2a6   : > { %4324 = vst.msk [vmem:[#allocation3 + $0xf0] sm:$0xff] %vm2140_vm8, %v4287_v3  ;;  %v9393_v34 = vpop.f32.mrb[67].mxu0 }
 0x2a7   : > { %v4875_v58 = vpop.permute.xlu0 %4874 }
 0x2a9   : > { %v3831_v46 = vpop.permute.xlu1 %3830 }
 0x2aa   : > { %3866 = vst.msk [vmem:[#allocation3 + $0x120] sm:$0xff] %vm1422_vm11, %v3831_v46 }
 0x2ab   : > { %v4549_v39 = vpop.permute.xlu0 %4548 }
 0x2ac   : > { %4586 = vst.msk [vmem:[#allocation3 + $0xf8] sm:$0xff] %vm1422_vm11, %v4549_v39  ;;  %v5144_v51 = vld [vmem:[#allocation3 + $0xe0] sm:$0xff]  ;;  %v5163_v39 = vld [vmem:[#allocation3 + $0x178] sm:$0xff] }
 0x2ad   : > { %5467 = vmatprep.mubr.bf16.mxu1 %v5144_v51  ;;  %v4059_v23 = vpop.permute.xlu1 %4058  ;;  %v5146_v49 = vld [vmem:[#allocation3 + $0xf0] sm:$0xff] }
 0x2ae   : > { %5468 = vmatmul.mubr.bf16.gmra.mrb[68].mxu1 %v5143_v29  ;;  %4095 = vst.msk [vmem:[#allocation3 + $0x108] sm:$0xff] %vm1909_vm3, %v4059_v23 }
 0x2af   : > { %v4779_v6 = vpop.permute.xlu0 %4778 }
 0x2b0   : > { %4816 = vst.msk [vmem:[#allocation3 + $0xf8] sm:$0xff] %vm1909_vm3, %v4779_v6 }
 0x2b1   : > { %4912 = vst.msk [vmem:[#allocation3 + $0xf8] sm:$0xff] %vm2140_vm8, %v4875_v58  ;;  %v4289_v15 = vpop.permute.xlu1 %4288  ;;  %v9455_v58 = vld [vmem:[%s9861_s4] ss:$0 sm:$0xff] }
 0x2b2   : > { %4325 = vst.msk [vmem:[#allocation3 + $0x108] sm:$0xff] %vm2140_vm8, %v4289_v15 }
 0x2b3   : > { %v4877_v40 = vpop.permute.xlu0 %4876 }
 0x2b5   : > { %v3833_v14 = vpop.permute.xlu1 %3832 }
 0x2b6   : > { %3867 = vst.msk [vmem:[#allocation3 + $0x138] sm:$0xff] %vm1422_vm11, %v3833_v14 }
 0x2b7   : > { %v4551_v28 = vpop.permute.xlu0 %4550 }
 0x2b8   : > { %4587 = vst.msk [vmem:[#allocation3 + $0x110] sm:$0xff] %vm1422_vm11, %v4551_v28  ;;  %v5147_v19 = vld [vmem:[#allocation3 + $0xf8] sm:$0xff] }
 0x2b9   : > { %5475 = vmatprep.mubr.bf16.mxu1 %v5147_v19  ;;  %v4061_v25 = vpop.permute.xlu1 %4060  ;;  %v5149_v62 = vld [vmem:[#allocation3 + $0x108] sm:$0xff] }
 0x2ba   : > { %5476 = vmatmul.mubr.bf16.gmra.mrb[72].mxu1 %v5146_v49  ;;  %4096 = vst.msk [vmem:[#allocation3 + $0x120] sm:$0xff] %vm1909_vm3, %v4061_v25 }
 0x2bb   : > { %v4781_v32 = vpop.permute.xlu0 %4780 }
 0x2bc   : > { %4817 = vst.msk [vmem:[#allocation3 + $0x110] sm:$0xff] %vm1909_vm3, %v4781_v32 }
 0x2bd   : > { %4913 = vst.msk [vmem:[#allocation3 + $0x110] sm:$0xff] %vm2140_vm8, %v4877_v40  ;;  %v4291_v41 = vpop.permute.xlu1 %4290 }
 0x2be   : > { %4326 = vst.msk [vmem:[#allocation3 + $0x120] sm:$0xff] %vm2140_vm8, %v4291_v41  ;;  %v9407_v44 = vpop.f32.mrb[68].mxu0 }
 0x2bf   : > { %v9409_v35 = vpop.f32.mrb[69].mxu0 }
 0x2c0   : > { %v9411_v2 = vpop.f32.mrb[70].mxu0 }
 0x2c1   : > { %v9413_v54 = vpop.f32.mrb[71].mxu0 }
 0x2c3   : > { %v4879_v61 = vpop.permute.xlu0 %4878  ;;  %v3835_v43 = vpop.permute.xlu1 %3834 }
 0x2c4   : > { %v5150_v21 = vld [vmem:[#allocation3 + $0x110] sm:$0xff]  ;;  %3868 = vst.msk [vmem:[#allocation3 + $0x150] sm:$0xff] %vm1422_vm11, %v3835_v43 }
 0x2c5   : > { %5483 = vmatprep.mubr.bf16.mxu1 %v5150_v21  ;;  %v5152_v27 = vld [vmem:[#allocation3 + $0x120] sm:$0xff] }
 0x2c6   : > { %5484 = vmatmul.mubr.bf16.gmra.mrb[76].mxu1 %v5149_v62 }
 0x2c9   : > { %v4553_v24 = vpop.permute.xlu0 %4552 }
 0x2ca   : > { %4588 = vst.msk [vmem:[#allocation3 + $0x128] sm:$0xff] %vm1422_vm11, %v4553_v24 }
 0x2cb   : > { %v4063_v38 = vpop.permute.xlu1 %4062 }
 0x2cc   : > { %4097 = vst.msk [vmem:[#allocation3 + $0x138] sm:$0xff] %vm1909_vm3, %v4063_v38 }
 0x2cd   : > { %v4783_v57 = vpop.permute.xlu0 %4782 }
 0x2ce   : > { %4818 = vst.msk [vmem:[#allocation3 + $0x128] sm:$0xff] %vm1909_vm3, %v4783_v57 }
 0x2cf   : > { %4914 = vst.msk [vmem:[#allocation3 + $0x128] sm:$0xff] %vm2140_vm8, %v4879_v61  ;;  %v4293_v26 = vpop.permute.xlu1 %4292 }
 0x2d0   : > { %4327 = vst.msk [vmem:[#allocation3 + $0x138] sm:$0xff] %vm2140_vm8, %v4293_v26 }
 0x2d1   : > { %v4881_v12 = vpop.permute.xlu0 %4880 }
 0x2d3   : > { %v3837_v0 = vpop.permute.xlu1 %3836 }
 0x2d4   : > { %3869 = vst.msk [vmem:[#allocation3 + $0x168] sm:$0xff] %vm1422_vm11, %v3837_v0 }
 0x2d5   : > { %v4555_v11 = vpop.permute.xlu0 %4554 }
 0x2d6   : > { %4589 = vst.msk [vmem:[#allocation3 + $0x140] sm:$0xff] %vm1422_vm11, %v4555_v11  ;;  %v5153_v7 = vld [vmem:[#allocation3 + $0x128] sm:$0xff] }
 0x2d7   : > { %5491 = vmatprep.mubr.bf16.mxu1 %v5153_v7  ;;  %v4065_v52 = vpop.permute.xlu1 %4064  ;;  %v9423_v50 = vpop.f32.mrb[72].mxu0  ;;  %v5155_v17 = vld [vmem:[#allocation3 + $0x138] sm:$0xff] }
 0x2d8   : > { %5492 = vmatmul.mubr.bf16.gmra.mrb[80].mxu1 %v5152_v27  ;;  %4098 = vst.msk [vmem:[#allocation3 + $0x150] sm:$0xff] %vm1909_vm3, %v4065_v52  ;;  %v9426_v13 = vpop.f32.mrb[73].mxu0 }
 0x2d9   : > { %v4785_v60 = vpop.permute.xlu0 %4784  ;;  %v9428_v37 = vpop.f32.mrb[74].mxu0 }
 0x2da   : > { %4819 = vst.msk [vmem:[#allocation3 + $0x140] sm:$0xff] %vm1909_vm3, %v4785_v60  ;;  %v9431_v30 = vpop.f32.mrb[75].mxu0 }
 0x2db   : > { %4915 = vst.msk [vmem:[#allocation3 + $0x140] sm:$0xff] %vm2140_vm8, %v4881_v12  ;;  %v4295_v42 = vpop.permute.xlu1 %4294 }
 0x2dc   : > { %4328 = vst.msk [vmem:[#allocation3 + $0x150] sm:$0xff] %vm2140_vm8, %v4295_v42 }
 0x2dd   : > { %v4883_v8 = vpop.permute.xlu0 %4882 }
 0x2e1   : > { %v4557_v31 = vpop.permute.xlu0 %4556 }
 0x2e2   : > { %v4067_v33 = vpop.permute.xlu1 %4066  ;;  %4590 = vst.msk [vmem:[#allocation3 + $0x158] sm:$0xff] %vm1422_vm11, %v4557_v31  ;;  %v5156_v63 = vld [vmem:[#allocation3 + $0x140] sm:$0xff] }
 0x2e3   : > { %4099 = vst.msk [vmem:[#allocation3 + $0x168] sm:$0xff] %vm1909_vm3, %v4067_v33  ;;  %5499 = vmatprep.mubr.bf16.mxu1 %v5156_v63  ;;  %v5158_v16 = vld [vmem:[#allocation3 + $0x150] sm:$0xff] }
 0x2e4   : > { %5500 = vmatmul.mubr.bf16.gmra.mrb[84].mxu1 %v5155_v17 }
 0x2e5   : > { %v4787_v59 = vpop.permute.xlu0 %4786 }
 0x2e6   : > { %4820 = vst.msk [vmem:[#allocation3 + $0x158] sm:$0xff] %vm1909_vm3, %v4787_v59  ;;  %v4297_v10 = vpop.permute.xlu1 %4296 }
 0x2e7   : > { %4916 = vst.msk [vmem:[#allocation3 + $0x158] sm:$0xff] %vm2140_vm8, %v4883_v8  ;;  %4329 = vst.msk [vmem:[#allocation3 + $0x168] sm:$0xff] %vm2140_vm8, %v4297_v10 }
 0x2e9   : > { %v4789_v18 = vpop.permute.xlu0 %4788 }
 0x2ed   : > { %v4559_v1 = vpop.permute.xlu0 %4558 }
 0x2ee   : > { %4591 = vst.msk [vmem:[#allocation3 + $0x170] sm:$0xff] %vm1422_vm11, %v4559_v1  ;;  %v5159_v48 = vld [vmem:[#allocation3 + $0x158] sm:$0xff]  ;;  %v5161_v5 = vld [vmem:[#allocation3 + $0x168] sm:$0xff] }
 0x2ef   : > { %4821 = vst.msk [vmem:[#allocation3 + $0x170] sm:$0xff] %vm1909_vm3, %v4789_v18  ;;  %5507 = vmatprep.mubr.bf16.mxu1 %v5159_v48 }
 0x2f0   : > { %5508 = vmatmul.mubr.bf16.gmra.mrb[88].mxu1 %v5158_v16 }
 0x2f1   : > { %v4885_v22 = vpop.permute.xlu0 %4884 }
 0x2f2   : > { %4917 = vst.msk [vmem:[#allocation3 + $0x170] sm:$0xff] %vm2140_vm8, %v4885_v22 }
 0x2f8   : > { %v9443_v53 = vpop.f32.mrb[76].mxu0 }
 0x2f9   : > { %v5162_v56 = vld [vmem:[#allocation3 + $0x170] sm:$0xff]  ;;  %v9445_v47 = vpop.f32.mrb[77].mxu0 }
 0x2fa   : > { %5515 = vmatprep.mubr.bf16.mxu1 %v5162_v56  ;;  %v9447_v20 = vpop.f32.mrb[78].mxu0 }
 0x2fb   : > { %5516 = vmatmul.mubr.bf16.gmra.mrb[92].mxu1 %v5161_v5  ;;  %v9449_v9 = vpop.f32.mrb[79].mxu0 }
 0x2fc   : > { %6450 = vmatprep.mubr.msk.bf16.mxu1 %vm336_vm0, %v5160_v4 }
 0x2fe   : > { %v6268_v3 = vpop.f32.mrb[32].mxu1 }
 0x2ff   : > { %v6269_v46 = vpop.f32.mrb[33].mxu1 }
 0x300   : > { %v6270_v51 = vadd.f32 %v6269_v46, %v6268_v3  ;;  %v6271_v29 = vpop.f32.mrb[34].mxu1 }
 0x301   : > { %v6272_v23 = vpop.f32.mrb[35].mxu1 }
 0x302   : > { %v5398_v6 = vadd.f32 %v6270_v51, %v9455_v58  ;;  %v6273_v15 = vadd.f32 %v6272_v23, %v6271_v29 }
 0x303   : > { %6451 = vmatmul.mubr.msk.bf16.vlgmr.msra.gmra.mrb[96].mxu1 %vm336_vm0, %v5163_v39 }
 0x304   : > { %v9460_v40 = vadd.f32 %v9388_v55, %v5398_v6  ;;  %v5401_v14 = vadd.f32 %v6273_v15, %v9455_v58 }
 0x306   : > { %v9464_v28 = vadd.f32 %v9393_v34, %v5401_v14 }
 0x30c   : > { %v6274_v19 = vpop.f32.mrb[36].mxu1 }
 0x30d   : > { %v6275_v49 = vpop.f32.mrb[37].mxu1 }
 0x30e   : > { %v6276_v25 = vadd.f32 %v6275_v49, %v6274_v19  ;;  %v6277_v32 = vpop.f32.mrb[38].mxu1 }
 0x30f   : > { %v6278_v41 = vpop.f32.mrb[39].mxu1 }
 0x310   : > { %v5406_v61 = vadd.f32 %v6276_v25, %v9455_v58  ;;  %v6279_v43 = vadd.f32 %v6278_v41, %v6277_v32 }
 0x312   : > { %v9468_v21 = vadd.f32 %v9385_v36, %v5406_v61  ;;  %v5409_v62 = vadd.f32 %v6279_v43, %v9455_v58 }
 0x313   : > { %v9471_v55 = vpop.f32.mrb[80].mxu0 }
 0x314   : > { %v9473_v24 = vpop.f32.mrb[81].mxu0  ;;  %v9476_v34 = vadd.f32 %v9391_v45, %v5409_v62 }
 0x315   : > { %v9478_v38 = vpop.f32.mrb[82].mxu0 }
 0x316   : > { %v9480_v57 = vpop.f32.mrb[83].mxu0 }
 0x31c   : > { %v6280_v26 = vpop.f32.mrb[40].mxu1 }
 0x31d   : > { %v6281_v12 = vpop.f32.mrb[41].mxu1 }
 0x31e   : > { %v6282_v0 = vadd.f32 %v6281_v12, %v6280_v26  ;;  %v6283_v11 = vpop.f32.mrb[42].mxu1 }
 0x31f   : > { %v6284_v7 = vpop.f32.mrb[43].mxu1 }
 0x320   : > { %v5414_v36 = vadd.f32 %v6282_v0, %v9455_v58  ;;  %v6285_v27 = vadd.f32 %v6284_v7, %v6283_v11 }
 0x322   : > { %v9484_v52 = vadd.f32 %v9409_v35, %v5414_v36  ;;  %v5417_v60 = vadd.f32 %v6285_v27, %v9455_v58 }
 0x324   : > { %v9488_v45 = vadd.f32 %v9413_v54, %v5417_v60 }
 0x329   : > { %v6286_v42 = vpop.f32.mrb[44].mxu1 }
 0x32a   : > { %v6287_v8 = vpop.f32.mrb[45].mxu1 }
 0x32b   : > { %v6288_v31 = vadd.f32 %v6287_v8, %v6286_v42  ;;  %v6289_v33 = vpop.f32.mrb[46].mxu1 }
 0x32c   : > { %v6290_v63 = vpop.f32.mrb[47].mxu1 }
 0x32d   : > { %v5422_v17 = vadd.f32 %v6288_v31, %v9455_v58  ;;  %v6291_v59 = vadd.f32 %v6290_v63, %v6289_v33 }
 0x32f   : > { %v9492_v10 = vadd.f32 %v9407_v44, %v5422_v17  ;;  %v5425_v18 = vadd.f32 %v6291_v59, %v9455_v58 }
 0x331   : > { %v9496_v35 = vadd.f32 %v9411_v2, %v5425_v18 }
 0x333   : > { %v9498_v1 = vpop.f32.mrb[84].mxu0 }
 0x334   : > { %v9500_v54 = vpop.f32.mrb[85].mxu0 }
 0x335   : > { %v9502_v48 = vpop.f32.mrb[86].mxu0 }
 0x336   : > { %v9504_v16 = vpop.f32.mrb[87].mxu0 }
 0x337   : > { %v6292_v22 = vpop.f32.mrb[48].mxu1 }
 0x338   : > { %v6293_v56 = vpop.f32.mrb[49].mxu1 }
 0x339   : > { %v6294_v5 = vadd.f32 %v6293_v56, %v6292_v22  ;;  %v6295_v4 = vpop.f32.mrb[50].mxu1 }
 0x33a   : > { %v6296_v3 = vpop.f32.mrb[51].mxu1 }
 0x33b   : > { %v5430_v44 = vadd.f32 %v6294_v5, %v9455_v58  ;;  %v6297_v46 = vadd.f32 %v6296_v3, %v6295_v4 }
 0x33d   : > { %v9508_v39 = vadd.f32 %v9426_v13, %v5430_v44  ;;  %v5433_v2 = vadd.f32 %v6297_v46, %v9455_v58 }
 0x33f   : > { %v9512_v51 = vadd.f32 %v9431_v30, %v5433_v2 }
 0x344   : > { %v6298_v29 = vpop.f32.mrb[52].mxu1 }
 0x345   : > { %v6299_v23 = vpop.f32.mrb[53].mxu1 }
 0x346   : > { %v6300_v6 = vadd.f32 %v6299_v23, %v6298_v29  ;;  %v6301_v15 = vpop.f32.mrb[54].mxu1 }
 0x347   : > { %v6302_v14 = vpop.f32.mrb[55].mxu1 }
 0x348   : > { %v5438_v19 = vadd.f32 %v6300_v6, %v9455_v58  ;;  %v6303_v49 = vadd.f32 %v6302_v14, %v6301_v15 }
 0x34a   : > { %v9515_v25 = vpop.f32.mrb[88].mxu0  ;;  %v9518_v32 = vadd.f32 %v9423_v50, %v5438_v19  ;;  %v5441_v13 = vadd.f32 %v6303_v49, %v9455_v58 }
 0x34b   : > { %v9521_v41 = vpop.f32.mrb[89].mxu0 }
 0x34c   : > { %v9523_v61 = vpop.f32.mrb[90].mxu0  ;;  %v9526_v30 = vadd.f32 %v9428_v37, %v5441_v13 }
 0x34d   : > { %v9528_v43 = vpop.f32.mrb[91].mxu0 }
 0x350   : > { %v6304_v62 = vpop.f32.mrb[56].mxu1 }
 0x351   : > { %v6305_v26 = vpop.f32.mrb[57].mxu1 }
 0x352   : > { %v6306_v12 = vadd.f32 %v6305_v26, %v6304_v62  ;;  %v6307_v0 = vpop.f32.mrb[58].mxu1  ;;  %v5688_v26 = vsel %vm336_vm0, %v9468_v21, 0.0 }
 0x353   : > { %v6308_v11 = vpop.f32.mrb[59].mxu1 }
 0x354   : > { %v5446_v7 = vadd.f32 %v6306_v12, %v9455_v58  ;;  %v6309_v50 = vadd.f32 %v6308_v11, %v6307_v0 }
 0x356   : > { %v9532_v36 = vadd.f32 %v9445_v47, %v5446_v7  ;;  %v5449_v27 = vadd.f32 %v6309_v50, %v9455_v58 }
 0x358   : > { %v9536_v60 = vadd.f32 %v9449_v9, %v5449_v27 }
 0x35d   : > { %v6310_v37 = vpop.f32.mrb[60].mxu1 }
 0x35e   : > { %v6311_v42 = vpop.f32.mrb[61].mxu1 }
 0x35f   : > { %v6312_v8 = vadd.f32 %v6311_v42, %v6310_v37  ;;  %v6313_v31 = vpop.f32.mrb[62].mxu1 }
 0x360   : > { %v6314_v33 = vpop.f32.mrb[63].mxu1 }
 0x361   : > { %v5454_v63 = vadd.f32 %v6312_v8, %v9455_v58  ;;  %v6315_v17 = vadd.f32 %v6314_v33, %v6313_v31 }
 0x363   : > { %v9540_v59 = vadd.f32 %v9443_v53, %v5454_v63  ;;  %v5457_v18 = vadd.f32 %v6315_v17, %v9455_v58 }
 0x365   : > { %v9544_v47 = vadd.f32 %v9447_v20, %v5457_v18  ;;  %v5694_v18 = vsel %vm336_vm0, %v9488_v45, 0.0 }
 0x371   : > { %v6316_v22 = vpop.f32.mrb[64].mxu1 }
 0x372   : > { %v6317_v56 = vpop.f32.mrb[65].mxu1 }
 0x373   : > { %v6318_v9 = vadd.f32 %v6317_v56, %v6316_v22  ;;  %v6319_v5 = vpop.f32.mrb[66].mxu1  ;;  %v5696_v56 = vsel %vm336_vm0, %v9492_v10, 0.0 }
 0x374   : > { %v6320_v4 = vpop.f32.mrb[67].mxu1 }
 0x375   : > { %v5462_v3 = vadd.f32 %v6318_v9, %v9455_v58  ;;  %v6321_v44 = vadd.f32 %v6320_v4, %v6319_v5 }
 0x377   : > { %v9548_v46 = vadd.f32 %v9473_v24, %v5462_v3  ;;  %v5465_v2 = vadd.f32 %v6321_v44, %v9455_v58  ;;  %v5686_v24 = vsel %vm336_vm0, %v9464_v28, 0.0 }
 0x379   : > { %v9552_v53 = vadd.f32 %v9480_v57, %v5465_v2  ;;  %v5685_v57 = vsel %vm336_vm0, %v9460_v40, 0.0 }
 0x37a   : > { %v5687_v12 = vadd.f32 %v5686_v24, %v5685_v57  ;;  %v5704_v57 = vsel %vm336_vm0, %v9518_v32, 0.0 }
 0x37c   : > { %v5689_v11 = vadd.f32 %v5688_v26, %v5687_v12 }
 0x381   : > { %v6322_v29 = vpop.f32.mrb[68].mxu1 }
 0x382   : > { %v6323_v23 = vpop.f32.mrb[69].mxu1 }
 0x383   : > { %v6324_v20 = vadd.f32 %v6323_v23, %v6322_v29  ;;  %v6325_v6 = vpop.f32.mrb[70].mxu1  ;;  %v5700_v23 = vsel %vm336_vm0, %v9508_v39, 0.0 }
 0x384   : > { %v6326_v15 = vpop.f32.mrb[71].mxu1 }
 0x385   : > { %v5470_v14 = vadd.f32 %v6324_v20, %v9455_v58  ;;  %v6327_v19 = vadd.f32 %v6326_v15, %v6325_v6 }
 0x387   : > { %v9556_v49 = vadd.f32 %v9471_v55, %v5470_v14  ;;  %v5473_v13 = vadd.f32 %v6327_v19, %v9455_v58  ;;  %v5690_v55 = vsel %vm336_vm0, %v9476_v34, 0.0 }
 0x388   : > { %v5691_v31 = vadd.f32 %v5690_v55, %v5689_v11 }
 0x389   : > { %v9562_v62 = vadd.f32 %v9478_v38, %v5473_v13  ;;  %v5692_v38 = vsel %vm336_vm0, %v9484_v52, 0.0  ;;  %v5702_v13 = vsel %vm336_vm0, %v9512_v51, 0.0 }
 0x38a   : > { %v5693_v17 = vadd.f32 %v5692_v38, %v5691_v31  ;;  %v5712_v38 = vsel %vm336_vm0, %v9540_v59, 0.0 }
 0x38c   : > { %v5695_v9 = vadd.f32 %v5694_v18, %v5693_v17 }
 0x38d   : > { %v6328_v0 = vpop.f32.mrb[72].mxu1 }
 0x38e   : > { %v6329_v7 = vpop.f32.mrb[73].mxu1  ;;  %v5697_v4 = vadd.f32 %v5696_v56, %v5695_v9  ;;  %v5714_v9 = vsel %vm336_vm0, %v9544_v47, 0.0 }
 0x38f   : > { %v6330_v50 = vadd.f32 %v6329_v7, %v6328_v0  ;;  %v6331_v27 = vpop.f32.mrb[74].mxu1  ;;  %v5706_v0 = vsel %vm336_vm0, %v9526_v30, 0.0 }
 0x390   : > { %v6332_v37 = vpop.f32.mrb[75].mxu1 }
 0x391   : > { %v5478_v42 = vadd.f32 %v6330_v50, %v9455_v58  ;;  %v6333_v8 = vadd.f32 %v6332_v37, %v6331_v27  ;;  %v5710_v50 = vsel %vm336_vm0, %v9536_v60, 0.0 }
 0x393   : > { %v9574_v33 = vadd.f32 %v9500_v54, %v5478_v42  ;;  %v5481_v63 = vadd.f32 %v6333_v8, %v9455_v58  ;;  %v5698_v54 = vsel %vm336_vm0, %v9496_v35, 0.0 }
 0x394   : > { %v5699_v6 = vadd.f32 %v5698_v54, %v5697_v4  ;;  %v5716_v4 = vsel %vm336_vm0, %v9548_v46, 0.0 }
 0x395   : > { %v9580_v22 = vadd.f32 %v9504_v16, %v5481_v63 }
 0x396   : > { %v5701_v19 = vadd.f32 %v5700_v23, %v5699_v6 }
 0x398   : > { %v5703_v26 = vadd.f32 %v5702_v13, %v5701_v19 }
 0x399   : > { %v6334_v5 = vpop.f32.mrb[76].mxu1 }
 0x39a   : > { %v6335_v3 = vpop.f32.mrb[77].mxu1  ;;  %v5705_v12 = vadd.f32 %v5704_v57, %v5703_v26  ;;  %v5722_v26 = vsel %vm336_vm0, %v9562_v62, 0.0 }
 0x39b   : > { %v6336_v44 = vadd.f32 %v6335_v3, %v6334_v5  ;;  %v6337_v2 = vpop.f32.mrb[78].mxu1 }
 0x39c   : > { %v6338_v29 = vpop.f32.mrb[79].mxu1  ;;  %v5707_v11 = vadd.f32 %v5706_v0, %v5705_v12  ;;  %v5724_v0 = vsel %vm336_vm0, %v9574_v33, 0.0 }
 0x39d   : > { %v5486_v20 = vadd.f32 %v6336_v44, %v9455_v58  ;;  %v6339_v16 = vadd.f32 %v6338_v29, %v6337_v2  ;;  %v5718_v2 = vsel %vm336_vm0, %v9552_v53, 0.0 }
 0x39f   : > { %v9590_v15 = vadd.f32 %v9498_v1, %v5486_v20  ;;  %v5489_v14 = vadd.f32 %v6339_v16, %v9455_v58  ;;  %v5708_v1 = vsel %vm336_vm0, %v9532_v36, 0.0  ;;  %v5720_v20 = vsel %vm336_vm0, %v9556_v49, 0.0 }
 0x3a0   : > { %v5709_v7 = vadd.f32 %v5708_v1, %v5707_v11 }
 0x3a1   : > { %v9596_v24 = vadd.f32 %v9502_v48, %v5489_v14 }
 0x3a2   : > { %v5711_v8 = vadd.f32 %v5710_v50, %v5709_v7 }
 0x3a4   : > { %v5713_v17 = vadd.f32 %v5712_v38, %v5711_v8  ;;  %v5730_v8 = vsel %vm336_vm0, %v9596_v24, 0.0 }
 0x3a6   : > { %v5715_v3 = vadd.f32 %v5714_v9, %v5713_v17 }
 0x3a8   : > { %v5717_v54 = vadd.f32 %v5716_v4, %v5715_v3 }
 0x3aa   : > { %v5719_v6 = vadd.f32 %v5718_v2, %v5717_v54 }
 0x3ab   : > { %v6340_v55 = vpop.f32.mrb[80].mxu1 }
 0x3ac   : > { %v6341_v27 = vpop.f32.mrb[81].mxu1  ;;  %v5721_v19 = vadd.f32 %v5720_v20, %v5719_v6 }
 0x3ad   : > { %v6342_v48 = vadd.f32 %v6341_v27, %v6340_v55  ;;  %v6343_v37 = vpop.f32.mrb[82].mxu1  ;;  %v5726_v55 = vsel %vm336_vm0, %v9580_v22, 0.0 }
 0x3ae   : > { %v6344_v42 = vpop.f32.mrb[83].mxu1  ;;  %v5723_v1 = vadd.f32 %v5722_v26, %v5721_v19 }
 0x3af   : > { %v5494_v31 = vadd.f32 %v6342_v48, %v9455_v58  ;;  %v6345_v63 = vadd.f32 %v6344_v42, %v6343_v37  ;;  %v5728_v48 = vsel %vm336_vm0, %v9590_v15, 0.0 }
 0x3b0   : > { %v5725_v11 = vadd.f32 %v5724_v0, %v5723_v1 }
 0x3b1   : > { %v9610_v18 = vadd.f32 %v9521_v41, %v5494_v31  ;;  %v5497_v56 = vadd.f32 %v6345_v63, %v9455_v58 }
 0x3b2   : > { %v5727_v38 = vadd.f32 %v5726_v55, %v5725_v11 }
 0x3b3   : > { %v9616_v5 = vadd.f32 %v9528_v43, %v5497_v56  ;;  %v5732_v31 = vsel %vm336_vm0, %v9610_v18, 0.0 }
 0x3b5   : > { %v5734_v4 = vsel %vm336_vm0, %v9616_v5, 0.0 }
 0x3b7   : > { %v6346_v44 = vpop.f32.mrb[84].mxu1 }
 0x3b8   : > { %v6347_v29 = vpop.f32.mrb[85].mxu1 }
 0x3b9   : > { %v6348_v41 = vadd.f32 %v6347_v29, %v6346_v44  ;;  %v6349_v23 = vpop.f32.mrb[86].mxu1 }
 0x3ba   : > { %v6350_v16 = vpop.f32.mrb[87].mxu1 }
 0x3bb   : > { %v5502_v43 = vadd.f32 %v6348_v41, %v9455_v58  ;;  %v6351_v14 = vadd.f32 %v6350_v16, %v6349_v23 }
 0x3bd   : > { %v9626_v13 = vadd.f32 %v9515_v25, %v5502_v43  ;;  %v5505_v57 = vadd.f32 %v6351_v14, %v9455_v58 }
 0x3bf   : > { %v9632_v12 = vadd.f32 %v9523_v61, %v5505_v57  ;;  %v5729_v61 = vadd.f32 %v5728_v48, %v5727_v38  ;;  %v5736_v2 = vsel %vm336_vm0, %v9626_v13, 0.0 }
 0x3c1   : > { %v5731_v63 = vadd.f32 %v5730_v8, %v5729_v61  ;;  %v5738_v43 = vsel %vm336_vm0, %v9632_v12, 0.0 }
 0x3c3   : > { %v6352_v7 = vpop.f32.mrb[88].mxu1  ;;  %v5733_v56 = vadd.f32 %v5732_v31, %v5731_v63 }
 0x3c4   : > { %v6353_v50 = vpop.f32.mrb[89].mxu1 }
 0x3c5   : > { %v6354_v25 = vadd.f32 %v6353_v50, %v6352_v7  ;;  %v6355_v27 = vpop.f32.mrb[90].mxu1  ;;  %v5735_v41 = vadd.f32 %v5734_v4, %v5733_v56  ;;  %v5756_v4 = vld [vmem:[%s9862_s5] sm:$0x3] }
 0x3c6   : > { %v6356_v37 = vpop.f32.mrb[91].mxu1 }
 0x3c7   : > { %v6357_v42 = vadd.f32 %v6356_v37, %v6355_v27  ;;  %v5737_v20 = vadd.f32 %v5736_v2, %v5735_v41  ;;  %v5510_v6 = vadd.f32 %v6354_v25, %v9455_v58  ;;  %v5762_v2 = vld [vmem:[%s9863_s6] sm:$0x3] }
 0x3c9   : > { %v5513_v1 = vadd.f32 %v6357_v42, %v9455_v58  ;;  %v5739_v11 = vadd.f32 %v5738_v43, %v5737_v20  ;;  %v5765_v20 = vld [vmem:[%s9864_s7] sm:$0x3] }
 0x3ce   : > { %v6358_v17 = vpop.f32.mrb[92].mxu1 }
 0x3cf   : > { %v6359_v9 = vpop.f32.mrb[93].mxu1 }
 0x3d0   : > { %v6360_v3 = vadd.f32 %v6359_v9, %v6358_v17  ;;  %v6361_v54 = vpop.f32.mrb[94].mxu1 }
 0x3d1   : > { %v6362_v44 = vpop.f32.mrb[95].mxu1 }
 0x3d2   : > { %v6363_v29 = vadd.f32 %v6362_v44, %v6361_v54  ;;  %v5518_v23 = vadd.f32 %v6360_v3, %v9455_v58 }
 0x3d4   : > { %v5521_v57 = vadd.f32 %v6363_v29, %v9455_v58 }
 0x3d6   : > { %v6452_v16 = vpop.f32.mrb[96].mxu1 }
 0x3d7   : > { %v9652_v14 = vadd.f32 %v6452_v16, %v5518_v23  ;;  %v5670_v19 = vpop.f32.mrb[97].mxu1 }
 0x3d8   : > { %v9655_v26 = vadd.f32 %v5670_v19, %v5510_v6  ;;  %v6453_v0 = vpop.f32.mrb[98].mxu1 }
 0x3d9   : > { %v9658_v7 = vadd.f32 %v6453_v0, %v5521_v57  ;;  %v5673_v55 = vpop.f32.mrb[99].mxu1  ;;  %v5744_v38 = vsel %vm336_vm0, %v9652_v14, 0.0 }
 0x3da   : > { %v5740_v50 = vsel %vm336_vm0, %v9655_v26, 0.0  ;;  %v9662_v25 = vadd.f32 %v5673_v55, %v5513_v1  ;;  %v5779_v55 = vld [vmem:[%s9865_s8] sm:$0x1] }
 0x3db   : > { %v5741_v27 = vadd.f32 %v5740_v50, %v5739_v11  ;;  %v5746_v58 = vsel %vm336_vm0, %v9658_v7, 0.0 }
 0x3dc   : > { %v5742_v48 = vsel %vm336_vm0, %v9662_v25, 0.0 }
 0x3dd   : > { %v5743_v37 = vadd.f32 %v5742_v48, %v5741_v27 }
 0x3df   : > { %v5745_v61 = vadd.f32 %v5744_v38, %v5743_v37 }
 0x3e1   : > { %v5747_v42 = vadd.f32 %v5746_v58, %v5745_v61  ;;  %v10112_v61 = vld [vmem:[#allocation4_spill] sm:$0xff] }
 0x3e2   : > { %v5789_v58 = vsub.s32 0, %v10112_v61  ;;  %v5843_v61 = vld [vmem:[%s6614_s14 + $0xa0] sm:$0xff] }
 0x3e3   : > { %v5748_v8 = vrot.slane %v5747_v42, 4 }
 0x3e5   : > { %v5749_v31 = vadd.f32 %v5748_v8, %v5747_v42 }
 0x3e7   : > { %v5750_v63 = vrot.slane %v5749_v31, 2 }
 0x3e9   : > { %v5751_v17 = vadd.f32 %v5750_v63, %v5749_v31 }
 0x3eb   : > { %v5752_v56 = vrot.slane %v5751_v17, 1 }
 0x3ed   : > { %v5753_v9 = vadd.f32 %v5752_v56, %v5751_v17 }
 0x3ef   : > { %v5755_v3 = vmul.f32 0.00390625, %v5753_v9 }
 0x3f1   : > { %v5757_v54 = vmul.f32 %v5756_v4, %v5755_v3 }
 0x3f3   : > { %v5759_v44 = vsel %vm5758_vm4, %v5757_v54, 0.0 }
 0x3f4   : > { %5760 = vadd.xlane.f32.xlu0 %v5759_v44  ;;  %v5823_v44 = vld [vmem:[%s6614_s14] sm:$0xff] }
 0x481   : > { %v5761_v29 = vpop.xlane.xlu0 %5760 }
 0x482   : > { %v5763_v41 = vadd.f32 %v5762_v2, %v5761_v29  ;;  %v5826_v2 = vld [vmem:[%s6614_s14 + $0x18] sm:$0xff] }
 0x484   : > { %v5764_v23 = vmax.f32 %v5763_v41, 0.0  ;;  %v5830_v41 = vld [vmem:[%s6614_s14 + $0x38] sm:$0xff] }
 0x486   : > { %5768 = vperm.xlu1 %6471, %v5764_v23  }
 0x505   : > { %v5769_v16 = vpop.permute.xlu1 %5768 }
 0x506   : > { %v5771_v6 = vmul.f32 %v5769_v16, %v5765_v20 }
 0x508   : > { %v5772_v43 = vsel %vm5758_vm4, %v5771_v6, 0.0 }
 0x509   : > { %v5773_v19 = vrot.slane %v5772_v43, 4 }
 0x50b   : > { %v5774_v57 = vadd.f32 %v5773_v19, %v5772_v43 }
 0x50d   : > { %v5775_v0 = vrot.slane %v5774_v57, 2 }
 0x50f   : > { %v5776_v1 = vadd.f32 %v5775_v0, %v5774_v57  ;;  %v5836_v57 = vld [vmem:[%s6614_s14 + $0x68] sm:$0xff] }
 0x511   : > { %v5777_v11 = vrot.slane %v5776_v1, 1 }
 0x513   : > { %v5778_v50 = vadd.f32 %v5777_v11, %v5776_v1  ;;  %v5839_v11 = vld [vmem:[%s6614_s14 + $0x80] sm:$0xff] }
 0x515   : > { %v5780_v27 = vadd.f32 %v5779_v55, %v5778_v50 }
 0x517   : > { %v6117_v48 = vmul.f32 -1.442695, %v5780_v27  ;;  %v5842_v27 = vld [vmem:[%s6614_s14 + $0x98] sm:$0xff] }
 0x519   : > { %6509 = vpow2.f32 %v6117_v48 }
 0x523   : > { %v6510_v37 = vpop.eup %6509 }
 0x524   : > { %v5784_v38 = vadd.f32 1.0, %v6510_v37 }
 0x526   : > { %6511 = vrcp.f32 %v5784_v38 }
 0x530   : > { %v6512_v42 = vpop.eup %6511 }
 0x531   : > { %v5790_v8 = vrot.slane %v6512_v42, %v5789_v58 }
 0x533   : > { %v5791_v31 = vmul.f32 %v5790_v8, %v9460_v40  ;;  %v5792_v63 = vmul.f32 %v5790_v8, %v9464_v28  ;;  %v5793_v17 = vmul.f32 %v5790_v8, %v9468_v21  ;;  %v5794_v56 = vmul.f32 %v5790_v8, %v9476_v34 }
 0x534   : > { %v5795_v9 = vmul.f32 %v5790_v8, %v9484_v52  ;;  %v5796_v4 = vmul.f32 %v5790_v8, %v9488_v45  ;;  %v5797_v3 = vmul.f32 %v5790_v8, %v9492_v10  ;;  %v5798_v54 = vmul.f32 %v5790_v8, %v9496_v35  ;;  %v5824_v52 = vld [vmem:[%s6614_s14 + $0x8] sm:$0xff]  ;;  %v5825_v45 = vld [vmem:[%s6614_s14 + $0x10] sm:$0xff] }
 0x535   : > { %v5799_v40 = vmul.f32 %v5790_v8, %v9508_v39  ;;  %v5800_v28 = vmul.f32 %v5790_v8, %v9512_v51  ;;  %v5801_v21 = vmul.f32 %v5790_v8, %v9518_v32  ;;  %v5802_v34 = vmul.f32 %v5790_v8, %v9526_v30  ;;  %v5827_v51 = vld [vmem:[%s6614_s14 + $0x20] sm:$0xff]  ;;  %v5828_v32 = vld [vmem:[%s6614_s14 + $0x28] sm:$0xff]  ;;  %v5829_v30 = vld [vmem:[%s6614_s14 + $0x30] sm:$0xff] }
 0x536   : > { %v5803_v10 = vmul.f32 %v5790_v8, %v9532_v36  ;;  %v5804_v35 = vmul.f32 %v5790_v8, %v9536_v60  ;;  %v5805_v29 = vmul.f32 %v5790_v8, %v9540_v59  ;;  %v5806_v39 = vmul.f32 %v5790_v8, %v9544_v47  ;;  %v5831_v60 = vld [vmem:[%s6614_s14 + $0x40] sm:$0xff]  ;;  %v5832_v59 = vld [vmem:[%s6614_s14 + $0x48] sm:$0xff]  ;;  %v5833_v47 = vld [vmem:[%s6614_s14 + $0x50] sm:$0xff] }
 0x537   : > { %v5807_v23 = vmul.f32 %v5790_v8, %v9548_v46  ;;  %v5808_v20 = vmul.f32 %v5790_v8, %v9552_v53  ;;  %v5809_v16 = vmul.f32 %v5790_v8, %v9556_v49  ;;  %v5810_v36 = vmul.f32 %v5790_v8, %v9562_v62  ;;  %v5834_v53 = vld [vmem:[%s6614_s14 + $0x58] sm:$0xff]  ;;  %v5835_v49 = vld [vmem:[%s6614_s14 + $0x60] sm:$0xff] }
 0x538   : > { %v5811_v6 = vmul.f32 %v5790_v8, %v9574_v33  ;;  %v5812_v43 = vmul.f32 %v5790_v8, %v9580_v22  ;;  %v5813_v19 = vmul.f32 %v5790_v8, %v9590_v15  ;;  %v5814_v46 = vmul.f32 %v5790_v8, %v9596_v24  ;;  %v5837_v22 = vld [vmem:[%s6614_s14 + $0x70] sm:$0xff]  ;;  %v5838_v15 = vld [vmem:[%s6614_s14 + $0x78] sm:$0xff] }
 0x539   : > { %v5815_v62 = vmul.f32 %v5790_v8, %v9610_v18  ;;  %v5816_v0 = vmul.f32 %v5790_v8, %v9616_v5  ;;  %v5817_v1 = vmul.f32 %v5790_v8, %v9626_v13  ;;  %v5818_v33 = vmul.f32 %v5790_v8, %v9632_v12  ;;  %v5840_v5 = vld [vmem:[%s6614_s14 + $0x88] sm:$0xff]  ;;  %v5841_v13 = vld [vmem:[%s6614_s14 + $0x90] sm:$0xff] }
 0x53a   : > { %v5819_v24 = vmul.f32 %v5790_v8, %v9655_v26  ;;  %v5820_v55 = vmul.f32 %v5790_v8, %v9662_v25  ;;  %v5821_v50 = vmul.f32 %v5790_v8, %v9652_v14  ;;  %v5822_v18 = vmul.f32 %v5790_v8, %v9658_v7  ;;  %v5844_v26 = vld [vmem:[%s6614_s14 + $0xa8] sm:$0xff]  ;;  %v5845_v25 = vld [vmem:[%s6614_s14 + $0xb0] sm:$0xff]  ;;  %v5846_v8 = vld [vmem:[%s6614_s14 + $0xb8] sm:$0xff] }
 0x53b   : > { %v5855_v12 = vadd.f32 %v5823_v44, %v5791_v31  ;;  %v5856_v48 = vadd.f32 %v5824_v52, %v5792_v63  ;;  %v5857_v37 = vadd.f32 %v5825_v45, %v5793_v17  ;;  %v5858_v38 = vadd.f32 %v5826_v2, %v5794_v56  ;;  %v5847_v31 = vld [vmem:[%s6614_s14 + $0xc0] sm:$0xff]  ;;  %v5848_v44 = vld [vmem:[%s6614_s14 + $0xc8] sm:$0xff]  ;;  %v5849_v56 = vld [vmem:[%s6614_s14 + $0xd0] sm:$0xff] }
 0x53c   : > { %v5859_v58 = vadd.f32 %v5827_v51, %v5795_v9  ;;  %v5860_v14 = vadd.f32 %v5828_v32, %v5796_v4  ;;  %v5861_v42 = vadd.f32 %v5829_v30, %v5797_v3  ;;  %v5862_v7 = vadd.f32 %v5830_v41, %v5798_v54  ;;  %v5850_v2 = vld [vmem:[%s6614_s14 + $0xd8] sm:$0xff]  ;;  %v5851_v9 = vld [vmem:[%s6614_s14 + $0xe0] sm:$0xff]  ;;  %v5852_v30 = vld [vmem:[%s6614_s14 + $0xe8] sm:$0xff] }
 0x53d   : > { %v5863_v52 = vadd.f32 %v5831_v60, %v5799_v40  ;;  %v5864_v63 = vadd.f32 %v5832_v59, %v5800_v28  ;;  %v5865_v17 = vadd.f32 %v5833_v47, %v5801_v21  ;;  %v5866_v45 = vadd.f32 %v5834_v53, %v5802_v34  ;;  %v5853_v41 = vld [vmem:[%s6614_s14 + $0xf0] sm:$0xff]  ;;  %v5854_v54 = vld [vmem:[%s6614_s14 + $0xf8] sm:$0xff] }
 0x53e   : > { %v5867_v51 = vadd.f32 %v5835_v49, %v5803_v10  ;;  %v5868_v4 = vadd.f32 %v5836_v57, %v5804_v35  ;;  %v5869_v32 = vadd.f32 %v5837_v22, %v5805_v29  ;;  %v5870_v3 = vadd.f32 %v5838_v15, %v5806_v39 }
 0x53f   : > { %v5871_v40 = vadd.f32 %v5839_v11, %v5807_v23  ;;  %v5872_v60 = vadd.f32 %v5840_v5, %v5808_v20  ;;  %v5873_v28 = vadd.f32 %v5841_v13, %v5809_v16  ;;  %v5874_v59 = vadd.f32 %v5842_v27, %v5810_v36 }
 0x540   : > { %v9747_v21 = vadd.f32 %v5843_v61, %v5811_v6  ;;  %v9749_v47 = vadd.f32 %v5844_v26, %v5812_v43  ;;  %v9751_v34 = vadd.f32 %v5845_v25, %v5813_v19  ;;  %v9753_v53 = vadd.f32 %v5846_v8, %v5814_v46 }
 0x541   : > { %v9755_v10 = vadd.f32 %v5847_v31, %v5815_v62  ;;  %v9757_v35 = vadd.f32 %v5848_v44, %v5816_v0  ;;  %v9759_v29 = vadd.f32 %v5849_v56, %v5817_v1  ;;  %v9761_v39 = vadd.f32 %v5850_v2, %v5818_v33 }
 0x542   : > { %v9770_v23 = vadd.f32 %v5851_v9, %v5819_v24  ;;  %v9772_v20 = vadd.f32 %v5852_v30, %v5820_v55  ;;  %v9774_v16 = vadd.f32 %v5853_v41, %v5821_v50  ;;  %v9776_v36 = vadd.f32 %v5854_v54, %v5822_v18 }
 0x543   : > { %v5887_v6 = vmax.f32 %v5855_v12, 0.0  ;;  %v5888_v43 = vmax.f32 %v5856_v48, 0.0  ;;  %v5889_v19 = vmax.f32 %v5857_v37, 0.0  ;;  %v5890_v46 = vmax.f32 %v5858_v38, 0.0 }
 0x544   : > { %v5891_v49 = vmax.f32 %v5859_v58, 0.0  ;;  %v5892_v57 = vmax.f32 %v5860_v14, 0.0  ;;  %v5893_v62 = vmax.f32 %v5861_v42, 0.0  ;;  %v5894_v0 = vmax.f32 %v5862_v7, 0.0 }
 0x545   : > { %v5895_v1 = vmax.f32 %v5863_v52, 0.0  ;;  %v5896_v33 = vmax.f32 %v5864_v63, 0.0  ;;  %v5897_v22 = vmax.f32 %v5865_v17, 0.0  ;;  %v5898_v15 = vmax.f32 %v5866_v45, 0.0  ;;  %5919 = vst.msk [vmem:[%s9768_s22] sm:$0xff] %vm336_vm0, %v5887_v6  ;;  %5920 = vst.msk [vmem:[%s9768_s22 + $0x8] sm:$0xff] %vm336_vm0, %v5888_v43 }
 0x546   : > { %5921 = vst.msk [vmem:[%s9768_s22 + $0x10] sm:$0xff] %vm336_vm0, %v5889_v19  ;;  %5922 = vst.msk [vmem:[%s9768_s22 + $0x18] sm:$0xff] %vm336_vm0, %v5890_v46  ;;  %v5899_v11 = vmax.f32 %v5867_v51, 0.0  ;;  %v5900_v24 = vmax.f32 %v5868_v4, 0.0  ;;  %v5901_v55 = vmax.f32 %v5869_v32, 0.0  ;;  %v5902_v50 = vmax.f32 %v5870_v3, 0.0 }
 0x547   : > { %5923 = vst.msk [vmem:[%s9768_s22 + $0x20] sm:$0xff] %vm336_vm0, %v5891_v49  ;;  %5924 = vst.msk [vmem:[%s9768_s22 + $0x28] sm:$0xff] %vm336_vm0, %v5892_v57  ;;  %v5903_v18 = vmax.f32 %v5871_v40, 0.0  ;;  %v5904_v5 = vmax.f32 %v5872_v60, 0.0  ;;  %v5905_v13 = vmax.f32 %v5873_v28, 0.0  ;;  %v5906_v27 = vmax.f32 %v5874_v59, 0.0 }
 0x548   : > { %5925 = vst.msk [vmem:[%s9768_s22 + $0x30] sm:$0xff] %vm336_vm0, %v5893_v62  ;;  %5926 = vst.msk [vmem:[%s9768_s22 + $0x38] sm:$0xff] %vm336_vm0, %v5894_v0  ;;  %v5907_v12 = vmax.f32 %v9747_v21, 0.0  ;;  %v5908_v48 = vmax.f32 %v9749_v47, 0.0  ;;  %v5909_v37 = vmax.f32 %v9751_v34, 0.0  ;;  %v5910_v38 = vmax.f32 %v9753_v53, 0.0 }
 0x549   : > { %5927 = vst.msk [vmem:[%s9768_s22 + $0x40] sm:$0xff] %vm336_vm0, %v5895_v1  ;;  %5928 = vst.msk [vmem:[%s9768_s22 + $0x48] sm:$0xff] %vm336_vm0, %v5896_v33  ;;  %v5911_v61 = vmax.f32 %v9755_v10, 0.0  ;;  %v5912_v26 = vmax.f32 %v9757_v35, 0.0  ;;  %v5913_v25 = vmax.f32 %v9759_v29, 0.0  ;;  %v5914_v58 = vmax.f32 %v9761_v39, 0.0 }
 0x54a   : > { %5929 = vst.msk [vmem:[%s9768_s22 + $0x50] sm:$0xff] %vm336_vm0, %v5897_v22  ;;  %5930 = vst.msk [vmem:[%s9768_s22 + $0x58] sm:$0xff] %vm336_vm0, %v5898_v15  ;;  %v5915_v14 = vmax.f32 %v9770_v23, 0.0  ;;  %v5916_v42 = vmax.f32 %v9772_v20, 0.0  ;;  %v5917_v7 = vmax.f32 %v9774_v16, 0.0  ;;  %v5918_v8 = vmax.f32 %v9776_v36, 0.0 }
 0x54b   : > { %5931 = vst.msk [vmem:[%s9768_s22 + $0x60] sm:$0xff] %vm336_vm0, %v5899_v11  ;;  %5932 = vst.msk [vmem:[%s9768_s22 + $0x68] sm:$0xff] %vm336_vm0, %v5900_v24 }
 0x54c   : > { %5933 = vst.msk [vmem:[%s9768_s22 + $0x70] sm:$0xff] %vm336_vm0, %v5901_v55  ;;  %5934 = vst.msk [vmem:[%s9768_s22 + $0x78] sm:$0xff] %vm336_vm0, %v5902_v50 }
 0x54d   : > { %5935 = vst.msk [vmem:[%s9768_s22 + $0x80] sm:$0xff] %vm336_vm0, %v5903_v18  ;;  %5936 = vst.msk [vmem:[%s9768_s22 + $0x88] sm:$0xff] %vm336_vm0, %v5904_v5 }
 0x54e   : > { %5937 = vst.msk [vmem:[%s9768_s22 + $0x90] sm:$0xff] %vm336_vm0, %v5905_v13  ;;  %5938 = vst.msk [vmem:[%s9768_s22 + $0x98] sm:$0xff] %vm336_vm0, %v5906_v27 }
 0x54f   : > { %5939 = vst.msk [vmem:[%s9768_s22 + $0xa0] sm:$0xff] %vm336_vm0, %v5907_v12  ;;  %5940 = vst.msk [vmem:[%s9768_s22 + $0xa8] sm:$0xff] %vm336_vm0, %v5908_v48 }
 0x550   : > { %5941 = vst.msk [vmem:[%s9768_s22 + $0xb0] sm:$0xff] %vm336_vm0, %v5909_v37  ;;  %5942 = vst.msk [vmem:[%s9768_s22 + $0xb8] sm:$0xff] %vm336_vm0, %v5910_v38 }
 0x551   : > { %5943 = vst.msk [vmem:[%s9768_s22 + $0xc0] sm:$0xff] %vm336_vm0, %v5911_v61  ;;  %5944 = vst.msk [vmem:[%s9768_s22 + $0xc8] sm:$0xff] %vm336_vm0, %v5912_v26 }
 0x552   : > { %5945 = vst.msk [vmem:[%s9768_s22 + $0xd0] sm:$0xff] %vm336_vm0, %v5913_v25  ;;  %5946 = vst.msk [vmem:[%s9768_s22 + $0xd8] sm:$0xff] %vm336_vm0, %v5914_v58 }
 0x553   : > { %5947 = vst.msk [vmem:[%s9768_s22 + $0xe0] sm:$0xff] %vm336_vm0, %v5915_v14  ;;  %5948 = vst.msk [vmem:[%s9768_s22 + $0xe8] sm:$0xff] %vm336_vm0, %v5916_v42 }
 0x554   : > { %5949 = vst.msk [vmem:[%s9768_s22 + $0xf0] sm:$0xff] %vm336_vm0, %v5917_v7  ;;  %5950 = vst.msk [vmem:[%s9768_s22 + $0xf8] sm:$0xff] %vm336_vm0, %v5918_v8 }
 0x555 PF: > { %s19_s30 = sadd.s32 1, %s6522_s30  }
 0x556   : > { %p16_p4 = scmp.ge.s32.totalorder %s19_s30, 4  }
 0x558   :  { %18 = sbr.rel (!%p16_p4) target bundleno = 1 (0x1), region = 86 }

</bundles_post_ra>
